<compile_context>
chip_gen: v7x
topology: tpu7x:2x2x1
jax: 0.10.0
libtpu: 0.0.40
codegen_flags: <defaults>
</compile_context>

<pallas_src>
import functools

import jax
import jax.numpy as jnp
from jax.experimental import pallas as pl
from jax.experimental.pallas import tpu as pltpu

# Mirrors the module-level BATCH_SIZE constant (scaled down for the demo).
BATCH_SIZE = 256
_LANE = 128


def _text_sentiment_kernel(ids_ref, emb_ref, w_ref, b_ref, o_ref, *, c):
    """Whole-batch forward in a single block.

    ids_ref : [B, c]   int32  token ids; row b holds its c consecutive tokens
    emb_ref : [V, D]   bf16   embedding table (fully VMEM-resident)
    w_ref   : [D, P]   f32    fc weight transposed, zero-padded to P=128 lanes
    b_ref   : [1, P]   f32    fc bias, zero-padded
    o_ref   : [B, P]   f32    lane-dense padded output (slice [:, :num_class] outside)
    """
    B, _ = ids_ref.shape
    V, _ = emb_ref.shape

    ids = ids_ref[...]                                        # [B, c] int32
    vocab = jax.lax.broadcasted_iota(jnp.int32, (B, V), 1)    # [B, V] int32

    # counts[b, v] = number of occurrences of token v among row b's c tokens.
    # c is a Python int at trace time, so this is a small static unrolled loop.
    counts = jnp.zeros((B, V), jnp.float32)
    for j in range(c):
        tok = ids[:, j:j + 1]                                 # [B, 1]
        counts = counts + jnp.where(tok == vocab, 1.0, 0.0)

    # avg_pool1d(kernel_size=c) over consecutive tokens == (counts / c) @ table.
    # bf16 MXU inputs, f32 accumulation. Integer counts <= c are exact in bf16
    # for c <= 256 (fine here; keep counts f32 in the dot for larger c).
    pooled = jnp.dot(counts.astype(jnp.bfloat16), emb_ref[...],
                     preferred_element_type=jnp.float32) * (1.0 / c)   # [B, D] f32

    out = jnp.dot(pooled, w_ref[...], preferred_element_type=jnp.float32)
    o_ref[...] = out + b_ref[...]


def text_sentiment_forward(text, emb_table, fc_w, fc_b, *, batch_size=BATCH_SIZE):
    """text: int32 [N] token ids. Returns [batch_size, num_class] float32."""
    num_class, embed_dim = fc_w.shape
    vocab_size = emb_table.shape[0]
    n = text.shape[0]
    c = n // batch_size
    if c == 0:
        raise ValueError(f"need at least batch_size={batch_size} tokens, got {n}")

    # Truncate and arrange so row b holds its c consecutive tokens (matches the
    # PyTorch transpose + avg_pool1d(kernel_size=c) window layout).
    ids = text[: batch_size * c].reshape(batch_size, c).astype(jnp.int32)

    npad = pl.cdiv(num_class, _LANE) * _LANE
    emb_bf16 = emb_table.astype(jnp.bfloat16)
    w_pad = jnp.zeros((embed_dim, npad), jnp.float32)
    w_pad = w_pad.at[:, :num_class].set(fc_w.T.astype(jnp.float32))
    b_pad = jnp.zeros((1, npad), jnp.float32)
    b_pad = b_pad.at[:, :num_class].set(fc_b.astype(jnp.float32))

    kernel = functools.partial(_text_sentiment_kernel, c=c)

    out_pad = pl.pallas_call(
        kernel,
        out_shape=jax.ShapeDtypeStruct((batch_size, npad), jnp.float32),
        grid=(1,),
        in_specs=[
            pl.BlockSpec((batch_size, c), lambda i: (0, 0)),          # token ids
            pl.BlockSpec((vocab_size, embed_dim), lambda i: (0, 0)),  # emb table
            pl.BlockSpec((embed_dim, npad), lambda i: (0, 0)),        # fc weight
            pl.BlockSpec((1, npad), lambda i: (0, 0)),                # fc bias
        ],
        out_specs=pl.BlockSpec((batch_size, npad), lambda i: (0, 0)),
        compiler_params=pltpu.CompilerParams(
            dimension_semantics=("arbitrary",)),
    )(ids, emb_bf16, w_pad, b_pad)

    return out_pad[:, :num_class]


if __name__ == "__main__":
    vocab_size, embed_dim, num_class = 1000, 32, 4
    initrange = 0.5

    key = jax.random.PRNGKey(0)
    k_emb, k_fc, k_txt = jax.random.split(key, 3)

    # Deterministic parameter init matching init_weights(): U(-0.5, 0.5), zero bias.
    emb_table = jax.random.uniform(k_emb, (vocab_size, embed_dim),
                                   jnp.float32, -initrange, initrange)
    fc_w = jax.random.uniform(k_fc, (num_class, embed_dim),
                              jnp.float32, -initrange, initrange)
    fc_b = jnp.zeros((num_class,), jnp.float32)

    # Flat token stream; 2 extra tokens exercise the truncation to BATCH_SIZE*c.
    c = 3
    n_tokens = BATCH_SIZE * c + 2
    text = jax.random.randint(k_txt, (n_tokens,), 0, vocab_size, dtype=jnp.int32)

    out = text_sentiment_forward(text, emb_table, fc_w, fc_b)
    out = jax.block_until_ready(out)

    # Pure-JAX f32 reference (mean-then-dot, like the PyTorch module).
    ids = text[: BATCH_SIZE * c]
    ref = (jnp.take(emb_table, ids, axis=0)
           .reshape(BATCH_SIZE, c, embed_dim)
           .mean(axis=1) @ fc_w.T + fc_b)
    assert out.shape == (BATCH_SIZE, num_class)
    # Embedding table is bf16 inside the kernel (~1e-3 abs rounding per entry);
    # FC stays f32, so 2e-2 comfortably covers the worst case.
    assert jnp.allclose(out, ref, atol=2e-2, rtol=2e-2), "mismatch vs reference"

    print("KERNEL_OK")
</pallas_src>

<mosaic_0001>
module attributes {stable_mosaic.version = 11 : i64} {
  func.func @_text_sentiment_kernel(%arg0: i32, %arg1: memref<256x3xi32, #tpu.memory_space<vmem>>, %arg2: memref<1000x32xbf16, #tpu.memory_space<vmem>>, %arg3: memref<32x128xf32, #tpu.memory_space<vmem>>, %arg4: memref<1x128xf32, #tpu.memory_space<vmem>>, %arg5: memref<256x128xf32, #tpu.memory_space<vmem>>) attributes {dimension_semantics = [#tpu.dimension_semantics<arbitrary>], iteration_bounds = array<i64: 1>, scalar_prefetch = 0 : i64, scratch_operands = 0 : i64, tpu.core_type = #tpu.core_type<tc>, window_params = [{pipeline_mode = #tpu.pipeline_mode<synchronous>, transform_indices = @transform_0, window_bounds = array<i64: 256, 3>}, {pipeline_mode = #tpu.pipeline_mode<synchronous>, transform_indices = @transform_1, window_bounds = array<i64: 1000, 32>}, {pipeline_mode = #tpu.pipeline_mode<synchronous>, transform_indices = @transform_2, window_bounds = array<i64: 32, 128>}, {pipeline_mode = #tpu.pipeline_mode<synchronous>, transform_indices = @transform_3, window_bounds = array<i64: 1, 128>}, {pipeline_mode = #tpu.pipeline_mode<synchronous>, transform_indices = @transform_4, window_bounds = array<i64: 256, 128>}]} {
    %c0 = arith.constant 0 : index
    %c0_0 = arith.constant 0 : index
    %0 = vector.load %arg1[%c0, %c0_0] : memref<256x3xi32, #tpu.memory_space<vmem>>, vector<256x3xi32>
    %1 = tpu.iota {dimensions = array<i32: 1>} : vector<256x1000xi32>
    %cst = arith.constant 0.000000e+00 : f32
    %2 = vector.broadcast %cst : f32 to vector<256x1000xf32>
    %3 = vector.extract_strided_slice %0 {offsets = [0, 0], sizes = [256, 1], strides = [1, 1]} : vector<256x3xi32> to vector<256x1xi32>
    %4 = vector.broadcast %3 : vector<256x1xi32> to vector<256x1000xi32>
    %5 = arith.cmpi eq, %4, %1 : vector<256x1000xi32>
    %cst_1 = arith.constant 1.000000e+00 : f32
    %cst_2 = arith.constant 0.000000e+00 : f32
    %6 = vector.broadcast %cst_1 : f32 to vector<256x1000xf32>
    %7 = vector.broadcast %cst_2 : f32 to vector<256x1000xf32>
    %8 = arith.select %5, %6, %7 : vector<256x1000xi1>, vector<256x1000xf32>
    %9 = arith.addf %2, %8 : vector<256x1000xf32>
    %10 = vector.extract_strided_slice %0 {offsets = [0, 1], sizes = [256, 1], strides = [1, 1]} : vector<256x3xi32> to vector<256x1xi32>
    %11 = vector.broadcast %10 : vector<256x1xi32> to vector<256x1000xi32>
    %12 = arith.cmpi eq, %11, %1 : vector<256x1000xi32>
    %cst_3 = arith.constant 1.000000e+00 : f32
    %cst_4 = arith.constant 0.000000e+00 : f32
    %13 = vector.broadcast %cst_3 : f32 to vector<256x1000xf32>
    %14 = vector.broadcast %cst_4 : f32 to vector<256x1000xf32>
    %15 = arith.select %12, %13, %14 : vector<256x1000xi1>, vector<256x1000xf32>
    %16 = arith.addf %9, %15 : vector<256x1000xf32>
    %17 = vector.extract_strided_slice %0 {offsets = [0, 2], sizes = [256, 1], strides = [1, 1]} : vector<256x3xi32> to vector<256x1xi32>
    %18 = vector.broadcast %17 : vector<256x1xi32> to vector<256x1000xi32>
    %19 = arith.cmpi eq, %18, %1 : vector<256x1000xi32>
    %cst_5 = arith.constant 1.000000e+00 : f32
    %cst_6 = arith.constant 0.000000e+00 : f32
    %20 = vector.broadcast %cst_5 : f32 to vector<256x1000xf32>
    %21 = vector.broadcast %cst_6 : f32 to vector<256x1000xf32>
    %22 = arith.select %19, %20, %21 : vector<256x1000xi1>, vector<256x1000xf32>
    %23 = arith.addf %16, %22 : vector<256x1000xf32>
    %24 = arith.truncf %23 : vector<256x1000xf32> to vector<256x1000xbf16>
    %c0_7 = arith.constant 0 : index
    %c0_8 = arith.constant 0 : index
    %25 = vector.load %arg2[%c0_7, %c0_8] : memref<1000x32xbf16, #tpu.memory_space<vmem>>, vector<1000x32xbf16>
    %cst_9 = arith.constant dense<0.000000e+00> : vector<256x32xf32>
    %26 = tpu.matmul %24, %25, %cst_9 {dimension_numbers = #tpu.dot_dimension_numbers<[1], [0], [0], [1], [0, 0, 1, 1], [], []>} : vector<256x1000xbf16>, vector<1000x32xbf16>, vector<256x32xf32> -> vector<256x32xf32>
    %cst_10 = arith.constant 0.333333343 : f32
    %27 = vector.broadcast %cst_10 : f32 to vector<256x32xf32>
    %28 = arith.mulf %26, %27 : vector<256x32xf32>
    %c0_11 = arith.constant 0 : index
    %c0_12 = arith.constant 0 : index
    %29 = vector.load %arg3[%c0_11, %c0_12] : memref<32x128xf32, #tpu.memory_space<vmem>>, vector<32x128xf32>
    %cst_13 = arith.constant dense<0.000000e+00> : vector<256x128xf32>
    %30 = tpu.matmul %28, %29, %cst_13 {dimension_numbers = #tpu.dot_dimension_numbers<[1], [0], [0], [1], [0, 0, 1, 1], [], []>} : vector<256x32xf32>, vector<32x128xf32>, vector<256x128xf32> -> vector<256x128xf32>
    %c0_14 = arith.constant 0 : index
    %c0_15 = arith.constant 0 : index
    %31 = vector.load %arg4[%c0_14, %c0_15] : memref<1x128xf32, #tpu.memory_space<vmem>>, vector<1x128xf32>
    %32 = vector.broadcast %31 : vector<1x128xf32> to vector<256x128xf32>
    %33 = arith.addf %30, %32 : vector<256x128xf32>
    %c0_16 = arith.constant 0 : index
    %c0_17 = arith.constant 0 : index
    %34 = vector.load %arg5[%c0_16, %c0_17] : memref<256x128xf32, #tpu.memory_space<vmem>>, vector<256x128xf32>
    tpu.vector_store %arg5[%c0_16, %c0_17], %33 {strides = array<i32>} : memref<256x128xf32, #tpu.memory_space<vmem>>, vector<256x128xf32>,
    return
  }
  func.func @transform_0(%arg0: i32) -> (i32, i32) {
    %c0_i32 = arith.constant 0 : i32
    %c0_i32_0 = arith.constant 0 : i32
    %c0_i32_1 = arith.constant 0 : i32
    return %c0_i32, %c0_i32_0 : i32, i32
  }
  func.func @transform_1(%arg0: i32) -> (i32, i32) {
    %c0_i32 = arith.constant 0 : i32
    %c0_i32_0 = arith.constant 0 : i32
    %c0_i32_1 = arith.constant 0 : i32
    return %c0_i32, %c0_i32_0 : i32, i32
  }
  func.func @transform_2(%arg0: i32) -> (i32, i32) {
    %c0_i32 = arith.constant 0 : i32
    %c0_i32_0 = arith.constant 0 : i32
    %c0_i32_1 = arith.constant 0 : i32
    return %c0_i32, %c0_i32_0 : i32, i32
  }
  func.func @transform_3(%arg0: i32) -> (i32, i32) {
    %c0_i32 = arith.constant 0 : i32
    %c0_i32_0 = arith.constant 0 : i32
    %c0_i32_1 = arith.constant 0 : i32
    return %c0_i32, %c0_i32_0 : i32, i32
  }
  func.func @transform_4(%arg0: i32) -> (i32, i32) {
    %c0_i32 = arith.constant 0 : i32
    %c0_i32_0 = arith.constant 0 : i32
    %c0_i32_1 = arith.constant 0 : i32
    return %c0_i32, %c0_i32_0 : i32, i32
  }
}

</mosaic_0001>

<bundles_post_ra>
// kernel: tpu_custom_call.1
= control target key start
LH: loop header
LB: loop body
LE: loop exit
PB: predicated region body
PF: predicated region fallthrough
CT: control target
= control target key end

     0   :  { %v9655_v1 = vmov 2   ;;  %v9657_v2 = vmov 1   ;;  %v9653_v13 = vmov 0   ;;  %s9648_s0 = inlined_call_operand.vmem [shape: s32[256,3], index: 0, kind: input, shape index: {}]   ;;  %s9649_s1 = inlined_call_operand.vmem [shape: bf16[1000,32], index: 1, kind: input, shape index: {}]   ;;  %s9650_s2 = inlined_call_operand.vmem [shape: f32[32,128], index: 2, kind: input, shape index: {}]   ;;  %s9651_s3 = inlined_call_operand.vmem [shape: f32[1,128], index: 3, kind: input, shape index: {}]   ;;  %s9652_s4 = inlined_call_operand.hbm [shape: f32[256,128], index: 4, kind: output, shape index: {}]  }
   0x1   :  { %v43_v0 = vld [vmem:[%s9648_s0 + $0xc0] sm:$0xff]  ;;  %4962 = vset.pattern.permute.xlu0 %v9655_v1  ;;  %4961 = vset.pattern.permute.xlu1 %v9657_v2  ;;  %v45_v3 = vld [vmem:[%s9648_s0 + $0xd0] sm:$0xff]  ;;  %v44_v4 = vld [vmem:[%s9648_s0 + $0xc8] sm:$0xff] }
   0x2   :  { %1861 = vperm.xlu0 %4962, %v43_v0   ;;  %997 = vperm.xlu1 %4961, %v43_v0   ;;  %v5156_v5 = vld [vmem:[%s9648_s0 + $0xe0] sm:$0xff]  ;;  %v5017_v8 = vld [vmem:[%s9649_s1 + $0x48] sm:$0xff]   ;;  %v5019_v10 = vld [vmem:[%s9649_s1 + $0x50] sm:$0xff]  }
   0x3   :  { %v5015_v6 = vld [vmem:[%s9649_s1 + $0x40] sm:$0xff]   ;;  %v5018_v9 = vld [vmem:[%s9649_s1 + $0x8] sm:$0xff]   ;;  %v5020_v11 = vld [vmem:[%s9649_s1 + $0x10] sm:$0xff]  }
   0x4   :  { %v5016_v7 = vld [vmem:[%s9649_s1] sm:$0xff]   ;;  %4938 = vmatprep.subr.bf16.mxu1 %v5015_v6  ;;  %4502 = vmatprep.subr.bf16.mxu0 %v5015_v6  ;;  %v5021_v12 = vld [vmem:[%s9649_s1 + $0x58] sm:$0xff]   ;;  %v5025_v18 = vld [vmem:[%s9649_s1 + $0x68] sm:$0xff]  }
   0x5   :  { %4946 = vmatpush3.bf16.msra.mxu1 %v5016_v7  ;;  %4503 = vmatpush3.bf16.msra.mxu0 %v5016_v7  ;;  %v5022_v14 = vld [vmem:[%s9649_s1 + $0x18] sm:$0xff]   ;;  %v5023_v15 = vld [vmem:[%s9649_s1 + $0x60] sm:$0xff]   ;;  %v48_v19 = vld [vmem:[%s9648_s0 + $0xe8] sm:$0xff] }
   0x6   :  { %1867 = vperm.xlu0 %4962, %v45_v3   ;;  %1000 = vperm.xlu1 %4961, %v44_v4   ;;  %v46_v16 = vld [vmem:[%s9648_s0 + $0xd8] sm:$0xff]  ;;  %v5024_v17 = vld [vmem:[%s9649_s1 + $0x20] sm:$0xff]   ;;  %v5026_v20 = vld [vmem:[%s9649_s1 + $0x28] sm:$0xff]  }
   0x7   :  { %4939 = vmatprep.subr.bf16.mxu1 %v5017_v8  ;;  %4504 = vmatprep.subr.bf16.mxu0 %v5017_v8  ;;  %v5027_v21 = vld [vmem:[%s9649_s1 + $0x70] sm:$0xff]   ;;  %v50_v22 = vld [vmem:[%s9648_s0 + $0xf8] sm:$0xff]  ;;  %v20_v25 = vld [vmem:[%s9648_s0 + $0x8] sm:$0xff] }
   0x8   :  { %v5028_v23 = vld [vmem:[%s9649_s1 + $0x30] sm:$0xff]   ;;  %v5029_v24 = vld [vmem:[%s9649_s1 + $0x78] sm:$0xff]   ;;  %v5234_v28 = vld [vmem:[%s9648_s0 + $0x28] sm:$0xff] }
   0x9   :  { %4947 = vmatpush3.bf16.msra.mxu1 %v5018_v9  ;;  %4505 = vmatpush3.bf16.msra.mxu0 %v5018_v9  ;;  %v5030_v26 = vld [vmem:[%s9649_s1 + $0x38] sm:$0xff]   ;;  %v49_v30 = vld [vmem:[%s9648_s0 + $0xf0] sm:$0xff] }
   0xa   :  { %1873 = vperm.xlu0 %4962, %v5156_v5   ;;  %4963 = vset.pattern.permute.xlu1 %v9655_v1  ;;  %v5228_v27 = vld [vmem:[%s9648_s0 + $0x18] sm:$0xff] }
   0xb   :  { %1864 = vperm.xlu1 %4963, %v44_v4   ;;  %4940 = vmatprep.subr.bf16.mxu1 %v5019_v10  ;;  %v5242_v29 = vld [vmem:[%s9648_s0 + $0x38] sm:$0xff] }
   0xc   :  { %4506 = vmatprep.subr.bf16.mxu0 %v5019_v10 }
   0xd   :  { %4948 = vmatpush3.bf16.msra.mxu1 %v5020_v11  ;;  %4507 = vmatpush3.bf16.msra.mxu0 %v5020_v11 }
   0xe   :  { %4969 = vset.pattern.permute.xlu0 %v9653_v13  ;;  %4941 = vmatprep.subr.bf16.mxu1 %v5021_v12 }
   0xf   :  { %133 = vperm.xlu0 %4969, %v43_v0   ;;  %4964 = vset.pattern.permute.xlu1 %v9653_v13 }
  0x10   :  { %139 = vperm.xlu1 %4964, %v45_v3   ;;  %4508 = vmatprep.subr.bf16.mxu0 %v5021_v12 }
  0x11   :  { %4949 = vmatpush3.bf16.msra.mxu1 %v5022_v14  ;;  %4509 = vmatpush3.bf16.msra.mxu0 %v5022_v14 }
  0x12   :  { %4942 = vmatprep.subr.bf16.mxu1 %v5023_v15  ;;  %4510 = vmatprep.subr.bf16.mxu0 %v5023_v15 }
  0x13   :  { %136 = vperm.xlu0 %4969, %v44_v4  }
  0x14   :  { %4965 = vset.pattern.permute.xlu1 %v9657_v2 }
  0x15   :  { %1003 = vperm.xlu1 %4965, %v45_v3   ;;  %4950 = vmatpush3.bf16.msra.mxu1 %v5024_v17 }
  0x16   :  { %4943 = vmatprep.subr.bf16.mxu1 %v5025_v18  ;;  %4511 = vmatpush3.bf16.msra.mxu0 %v5024_v17 }
  0x17   :  { %142 = vperm.xlu0 %4969, %v46_v16   ;;  %4512 = vmatprep.subr.bf16.mxu0 %v5025_v18 }
  0x19   :  { %1006 = vperm.xlu1 %4965, %v46_v16   ;;  %4951 = vmatpush3.bf16.msra.mxu1 %v5026_v20 }
  0x1a   :  { %4944 = vmatprep.subr.bf16.mxu1 %v5027_v21  ;;  %4513 = vmatpush3.bf16.msra.mxu0 %v5026_v20 }
  0x1b   :  { %148 = vperm.xlu0 %4969, %v48_v19   ;;  %4514 = vmatprep.subr.bf16.mxu0 %v5027_v21 }
  0x1d   :  { %4966 = vset.pattern.permute.xlu1 %v9655_v1  ;;  %4952 = vmatpush3.bf16.msra.mxu1 %v5028_v23 }
  0x1e   :  { %1870 = vperm.xlu1 %4966, %v46_v16   ;;  %4945 = vmatprep.subr.bf16.mxu1 %v5029_v24 }
  0x1f   :  { %154 = vperm.xlu0 %4969, %v50_v22   ;;  %4515 = vmatpush3.bf16.msra.mxu0 %v5028_v23 }
  0x20   :  { %4516 = vmatprep.subr.bf16.mxu0 %v5029_v24 }
  0x21   :  { %4953 = vmatpush3.bf16.msra.mxu1 %v5030_v26 }
  0x22   :  { %4967 = vset.pattern.permute.xlu1 %v9653_v13 }
  0x23   :  { %145 = vperm.xlu1 %4967, %v5156_v5   ;;  %64 = vperm.xlu0 %4969, %v20_v25  }
  0x24   :  { %4517 = vmatpush3.bf16.msra.mxu0 %v5030_v26 }
  0x27   :  { %4968 = vset.pattern.permute.xlu1 %v9657_v2  ;;  %70 = vperm.xlu0 %4969, %v5228_v27  }
  0x28   :  { %1009 = vperm.xlu1 %4968, %v5156_v5  }
  0x2b   :  { %76 = vperm.xlu0 %4969, %v5234_v28  }
  0x2c   :  { %1012 = vperm.xlu1 %4968, %v48_v19  }
  0x2f   :  { %82 = vperm.xlu0 %4969, %v5242_v29  }
  0x30   :  { %4970 = vset.pattern.permute.xlu1 %v9655_v1 }
  0x31   :  { %1876 = vperm.xlu1 %4970, %v48_v19  }
  0x33   :  { %4984 = vset.pattern.permute.xlu0 %v9655_v1 }
  0x34   :  { %1879 = vperm.xlu0 %4984, %v49_v30  }
  0x35   :  { %4971 = vset.pattern.permute.xlu1 %v9653_v13 }
  0x36   :  { %151 = vperm.xlu1 %4971, %v49_v30  }
  0x37   :  { %9 = vsyncpa [#allocation3], 0  ;;  %v19_v31 = vld [vmem:[%s9648_s0] sm:$0xff]  ;;  %v21_v32 = vld [vmem:[%s9648_s0 + $0x10] sm:$0xff]  ;;  %v51_v48 = vlaneseq  ;;  %v9852_v58 = vmov 0.0  }
  0x38   :  { %1789 = vperm.xlu0 %4984, %v19_v31   ;;  %v5031_v33 = vld [vmem:[%s9649_s1 + $0xc0] sm:$0xff]   ;;  %v5269_v35 = vld [vmem:[%s9648_s0 + $0x30] sm:$0xff]  ;;  %v5295_v39 = vld [vmem:[%s9648_s0 + $0x48] sm:$0xff] }
  0x39   :  { %4614 = vmatprep.subr.bf16.mxu1 %v5031_v33  ;;  %v23_v34 = vld [vmem:[%s9648_s0 + $0x20] sm:$0xff]  ;;  %v5282_v37 = vld [vmem:[%s9648_s0 + $0x50] sm:$0xff]  ;;  %v5303_v40 = vld [vmem:[%s9648_s0 + $0x58] sm:$0xff]  ;;  %v5346_v49 = vand.u32 127, %v51_v48 }
  0x3a   :  { %4972 = vset.pattern.permute.xlu1 %v9657_v2  ;;  %v5275_v36 = vld [vmem:[%s9648_s0 + $0x40] sm:$0xff]  ;;  %v5309_v41 = vld [vmem:[%s9648_s0 + $0x68] sm:$0xff]  ;;  %v5316_v42 = vld [vmem:[%s9648_s0 + $0x78] sm:$0xff] }
  0x3b   :  { %1015 = vperm.xlu1 %4972, %v49_v30   ;;  %v5289_v38 = vld [vmem:[%s9648_s0 + $0x60] sm:$0xff]  ;;  %v36_v43 = vld [vmem:[%s9648_s0 + $0x88] sm:$0xff]  ;;  %v38_v44 = vld [vmem:[%s9648_s0 + $0x98] sm:$0xff]  ;;  %v5350_v50 = vadd.s32 128, %v5346_v49  ;;  %v5359_v53 = vadd.s32 384, %v5346_v49  ;;  %v5366_v54 = vadd.s32 256, %v5346_v49 }
  0x3c   :  { %1795 = vperm.xlu0 %4984, %v21_v32   ;;  %v5332_v45 = vld [vmem:[%s9648_s0 + $0x70] sm:$0xff]  ;;  %v35_v46 = vld [vmem:[%s9648_s0 + $0x80] sm:$0xff]  ;;  %v5388_v61 = vadd.s32 640, %v5346_v49  ;;  %v5391_v62 = vadd.s32 512, %v5346_v49  ;;  %v40_v20 = vld [vmem:[%s9648_s0 + $0xa8] sm:$0xff] }
  0x3d   :  { %v37_v47 = vld [vmem:[%s9648_s0 + $0x90] sm:$0xff]  ;;  %v39_v57 = vld [vmem:[%s9648_s0 + $0xa0] sm:$0xff] }
  0x3e   :  { %9884 = vst [vmem:[#allocation9_spill] sm:$0xff] %v5391_v62 }
  0x3f   :  { %1018 = vperm.xlu1 %4972, %v50_v22  }
  0x40   :  { %1801 = vperm.xlu0 %4984, %v23_v34  }
  0x43   :  { %4973 = vset.pattern.permute.xlu1 %v9655_v1 }
  0x44   :  { %1882 = vperm.xlu1 %4973, %v50_v22   ;;  %1807 = vperm.xlu0 %4984, %v5269_v35  }
  0x48   :  { %4974 = vset.pattern.permute.xlu1 %v9653_v13  ;;  %1813 = vperm.xlu0 %4984, %v5275_v36  }
  0x49   :  { %61 = vperm.xlu1 %4974, %v19_v31  }
  0x4c   :  { %1819 = vperm.xlu0 %4984, %v5282_v37  }
  0x4d   :  { %4975 = vset.pattern.permute.xlu1 %v9657_v2 }
  0x4e   :  { %925 = vperm.xlu1 %4975, %v19_v31  }
  0x50   :  { %1825 = vperm.xlu0 %4984, %v5289_v38  }
  0x52   :  { %928 = vperm.xlu1 %4975, %v20_v25  }
  0x54   :  { %4995 = vset.pattern.permute.xlu0 %v9653_v13 }
  0x55   :  { %88 = vperm.xlu0 %4995, %v5295_v39  }
  0x56   :  { %4976 = vset.pattern.permute.xlu1 %v9655_v1 }
  0x57   :  { %1792 = vperm.xlu1 %4976, %v20_v25  }
  0x59   :  { %94 = vperm.xlu0 %4995, %v5303_v40  }
  0x5b   :  { %4977 = vset.pattern.permute.xlu1 %v9653_v13 }
  0x5c   :  { %67 = vperm.xlu1 %4977, %v21_v32  }
  0x5d   :  { %100 = vperm.xlu0 %4995, %v5309_v41  }
  0x60   :  { %4978 = vset.pattern.permute.xlu1 %v9657_v2 }
  0x61   :  { %931 = vperm.xlu1 %4978, %v21_v32   ;;  %106 = vperm.xlu0 %4995, %v5316_v42  }
  0x65   :  { %934 = vperm.xlu1 %4978, %v5228_v27   ;;  %112 = vperm.xlu0 %4995, %v36_v43  }
  0x69   :  { %4979 = vset.pattern.permute.xlu1 %v9655_v1  ;;  %118 = vperm.xlu0 %4995, %v38_v44  }
  0x6a   :  { %1798 = vperm.xlu1 %4979, %v5228_v27  }
  0x6d   :  { %5004 = vset.pattern.permute.xlu0 %v9655_v1 }
  0x6e   :  { %4980 = vset.pattern.permute.xlu1 %v9653_v13  ;;  %1831 = vperm.xlu0 %5004, %v5332_v45  }
  0x6f   :  { %73 = vperm.xlu1 %4980, %v23_v34  }
  0x72   :  { %1837 = vperm.xlu0 %5004, %v35_v46  }
  0x73   :  { %4981 = vset.pattern.permute.xlu1 %v9657_v2 }
  0x74   :  { %937 = vperm.xlu1 %4981, %v23_v34  }
  0x76   :  { %1843 = vperm.xlu0 %5004, %v37_v47  }
  0x78   :  { %940 = vperm.xlu1 %4981, %v5234_v28  }
  0x7a   :  { %1849 = vperm.xlu0 %5004, %v39_v57  }
  0x7c   :  { %4982 = vset.pattern.permute.xlu1 %v9655_v1 }
  0x7d   :  { %1804 = vperm.xlu1 %4982, %v5234_v28  }
  0x7e   :  { %5009 = vset.pattern.permute.xlu0 %v9653_v13 }
  0x7f   :  { %124 = vperm.xlu0 %5009, %v40_v20  }
  0x81   :  { %v5352_v51 = vpop.permute.xlu1 %997  ;;  %4983 = vset.pattern.permute.xlu1 %v9653_v13  ;;  %v5355_v52 = vpop.permute.xlu0 %1861 }
  0x82   :  { %9880 = vst [vmem:[#allocation5_spill] sm:$0xff] %v5352_v51  ;;  %9881 = vst [vmem:[#allocation6_spill] sm:$0xff] %v5355_v52  ;;  %79 = vperm.xlu1 %4983, %v5269_v35   ;;  %vm1213_vm0 = vcmp.eq.s32.totalorder %v5352_v51, %v5350_v50  ;;  %vm2077_vm1 = vcmp.eq.s32.totalorder %v5355_v52, %v5350_v50  ;;  %vm1212_vm2 = vcmp.eq.s32.totalorder %v5352_v51, %v5346_v49 }
  0x83   :  { %vm2076_vm3 = vcmp.eq.s32.totalorder %v5355_v52, %v5346_v49  ;;  %vm1215_vm4 = vcmp.eq.s32.totalorder %v5352_v51, %v5359_v53  ;;  %v1469_v59 = vsel %vm1213_vm0, 1.0, %v9852_v58  ;;  %v5385_v60 = vsel %vm2077_vm1, 1.0, %v9852_v58 }
  0x84   :  { %v1468_v63 = vsel %vm1212_vm2, 1.0, %v9852_v58  ;;  %vm2079_vm5 = vcmp.eq.s32.totalorder %v5355_v52, %v5359_v53  ;;  %vm1214_vm6 = vcmp.eq.s32.totalorder %v5352_v51, %v5366_v54  ;;  %vm2078_vm7 = vcmp.eq.s32.totalorder %v5355_v52, %v5366_v54 }
  0x85   :  { %v5368_v55 = vpop.permute.xlu1 %1000  ;;  %v5370_v56 = vpop.permute.xlu0 %1867  ;;  %v5410_v3 = vsel %vm2076_vm3, 1.0, %v9852_v58  ;;  %v5416_v4 = vsel %vm1215_vm4, 1.0, %v9852_v58  ;;  %v5431_v6 = vsel %vm2079_vm5, 1.0, %v9852_v58  ;;  %v5434_v7 = vsel %vm1214_vm6, 1.0, %v9852_v58 }
  0x86   :  { %9882 = vst [vmem:[#allocation7_spill] sm:$0xff] %v5368_v55  ;;  %9883 = vst [vmem:[#allocation8_spill] sm:$0xff] %v5370_v56  ;;  %4985 = vset.pattern.permute.xlu1 %v9657_v2  ;;  %vm1221_vm8 = vcmp.eq.s32.totalorder %v5368_v55, %v5350_v50  ;;  %vm1220_vm9 = vcmp.eq.s32.totalorder %v5368_v55, %v5346_v49  ;;  %vm2093_vm10 = vcmp.eq.s32.totalorder %v5370_v56, %v5350_v50 }
  0x87   :  { %943 = vperm.xlu1 %4985, %v5269_v35   ;;  %vm2092_vm11 = vcmp.eq.s32.totalorder %v5370_v56, %v5346_v49  ;;  %vm1223_vm12 = vcmp.eq.s32.totalorder %v5368_v55, %v5359_v53  ;;  %vm1222_vm13 = vcmp.eq.s32.totalorder %v5368_v55, %v5366_v54  ;;  %v5437_v8 = vsel %vm2078_vm7, 1.0, %v9852_v58  ;;  %v5044_v55 = vld [vmem:[%s9649_s1 + $0xb0] sm:$0xff]  }
  0x88   :  { %vm2095_vm14 = vcmp.eq.s32.totalorder %v5370_v56, %v5359_v53  ;;  %v1477_v9 = vsel %vm1221_vm8, 1.0, %v9852_v58  ;;  %v1476_v10 = vsel %vm1220_vm9, 1.0, %v9852_v58  ;;  %vm2094_vm0 = vcmp.eq.s32.totalorder %v5370_v56, %v5366_v54 }
  0x89   :  { %v5400_v0 = vpop.permute.xlu0 %1873  ;;  %v5448_v11 = vsel %vm2093_vm10, 1.0, %v9852_v58  ;;  %v5451_v12 = vsel %vm2092_vm11, 1.0, %v9852_v58  ;;  %v5454_v14 = vsel %vm1223_vm12, 1.0, %v9852_v58  ;;  %v5457_v15 = vsel %vm1222_vm13, 1.0, %v9852_v58 }
  0x8a   :  { %9885 = vst [vmem:[#allocation10_spill] sm:$0xff] %v5400_v0  ;;  %v5418_v5 = vpop.permute.xlu1 %1864  ;;  %vm2109_vm15 = vcmp.eq.s32.totalorder %v5400_v0, %v5350_v50  ;;  %vm2108_vm3 = vcmp.eq.s32.totalorder %v5400_v0, %v5346_v49  ;;  %v5468_v17 = vsel %vm2095_vm14, 1.0, %v9852_v58  ;;  %v5487_v21 = vsel %vm2094_vm0, 1.0, %v9852_v58 }
  0x8b   :  { %9886 = vst [vmem:[#allocation11_spill] sm:$0xff] %v5418_v5  ;;  %946 = vperm.xlu1 %4985, %v5242_v29   ;;  %vm2085_vm1 = vcmp.eq.s32.totalorder %v5418_v5, %v5350_v50  ;;  %vm2084_vm2 = vcmp.eq.s32.totalorder %v5418_v5, %v5346_v49  ;;  %v5478_v19 = vsel %vm2109_vm15, 1.0, %v9852_v58  ;;  %v5508_v26 = vsel %vm2108_vm3, 1.0, %v9852_v58 }
  0x8c   :  { %v2341_v24 = vsel %vm2085_vm1, 1.0, %v9852_v58  ;;  %v2340_v25 = vsel %vm2084_vm2, 1.0, %v9852_v58  ;;  %vm2087_vm9 = vcmp.eq.s32.totalorder %v5418_v5, %v5359_v53  ;;  %vm2086_vm13 = vcmp.eq.s32.totalorder %v5418_v5, %v5366_v54 }
  0x8e   :  { %v5459_v16 = vpop.permute.xlu0 %133 }
  0x8f   :  { %9887 = vst [vmem:[#allocation12_spill] sm:$0xff] %v5459_v16  ;;  %v5470_v18 = vpop.permute.xlu1 %139  ;;  %4986 = vset.pattern.permute.xlu1 %v9655_v1  ;;  %vm349_vm4 = vcmp.eq.s32.totalorder %v5459_v16, %v5350_v50  ;;  %vm348_vm5 = vcmp.eq.s32.totalorder %v5459_v16, %v5346_v49  ;;  %vm351_vm8 = vcmp.eq.s32.totalorder %v5459_v16, %v5359_v53 }
  0x90   :  { %9888 = vst [vmem:[#allocation13_spill] sm:$0xff] %v5470_v18  ;;  %1810 = vperm.xlu1 %4986, %v5242_v29   ;;  %v605_v22 = vsel %vm349_vm4, 1.0, %v9852_v58  ;;  %v604_v23 = vsel %vm348_vm5, 1.0, %v9852_v58  ;;  %vm365_vm6 = vcmp.eq.s32.totalorder %v5470_v18, %v5350_v50  ;;  %vm364_vm7 = vcmp.eq.s32.totalorder %v5470_v18, %v5346_v49 }
  0x91   :  { %v1725_v28 = vadd.f32 %v1469_v59, %v605_v22  ;;  %v1724_v29 = vadd.f32 %v1468_v63, %v604_v23  ;;  %vm350_vm10 = vcmp.eq.s32.totalorder %v5459_v16, %v5366_v54  ;;  %v621_v30 = vsel %vm365_vm6, 1.0, %v9852_v58 }
  0x92   :  { %v5512_v27 = vpop.permute.xlu0 %136  ;;  %v620_v31 = vsel %vm364_vm7, 1.0, %v9852_v58  ;;  %v607_v35 = vsel %vm351_vm8, 1.0, %v9852_v58  ;;  %vm367_vm5 = vcmp.eq.s32.totalorder %v5470_v18, %v5359_v53 }
  0x93   :  { %9889 = vst [vmem:[#allocation14_spill] sm:$0xff] %v5512_v27  ;;  %vm357_vm11 = vcmp.eq.s32.totalorder %v5512_v27, %v5350_v50  ;;  %vm356_vm12 = vcmp.eq.s32.totalorder %v5512_v27, %v5346_v49  ;;  %vm359_vm14 = vcmp.eq.s32.totalorder %v5512_v27, %v5359_v53  ;;  %v2589_v47 = vadd.f32 %v5385_v60, %v1725_v28 }
  0x94   :  { %v5526_v32 = vpop.permute.xlu1 %1003  ;;  %4987 = vset.pattern.permute.xlu1 %v9653_v13  ;;  %v613_v33 = vsel %vm357_vm11, 1.0, %v9852_v58  ;;  %v612_v34 = vsel %vm356_vm12, 1.0, %v9852_v58  ;;  %v615_v59 = vsel %vm359_vm14, 1.0, %v9852_v58  ;;  %v1727_v23 = vadd.f32 %v5416_v4, %v607_v35 }
  0x95   :  { %9890 = vst [vmem:[#allocation15_spill] sm:$0xff] %v5526_v32  ;;  %85 = vperm.xlu1 %4987, %v5275_v36   ;;  %v1733_v43 = vadd.f32 %v1477_v9, %v613_v33  ;;  %v1732_v44 = vadd.f32 %v1476_v10, %v612_v34  ;;  %vm1229_vm15 = vcmp.eq.s32.totalorder %v5526_v32, %v5350_v50  ;;  %v606_v35 = vsel %vm350_vm10, 1.0, %v9852_v58 }
  0x96   :  { %vm1228_vm0 = vcmp.eq.s32.totalorder %v5526_v32, %v5346_v49  ;;  %v5542_v46 = vpop.permute.xlu0 %142  ;;  %v1485_v48 = vsel %vm1229_vm15, 1.0, %v9852_v58  ;;  %v2588_v9 = vadd.f32 %v5410_v3, %v1724_v29  ;;  %v5032_v3 = vld [vmem:[%s9649_s1 + $0x80] sm:$0xff]   ;;  %vm358_vm8 = vcmp.eq.s32.totalorder %v5512_v27, %v5366_v54 }
  0x97   :  { %9891 = vst [vmem:[#allocation16_spill] sm:$0xff] %v5542_v46  ;;  %v1484_v57 = vsel %vm1228_vm0, 1.0, %v9852_v58  ;;  %v2597_v63 = vadd.f32 %v2341_v24, %v1733_v43  ;;  %v2596_v10 = vadd.f32 %v2340_v25, %v1732_v44  ;;  %vm373_vm1 = vcmp.eq.s32.totalorder %v5542_v46, %v5350_v50 }
  0x98   :  { %v5551_v20 = vpop.permute.xlu1 %1006  ;;  %v1741_v22 = vadd.f32 %v1485_v48, %v621_v30  ;;  %vm372_vm2 = vcmp.eq.s32.totalorder %v5542_v46, %v5346_v49  ;;  %v1740_v60 = vadd.f32 %v1484_v57, %v620_v31  ;;  %v1735_v24 = vadd.f32 %v5454_v14, %v615_v59  ;;  %v5033_v30 = vld [vmem:[%s9649_s1 + $0xc8] sm:$0xff]   ;;  %v42_v31 = vld [vmem:[%s9648_s0 + $0xb8] sm:$0xff] }
  0x99   :  { %9892 = vst [vmem:[#allocation17_spill] sm:$0xff] %v5551_v20  ;;  %4988 = vset.pattern.permute.xlu1 %v9657_v2  ;;  %v2749_v28 = vpack.c.bf16 %v2597_v63, %v2589_v47  ;;  %v2748_v33 = vpack.c.bf16 %v2596_v10, %v2588_v9  ;;  %vm1237_vm3 = vcmp.eq.s32.totalorder %v5551_v20, %v5350_v50  ;;  %v629_v29 = vsel %vm373_vm1, 1.0, %v9852_v58  ;;  %v5034_v59 = vld [vmem:[%s9649_s1 + $0x88] sm:$0xff]   ;;  %v5035_v63 = vld [vmem:[%s9649_s1 + $0xd0] sm:$0xff]  }
  0x9a   :  { %949 = vperm.xlu1 %4988, %v5275_v36   ;;  %v5564_v25 = vpop.permute.xlu0 %148  ;;  %v1493_v4 = vsel %vm1237_vm3, 1.0, %v9852_v58  ;;  %vm1236_vm4 = vcmp.eq.s32.totalorder %v5551_v20, %v5346_v49  ;;  %v2343_v36 = vsel %vm2087_vm9, 1.0, %v9852_v58  ;;  %v628_v14 = vsel %vm372_vm2, 1.0, %v9852_v58  ;;  %130 = vperm.xlu0 %5009, %v42_v31  }
  0x9b   :  { %9893 = vst [vmem:[#allocation18_spill] sm:$0xff] %v5564_v25  ;;  %3461 = vmatprep.mubr.bf16.mxu1 %v2749_v28  ;;  %v1492_v34 = vsel %vm1236_vm4, 1.0, %v9852_v58  ;;  %v2605_v43 = vadd.f32 %v5448_v11, %v1741_v22  ;;  %vm389_vm6 = vcmp.eq.s32.totalorder %v5564_v25, %v5350_v50  ;;  %vm388_vm7 = vcmp.eq.s32.totalorder %v5564_v25, %v5346_v49  ;;  %v41_v28 = vld [vmem:[%s9648_s0 + $0xb0] sm:$0xff] }
  0x9c   :  { %3462 = vmatmul.mubr.bf16.vlgmr.msra.gmra.mrb[0].mxu1 %v2748_v33  ;;  %v5597_v44 = vadd.f32 %v5431_v6, %v1727_v23  ;;  %v1749_v48 = vadd.f32 %v1493_v4, %v629_v29  ;;  %v2604_v57 = vadd.f32 %v5451_v12, %v1740_v60  ;;  %v5605_v11 = vadd.f32 %v2343_v36, %v1735_v24 }
  0x9d   :  { %v5599_v47 = vpop.permute.xlu1 %1870  ;;  %4615 = vmatpush3.bf16.msra.mxu1 %v5032_v3  ;;  %v1748_v6 = vadd.f32 %v1492_v34, %v628_v14  ;;  %v2342_v9 = vsel %vm2086_vm13, 1.0, %v9852_v58  ;;  %v5629_v60 = vsel %vm389_vm6, 1.0, %v9852_v58  ;;  %v5635_v23 = vsel %vm388_vm7, 1.0, %v9852_v58  ;;  %v5036_v14 = vld [vmem:[%s9649_s1 + $0x90] sm:$0xff]  }
  0x9e   :  { %9894 = vst [vmem:[#allocation19_spill] sm:$0xff] %v5597_v44  ;;  %9895 = vst [vmem:[#allocation20_spill] sm:$0xff] %v5599_v47  ;;  %952 = vperm.xlu1 %4988, %v5295_v39   ;;  %vm2101_vm9 = vcmp.eq.s32.totalorder %v5599_v47, %v5350_v50  ;;  %vm2100_vm10 = vcmp.eq.s32.totalorder %v5599_v47, %v5346_v49  ;;  %v5614_v12 = vpop.permute.xlu0 %154  ;;  %4616 = vmatprep.subr.bf16.mxu1 %v5033_v30  ;;  %v614_v24 = vsel %vm358_vm8, 1.0, %v9852_v58 }
  0x9f   :  { %9896 = vst [vmem:[#allocation21_spill] sm:$0xff] %v5605_v11  ;;  %9897 = vst [vmem:[#allocation22_spill] sm:$0xff] %v5614_v12  ;;  %v2357_v10 = vsel %vm2101_vm9, 1.0, %v9852_v58  ;;  %v2356_v22 = vsel %vm2100_vm10, 1.0, %v9852_v58  ;;  %5013 = vset.pattern.permute.xlu0 %v9655_v1  ;;  %vm366_vm11 = vcmp.eq.s32.totalorder %v5470_v18, %v5366_v54  ;;  %v1726_v29 = vadd.f32 %v5434_v7, %v606_v35  ;;  %v5037_v35 = vld [vmem:[%s9649_s1 + $0xd8] sm:$0xff]  }
  0xa0   :  { %v2613_v33 = vadd.f32 %v2357_v10, %v1749_v48  ;;  %v2612_v3 = vadd.f32 %v2356_v22, %v1748_v6  ;;  %1855 = vperm.xlu0 %5013, %v41_v28   ;;  %vm405_vm12 = vcmp.eq.s32.totalorder %v5614_v12, %v5350_v50  ;;  %vm404_vm13 = vcmp.eq.s32.totalorder %v5614_v12, %v5346_v49 }
  0xa1   :  { %4617 = vmatpush3.bf16.msra.mxu1 %v5034_v59  ;;  %vm375_vm14 = vcmp.eq.s32.totalorder %v5542_v46, %v5359_v53  ;;  %v623_v34 = vsel %vm367_vm5, 1.0, %v9852_v58  ;;  %vm1231_vm15 = vcmp.eq.s32.totalorder %v5526_v32, %v5359_v53  ;;  %v5691_v48 = vsel %vm404_vm13, 1.0, %v9852_v58 }
  0xa2   :  { %v5656_v30 = vpop.permute.xlu1 %145  ;;  %4989 = vset.pattern.permute.xlu1 %v9655_v1  ;;  %v2757_v31 = vpack.c.bf16 %v2613_v33, %v2605_v43  ;;  %v2756_v36 = vpack.c.bf16 %v2612_v3, %v2604_v57  ;;  %v5659_v7 = vpop.permute.xlu0 %64  ;;  %4618 = vmatprep.subr.bf16.mxu1 %v5035_v63  ;;  %v1734_v43 = vadd.f32 %v5457_v15, %v614_v24  ;;  %v5705_v59 = vsel %vm375_vm14, 1.0, %v9852_v58  ;;  %v5039_v33 = vld [vmem:[%s9649_s1 + $0xe0] sm:$0xff]  }
  0xa3   :  { %9898 = vst [vmem:[#allocation23_spill] sm:$0xff] %v5656_v30  ;;  %9899 = vst [vmem:[#allocation24_spill] sm:$0xff] %v5659_v7  ;;  %1816 = vperm.xlu1 %4989, %v5295_v39   ;;  %vm381_vm0 = vcmp.eq.s32.totalorder %v5656_v30, %v5350_v50  ;;  %vm380_vm1 = vcmp.eq.s32.totalorder %v5656_v30, %v5346_v49  ;;  %vm165_vm2 = vcmp.eq.s32.totalorder %v5659_v7, %v5350_v50 }
  0xa4   :  { %3469 = vmatprep.mubr.bf16.mxu1 %v2757_v31  ;;  %v5685_v39 = vsel %vm405_vm12, 1.0, %v9852_v58  ;;  %vm167_vm3 = vcmp.eq.s32.totalorder %v5659_v7, %v5359_v53  ;;  %vm1239_vm4 = vcmp.eq.s32.totalorder %v5551_v20, %v5359_v53  ;;  %v637_v15 = vsel %vm381_vm0, 1.0, %v9852_v58 }
  0xa5   :  { %3470 = vmatmul.mubr.bf16.gmra.mrb[4].mxu1 %v2756_v36  ;;  %v5699_v57 = vadd.f32 %v5437_v8, %v1726_v29  ;;  %v1487_v6 = vsel %vm1231_vm15, 1.0, %v9852_v58  ;;  %v636_v10 = vsel %vm380_vm1, 1.0, %v9852_v58  ;;  %v5038_v8 = vld [vmem:[%s9649_s1 + $0x98] sm:$0xff]   ;;  %v5721_v22 = vsel %vm165_vm2, 1.0, %v9852_v58 }
  0xa6   :  { %v5711_v63 = vpop.permute.xlu0 %70  ;;  %4619 = vmatpush3.bf16.msra.mxu1 %v5036_v14  ;;  %vm164_vm5 = vcmp.eq.s32.totalorder %v5659_v7, %v5346_v49  ;;  %vm166_vm6 = vcmp.eq.s32.totalorder %v5659_v7, %v5366_v54  ;;  %v5737_v3 = vsel %vm167_vm3, 1.0, %v9852_v58  ;;  %v5741_v24 = vadd.f32 %v2342_v9, %v1734_v43 }
  0xa7   :  { %9900 = vst [vmem:[#allocation25_spill] sm:$0xff] %v5699_v57  ;;  %9901 = vst [vmem:[#allocation26_spill] sm:$0xff] %v5711_v63  ;;  %v5727_v28 = vpop.permute.xlu1 %1009  ;;  %4990 = vset.pattern.permute.xlu1 %v9653_v13  ;;  %4620 = vmatprep.subr.bf16.mxu1 %v5037_v35  ;;  %vm181_vm7 = vcmp.eq.s32.totalorder %v5711_v63, %v5350_v50  ;;  %v5747_v29 = vsel %vm1239_vm4, 1.0, %v9852_v58  ;;  %vm183_vm10 = vcmp.eq.s32.totalorder %v5711_v63, %v5359_v53  ;;  %v5040_v13 = vld [vmem:[%s9649_s1 + $0xa0] sm:$0xff]  }
  0xa8   :  { %9902 = vst [vmem:[#allocation27_spill] sm:$0xff] %v5727_v28  ;;  %9903 = vst [vmem:[#allocation28_spill] sm:$0xff] %v5741_v24  ;;  %91 = vperm.xlu1 %4990, %v5282_v37   ;;  %vm1245_vm8 = vcmp.eq.s32.totalorder %v5727_v28, %v5350_v50  ;;  %vm1244_vm9 = vcmp.eq.s32.totalorder %v5727_v28, %v5346_v49  ;;  %vm180_vm12 = vcmp.eq.s32.totalorder %v5711_v63, %v5346_v49  ;;  %v5045_v24 = vld [vmem:[%s9649_s1 + $0xf8] sm:$0xff]  }
  0xa9   :  { %v1501_v9 = vsel %vm1245_vm8, 1.0, %v9852_v58  ;;  %v1500_v31 = vsel %vm1244_vm9, 1.0, %v9852_v58  ;;  %v5764_v36 = vsel %vm164_vm5, 1.0, %v9852_v58  ;;  %v5770_v14 = vsel %vm166_vm6, 1.0, %v9852_v58 }
  0xaa   :  { %v5772_v35 = vpop.permute.xlu0 %76  ;;  %v1757_v43 = vadd.f32 %v1501_v9, %v637_v15  ;;  %v1756_v4 = vadd.f32 %v1500_v31, %v636_v10  ;;  %4621 = vmatpush3.bf16.msra.mxu1 %v5038_v8  ;;  %v5777_v1 = vadd.f32 %v1487_v6, %v623_v34  ;;  %v5783_v2 = vsel %vm366_vm11, 1.0, %v9852_v58  ;;  %v5041_v15 = vld [vmem:[%s9649_s1 + $0xe8] sm:$0xff]  }
  0xab   :  { %9904 = vst [vmem:[#allocation29_spill] sm:$0xff] %v5772_v35  ;;  %v5785_v56 = vpop.permute.xlu1 %1012  ;;  %4622 = vmatprep.subr.bf16.mxu1 %v5039_v33  ;;  %v5794_v10 = vsel %vm181_vm7, 1.0, %v9852_v58  ;;  %v5800_v34 = vsel %vm183_vm10, 1.0, %v9852_v58  ;;  %v5806_v6 = vsel %vm180_vm12, 1.0, %v9852_v58  ;;  %vm182_vm11 = vcmp.eq.s32.totalorder %v5711_v63, %v5366_v54 }
  0xac   :  { %9905 = vst [vmem:[#allocation30_spill] sm:$0xff] %v5785_v56  ;;  %v9906_v8 = vmov 1   ;;  %vm1253_vm13 = vcmp.eq.s32.totalorder %v5785_v56, %v5350_v50  ;;  %vm1252_vm14 = vcmp.eq.s32.totalorder %v5785_v56, %v5346_v49  ;;  %vm197_vm15 = vcmp.eq.s32.totalorder %v5772_v35, %v5350_v50 }
  0xad   :  { %4991 = vset.pattern.permute.xlu1 %v9906_v8  ;;  %vm199_vm0 = vcmp.eq.s32.totalorder %v5772_v35, %v5359_v53  ;;  %vm169_vm1 = vcmp.eq.s32.totalorder %v5659_v7, %v5388_v61  ;;  %v1509_v33 = vsel %vm1253_vm13, 1.0, %v9852_v58  ;;  %v1508_v9 = vsel %vm1252_vm14, 1.0, %v9852_v58 }
  0xae   :  { %955 = vperm.xlu1 %4991, %v5282_v37   ;;  %vm196_vm2 = vcmp.eq.s32.totalorder %v5772_v35, %v5346_v49  ;;  %vm198_vm3 = vcmp.eq.s32.totalorder %v5772_v35, %v5366_v54  ;;  %v2621_v31 = vadd.f32 %v5478_v19, %v1757_v43  ;;  %v2620_v18 = vadd.f32 %v5508_v26, %v1756_v4  ;;  %v5830_v5 = vpop.permute.xlu0 %82  ;;  %v5042_v37 = vld [vmem:[%s9649_s1 + $0xa8] sm:$0xff]  }
  0xaf   :  { %9907 = vst [vmem:[#allocation31_spill] sm:$0xff] %v5830_v5  ;;  %4623 = vmatpush3.bf16.msra.mxu1 %v5040_v13  ;;  %v5839_v52 = vsel %vm182_vm11, 1.0, %v9852_v58  ;;  %v1765_v19 = vadd.f32 %v1509_v33, %v5629_v60  ;;  %v1764_v26 = vadd.f32 %v1508_v9, %v5635_v23  ;;  %v5043_v13 = vld [vmem:[%s9649_s1 + $0xf0] sm:$0xff]   ;;  %v5852_v4 = vsel %vm197_vm15, 1.0, %v9852_v58 }
  0xb0   :  { %4624 = vmatprep.subr.bf16.mxu1 %v5041_v15  ;;  %v5858_v43 = vsel %vm199_vm0, 1.0, %v9852_v58  ;;  %v5860_v60 = vpop.permute.xlu1 %1876  ;;  %v5866_v23 = vsel %vm196_vm2, 1.0, %v9852_v58  ;;  %v5872_v15 = vsel %vm198_vm3, 1.0, %v9852_v58  ;;  %vm213_vm4 = vcmp.eq.s32.totalorder %v5830_v5, %v5350_v50 }
  0xb1   :  { %9908 = vst [vmem:[#allocation32_spill] sm:$0xff] %v5860_v60  ;;  %vm215_vm5 = vcmp.eq.s32.totalorder %v5830_v5, %v5359_v53  ;;  %vm2117_vm6 = vcmp.eq.s32.totalorder %v5860_v60, %v5350_v50  ;;  %vm2116_vm7 = vcmp.eq.s32.totalorder %v5860_v60, %v5346_v49  ;;  %vm212_vm8 = vcmp.eq.s32.totalorder %v5830_v5, %v5346_v49 }
  0xb2   :  { %958 = vperm.xlu1 %4991, %v5303_v40   ;;  %vm2103_vm9 = vcmp.eq.s32.totalorder %v5599_v47, %v5359_v53  ;;  %v2373_v33 = vsel %vm2117_vm6, 1.0, %v9852_v58  ;;  %v2372_v9 = vsel %vm2116_vm7, 1.0, %v9852_v58  ;;  %vm214_vm10 = vcmp.eq.s32.totalorder %v5830_v5, %v5366_v54 }
  0xb3   :  { %4625 = vmatpush3.bf16.msra.mxu1 %v5042_v37  ;;  %v2359_v51 = vsel %vm2103_vm9, 1.0, %v9852_v58  ;;  %v2629_v27 = vadd.f32 %v2373_v33, %v1765_v19  ;;  %v2628_v16 = vadd.f32 %v2372_v9, %v1764_v26  ;;  %v5895_v57 = vpop.permute.xlu0 %1879  ;;  %v5904_v37 = vsel %vm213_vm4, 1.0, %v9852_v58 }
  0xb4   :  { %9909 = vst [vmem:[#allocation33_spill] sm:$0xff] %v5895_v57  ;;  %4626 = vmatprep.subr.bf16.mxu1 %v5043_v13  ;;  %v1751_v44 = vadd.f32 %v5747_v29, %v5705_v59  ;;  %vm2125_vm12 = vcmp.eq.s32.totalorder %v5895_v57, %v5350_v50  ;;  %vm2124_vm11 = vcmp.eq.s32.totalorder %v5895_v57, %v5346_v49  ;;  %v5916_v19 = vsel %vm215_vm5, 1.0, %v9852_v58 }
  0xb5   :  { %vm374_vm13 = vcmp.eq.s32.totalorder %v5542_v46, %v5366_v54  ;;  %v5920_v26 = vpop.permute.xlu1 %151  ;;  %v9911_v13 = vmov 2   ;;  %v2765_v59 = vpack.c.bf16 %v2629_v27, %v2621_v31  ;;  %v2764_v29 = vpack.c.bf16 %v2628_v16, %v2620_v18  ;;  %v5046_v16 = vld [vmem:[%s9649_s1 + $0xb8] sm:$0xff]  }
  0xb6   :  { %9910 = vst [vmem:[#allocation34_spill] sm:$0xff] %v5920_v26  ;;  %4992 = vset.pattern.permute.xlu1 %v9911_v13  ;;  %v5927_v33 = vsel %vm212_vm8, 1.0, %v9852_v58  ;;  %v5929_v9 = vadd.f32 %v2359_v51, %v1751_v44  ;;  %vm397_vm14 = vcmp.eq.s32.totalorder %v5920_v26, %v5350_v50  ;;  %vm396_vm15 = vcmp.eq.s32.totalorder %v5920_v26, %v5346_v49 }
  0xb7   :  { %1822 = vperm.xlu1 %4992, %v5303_v40   ;;  %4627 = vmatpush3.bf16.msra.mxu1 %v5044_v55  ;;  %v5943_v18 = vsel %vm214_vm10, 1.0, %v9852_v58  ;;  %v5947_v40 = vadd.f32 %v5468_v17, %v5777_v1  ;;  %v2381_v51 = vsel %vm2125_vm12, 1.0, %v9852_v58  ;;  %v2380_v55 = vsel %vm2124_vm11, 1.0, %v9852_v58  ;;  %v5957_v27 = vpop.permute.xlu0 %1789 }
  0xb8   :  { %9912 = vst [vmem:[#allocation35_spill] sm:$0xff] %v5929_v9  ;;  %3477 = vmatprep.mubr.bf16.mxu1 %v2765_v59  ;;  %9914 = vst [vmem:[#allocation37_spill] sm:$0xff] %v5957_v27  ;;  %4628 = vmatprep.subr.bf16.mxu1 %v5045_v24  ;;  %v5963_v1 = vsel %vm169_vm1, 1.0, %v9852_v58  ;;  %v5969_v17 = vsel %vm374_vm13, 1.0, %v9852_v58  ;;  %vm1885_vm0 = vcmp.eq.s32.totalorder %v5957_v27, %v5350_v50  ;;  %v653_v44 = vsel %vm397_vm14, 1.0, %v9852_v58 }
  0xb9   :  { %9913 = vst [vmem:[#allocation36_spill] sm:$0xff] %v5947_v40  ;;  %9915 = vst [vmem:[#allocation38_spill] sm:$0xff] %v5963_v1  ;;  %3478 = vmatmul.mubr.bf16.gmra.mrb[8].mxu1 %v2764_v29  ;;  %vm1887_vm2 = vcmp.eq.s32.totalorder %v5957_v27, %v5359_v53  ;;  %vm1884_vm3 = vcmp.eq.s32.totalorder %v5957_v27, %v5346_v49  ;;  %vm1230_vm1 = vcmp.eq.s32.totalorder %v5526_v32, %v5366_v54  ;;  %v9917_v29 = vmov 0  }
  0xba   :  { %v652_v24 = vsel %vm396_vm15, 1.0, %v9852_v58  ;;  %vm1238_vm4 = vcmp.eq.s32.totalorder %v5551_v20, %v5366_v54  ;;  %v5991_v59 = vpop.permute.xlu1 %1015  ;;  %v5995_v46 = vsel %vm1885_vm0, 1.0, %v9852_v58  ;;  %v5998_v11 = vsel %vm1887_vm2, 1.0, %v9852_v58 }
  0xbb   :  { %9916 = vst [vmem:[#allocation39_spill] sm:$0xff] %v5991_v59  ;;  %4993 = vset.pattern.permute.xlu1 %v9917_v29  ;;  %4629 = vmatpush3.bf16.msra.mxu1 %v5046_v16  ;;  %v6001_v5 = vsel %vm1884_vm3, 1.0, %v9852_v58  ;;  %vm1886_vm5 = vcmp.eq.s32.totalorder %v5957_v27, %v5366_v54  ;;  %vm1261_vm6 = vcmp.eq.s32.totalorder %v5991_v59, %v5350_v50  ;;  %v6010_v16 = vpop.permute.xlu0 %1795  ;;  %v1486_v31 = vsel %vm1230_vm1, 1.0, %v9852_v58 }
  0xbc   :  { %97 = vperm.xlu1 %4993, %v5289_v38   ;;  %vm1260_vm7 = vcmp.eq.s32.totalorder %v5991_v59, %v5346_v49  ;;  %9918 = vst [vmem:[#allocation40_spill] sm:$0xff] %v6010_v16  ;;  %3816 = vmatprep.subr.bf16.mxu1 %v9917_v29  ;;  %vm1889_vm8 = vcmp.eq.s32.totalorder %v5957_v27, %v5388_v61  ;;  %v1517_v40 = vsel %vm1261_vm6, 1.0, %v9852_v58  ;;  %v6026_v59 = vsel %vm1886_vm5, 1.0, %v9852_v58 }
  0xbd   :  { %v1516_v9 = vsel %vm1260_vm7, 1.0, %v9852_v58  ;;  %vm1901_vm9 = vcmp.eq.s32.totalorder %v6010_v16, %v5350_v50  ;;  %vm1903_vm10 = vcmp.eq.s32.totalorder %v6010_v16, %v5359_v53  ;;  %v1773_v57 = vadd.f32 %v1517_v40, %v653_v44 }
  0xbe   :  { %vm168_vm12 = vcmp.eq.s32.totalorder %v5659_v7, %v5391_v62  ;;  %v1494_v32 = vsel %vm1238_vm4, 1.0, %v9852_v58  ;;  %v6034_v12 = vpop.permute.xlu1 %1018  ;;  %v1772_v26 = vadd.f32 %v1516_v9, %v652_v24  ;;  %v6037_v35 = vsel %vm1901_vm9, 1.0, %v9852_v58 }
  0xbf   :  { %9919 = vst [vmem:[#allocation41_spill] sm:$0xff] %v6034_v12  ;;  %v6040_v60 = vsel %vm1889_vm8, 1.0, %v9852_v58  ;;  %v1742_v40 = vadd.f32 %v1486_v31, %v5783_v2  ;;  %vm1269_vm11 = vcmp.eq.s32.totalorder %v6034_v12, %v5350_v50  ;;  %vm1268_vm13 = vcmp.eq.s32.totalorder %v6034_v12, %v5346_v49  ;;  %v6053_v9 = vpop.permute.xlu0 %1801 }
  0xc0   :  { %9920 = vst [vmem:[#allocation42_spill] sm:$0xff] %v6040_v60  ;;  %4994 = vset.pattern.permute.xlu1 %v9906_v8  ;;  %v6049_v44 = vsel %vm1903_vm10, 1.0, %v9852_v58  ;;  %vm1900_vm14 = vcmp.eq.s32.totalorder %v6010_v16, %v5346_v49  ;;  %9921 = vst [vmem:[#allocation43_spill] sm:$0xff] %v6053_v9  ;;  %v1525_v2 = vsel %vm1269_vm11, 1.0, %v9852_v58  ;;  %v1524_v24 = vsel %vm1268_vm13, 1.0, %v9852_v58 }
  0xc1   :  { %961 = vperm.xlu1 %4994, %v5289_v38   ;;  %vm1902_vm15 = vcmp.eq.s32.totalorder %v6010_v16, %v5366_v54  ;;  %v6064_v31 = vsel %vm168_vm12, 1.0, %v9852_v58  ;;  %v2637_v20 = vadd.f32 %v2381_v51, %v1773_v57  ;;  %vm1917_vm0 = vcmp.eq.s32.totalorder %v6053_v9, %v5350_v50 }
  0xc2   :  { %9922 = vst [vmem:[#allocation44_spill] sm:$0xff] %v6064_v31  ;;  %vm1919_vm2 = vcmp.eq.s32.totalorder %v6053_v9, %v5359_v53  ;;  %vm1888_vm3 = vcmp.eq.s32.totalorder %v5957_v27, %v5391_v62  ;;  %v2636_v38 = vadd.f32 %v2380_v55, %v1772_v26  ;;  %v6073_v12 = vsel %vm1900_vm14, 1.0, %v9852_v58 }
  0xc3   :  { %vm1916_vm1 = vcmp.eq.s32.totalorder %v6053_v9, %v5346_v49  ;;  %vm1918_vm4 = vcmp.eq.s32.totalorder %v6053_v9, %v5366_v54  ;;  %v6079_v57 = vpop.permute.xlu1 %1882  ;;  %v1781_v51 = vadd.f32 %v1525_v2, %v5685_v39  ;;  %v1780_v7 = vadd.f32 %v1524_v24, %v5691_v48  ;;  %v6089_v55 = vpop.permute.xlu0 %1807 }
  0xc4   :  { %9923 = vst [vmem:[#allocation45_spill] sm:$0xff] %v6079_v57  ;;  %v6084_v0 = vsel %vm1902_vm15, 1.0, %v9852_v58  ;;  %v6087_v26 = vsel %vm1917_vm0, 1.0, %v9852_v58  ;;  %9924 = vst [vmem:[#allocation46_spill] sm:$0xff] %v6089_v55  ;;  %vm2133_vm5 = vcmp.eq.s32.totalorder %v6079_v57, %v5350_v50  ;;  %vm2132_vm6 = vcmp.eq.s32.totalorder %v6079_v57, %v5346_v49 }
  0xc5   :  { %964 = vperm.xlu1 %4994, %v5309_v41   ;;  %v6097_v39 = vsel %vm1919_vm2, 1.0, %v9852_v58  ;;  %vm1933_vm7 = vcmp.eq.s32.totalorder %v6089_v55, %v5350_v50  ;;  %v2389_v48 = vsel %vm2133_vm5, 1.0, %v9852_v58  ;;  %v2388_v2 = vsel %vm2132_vm6, 1.0, %v9852_v58 }
  0xc6   :  { %v6104_v24 = vsel %vm1916_vm1, 1.0, %v9852_v58  ;;  %v6107_v9 = vsel %vm1918_vm4, 1.0, %v9852_v58  ;;  %v2645_v56 = vadd.f32 %v2389_v48, %v1781_v51  ;;  %v2644_v28 = vadd.f32 %v2388_v2, %v1780_v7 }
  0xc7   :  { %v6113_v57 = vsel %vm1888_vm3, 1.0, %v9852_v58  ;;  %v6116_v25 = vadd.f32 %v1494_v32, %v5969_v17  ;;  %v6118_v30 = vpop.permute.xlu0 %1813  ;;  %v6121_v16 = vsel %vm1933_vm7, 1.0, %v9852_v58  ;;  %vm1935_vm8 = vcmp.eq.s32.totalorder %v6089_v55, %v5359_v53 }
  0xc8   :  { %9925 = vst [vmem:[#allocation47_spill] sm:$0xff] %v6113_v57  ;;  %9927 = vst [vmem:[#allocation49_spill] sm:$0xff] %v6118_v30  ;;  %vm1932_vm9 = vcmp.eq.s32.totalorder %v6089_v55, %v5346_v49  ;;  %vm1934_vm10 = vcmp.eq.s32.totalorder %v6089_v55, %v5366_v54  ;;  %v6130_v7 = vpop.permute.xlu1 %61  ;;  %v2773_v32 = vpack.c.bf16 %v2645_v56, %v2637_v20  ;;  %v6146_v56 = vsel %vm1935_vm8, 1.0, %v9852_v58 }
  0xc9   :  { %9926 = vst [vmem:[#allocation48_spill] sm:$0xff] %v6116_v25  ;;  %4996 = vset.pattern.permute.xlu1 %v9911_v13  ;;  %v2772_v17 = vpack.c.bf16 %v2644_v28, %v2636_v38  ;;  %vm1949_vm12 = vcmp.eq.s32.totalorder %v6118_v30, %v5350_v50  ;;  %vm1951_vm11 = vcmp.eq.s32.totalorder %v6118_v30, %v5359_v53  ;;  %v6149_v20 = vsel %vm1932_vm9, 1.0, %v9852_v58 }
  0xca   :  { %1828 = vperm.xlu1 %4996, %v5309_v41   ;;  %vm157_vm13 = vcmp.eq.s32.totalorder %v6130_v7, %v5350_v50  ;;  %vm159_vm14 = vcmp.eq.s32.totalorder %v6130_v7, %v5359_v53  ;;  %vm156_vm15 = vcmp.eq.s32.totalorder %v6130_v7, %v5346_v49  ;;  %vm158_vm0 = vcmp.eq.s32.totalorder %v6130_v7, %v5366_v54 }
  0xcb   :  { %3485 = vmatprep.mubr.bf16.mxu1 %v2773_v32  ;;  %v6152_v41 = vsel %vm1934_vm10, 1.0, %v9852_v58  ;;  %v6155_v28 = vadd.f32 %v5487_v21, %v1742_v40  ;;  %v413_v38 = vsel %vm157_vm13, 1.0, %v9852_v58  ;;  %v415_v51 = vsel %vm159_vm14, 1.0, %v9852_v58  ;;  %v6161_v32 = vpop.permute.xlu0 %1819 }
  0xcc   :  { %3486 = vmatmul.mubr.bf16.gmra.mrb[12].mxu1 %v2772_v17  ;;  %v412_v48 = vsel %vm156_vm15, 1.0, %v9852_v58  ;;  %v414_v2 = vsel %vm158_vm0, 1.0, %v9852_v58  ;;  %9929 = vst [vmem:[#allocation51_spill] sm:$0xff] %v6161_v32  ;;  %v6167_v27 = vsel %vm1949_vm12, 1.0, %v9852_v58  ;;  %v6173_v21 = vsel %vm1951_vm11, 1.0, %v9852_v58 }
  0xcd   :  { %9928 = vst [vmem:[#allocation50_spill] sm:$0xff] %v6155_v28  ;;  %vm1948_vm2 = vcmp.eq.s32.totalorder %v6118_v30, %v5346_v49  ;;  %vm1950_vm3 = vcmp.eq.s32.totalorder %v6118_v30, %v5366_v54  ;;  %v6180_v40 = vpop.permute.xlu1 %925  ;;  %vm1965_vm1 = vcmp.eq.s32.totalorder %v6161_v32, %v5350_v50  ;;  %vm1967_vm4 = vcmp.eq.s32.totalorder %v6161_v32, %v5359_v53 }
  0xce   :  { %4997 = vset.pattern.permute.xlu1 %v9917_v29  ;;  %9930 = vst [vmem:[#allocation52_spill] sm:$0xff] %v6180_v40  ;;  %vm1964_vm5 = vcmp.eq.s32.totalorder %v6161_v32, %v5346_v49  ;;  %vm1966_vm6 = vcmp.eq.s32.totalorder %v6161_v32, %v5366_v54  ;;  %vm1021_vm7 = vcmp.eq.s32.totalorder %v6180_v40, %v5350_v50  ;;  %v6209_v60 = vsel %vm1948_vm2, 1.0, %v9852_v58 }
  0xcf   :  { %103 = vperm.xlu1 %4997, %v5332_v45   ;;  %vm1023_vm8 = vcmp.eq.s32.totalorder %v6180_v40, %v5359_v53  ;;  %vm1020_vm9 = vcmp.eq.s32.totalorder %v6180_v40, %v5346_v49  ;;  %vm1022_vm10 = vcmp.eq.s32.totalorder %v6180_v40, %v5366_v54  ;;  %v1277_v17 = vsel %vm1021_vm7, 1.0, %v9852_v58  ;;  %v6203_v47 = vpop.permute.xlu0 %1825 }
  0xd0   :  { %v1279_v55 = vsel %vm1023_vm8, 1.0, %v9852_v58  ;;  %v1276_v28 = vsel %vm1020_vm9, 1.0, %v9852_v58  ;;  %v1278_v25 = vsel %vm1022_vm10, 1.0, %v9852_v58  ;;  %9931 = vst [vmem:[#allocation53_spill] sm:$0xff] %v6203_v47  ;;  %v1533_v57 = vadd.f32 %v1277_v17, %v413_v38 }
  0xd1   :  { %v1535_v63 = vadd.f32 %v1279_v55, %v415_v51  ;;  %v1532_v31 = vadd.f32 %v1276_v28, %v412_v48  ;;  %v6211_v1 = vpop.permute.xlu1 %928  ;;  %v1534_v62 = vadd.f32 %v1278_v25, %v414_v2  ;;  %v6217_v40 = vsel %vm1950_vm3, 1.0, %v9852_v58 }
  0xd2   :  { %9932 = vst [vmem:[#allocation54_spill] sm:$0xff] %v6211_v1  ;;  %v6223_v55 = vsel %vm1965_vm1, 1.0, %v9852_v58  ;;  %v6229_v28 = vsel %vm1967_vm4, 1.0, %v9852_v58  ;;  %vm1029_vm12 = vcmp.eq.s32.totalorder %v6211_v1, %v5350_v50  ;;  %vm1031_vm11 = vcmp.eq.s32.totalorder %v6211_v1, %v5359_v53 }
  0xd3   :  { %9933 = vst [vmem:[#allocation55_spill] sm:$0xff] %v6223_v55  ;;  %9934 = vst [vmem:[#allocation56_spill] sm:$0xff] %v6229_v28  ;;  %4998 = vset.pattern.permute.xlu1 %v9906_v8  ;;  %v6240_v25 = vsel %vm1964_vm5, 1.0, %v9852_v58  ;;  %v6246_v38 = vsel %vm1966_vm6, 1.0, %v9852_v58  ;;  %v1285_v51 = vsel %vm1029_vm12, 1.0, %v9852_v58  ;;  %v2397_v48 = vadd.f32 %v5995_v46, %v1533_v57 }
  0xd4   :  { %9935 = vst [vmem:[#allocation57_spill] sm:$0xff] %v6240_v25  ;;  %9936 = vst [vmem:[#allocation58_spill] sm:$0xff] %v6246_v38  ;;  %967 = vperm.xlu1 %4998, %v5332_v45   ;;  %v1287_v2 = vsel %vm1031_vm11, 1.0, %v9852_v58  ;;  %vm1028_vm13 = vcmp.eq.s32.totalorder %v6211_v1, %v5346_v49  ;;  %v2399_v17 = vadd.f32 %v5998_v11, %v1535_v63  ;;  %v6259_v32 = vpop.permute.xlu0 %88 }
  0xd5   :  { %v1284_v30 = vsel %vm1028_vm13, 1.0, %v9852_v58  ;;  %v2396_v25 = vadd.f32 %v6001_v5, %v1532_v31  ;;  %vm1030_vm14 = vcmp.eq.s32.totalorder %v6211_v1, %v5366_v54  ;;  %9937 = vst [vmem:[#allocation59_spill] sm:$0xff] %v6259_v32  ;;  %v1541_v45 = vadd.f32 %v1285_v51, %v5721_v22 }
  0xd6   :  { %v1543_v46 = vadd.f32 %v1287_v2, %v5737_v3  ;;  %v1286_v57 = vsel %vm1030_vm14, 1.0, %v9852_v58  ;;  %vm229_vm15 = vcmp.eq.s32.totalorder %v6259_v32, %v5350_v50  ;;  %v6266_v38 = vpop.permute.xlu1 %1792  ;;  %v1540_v11 = vadd.f32 %v1284_v30, %v5764_v36 }
  0xd7   :  { %9938 = vst [vmem:[#allocation60_spill] sm:$0xff] %v6266_v38  ;;  %v1542_v5 = vadd.f32 %v1286_v57, %v5770_v14  ;;  %v2398_v63 = vadd.f32 %v6026_v59, %v1534_v62  ;;  %v6272_v31 = vsel %vm229_vm15, 1.0, %v9852_v58  ;;  %vm1893_vm0 = vcmp.eq.s32.totalorder %v6266_v38, %v5350_v50 }
  0xd8   :  { %970 = vperm.xlu1 %4998, %v5316_v42   ;;  %vm1895_vm2 = vcmp.eq.s32.totalorder %v6266_v38, %v5359_v53  ;;  %vm1892_vm3 = vcmp.eq.s32.totalorder %v6266_v38, %v5346_v49  ;;  %vm1894_vm1 = vcmp.eq.s32.totalorder %v6266_v38, %v5366_v54  ;;  %v2149_v30 = vsel %vm1893_vm0, 1.0, %v9852_v58  ;;  %v6287_v36 = vpop.permute.xlu0 %94 }
  0xd9   :  { %v2151_v62 = vsel %vm1895_vm2, 1.0, %v9852_v58  ;;  %v2148_v22 = vsel %vm1892_vm3, 1.0, %v9852_v58  ;;  %v2150_v3 = vsel %vm1894_vm1, 1.0, %v9852_v58  ;;  %9939 = vst [vmem:[#allocation61_spill] sm:$0xff] %v6287_v36  ;;  %v2405_v14 = vadd.f32 %v2149_v30, %v1541_v45  ;;  %v5047_v30 = vld [vmem:[%s9649_s1 + $0x180] sm:$0xff]  }
  0xda   :  { %v2407_v59 = vadd.f32 %v2151_v62, %v1543_v46  ;;  %v2404_v51 = vadd.f32 %v2148_v22, %v1540_v11  ;;  %v2406_v2 = vadd.f32 %v2150_v3, %v1542_v5  ;;  %vm1981_vm4 = vcmp.eq.s32.totalorder %v6203_v47, %v5350_v50 }
  0xdb   :  { %vm1983_vm5 = vcmp.eq.s32.totalorder %v6203_v47, %v5359_v53  ;;  %vm231_vm6 = vcmp.eq.s32.totalorder %v6259_v32, %v5359_v53  ;;  %vm228_vm7 = vcmp.eq.s32.totalorder %v6259_v32, %v5346_v49  ;;  %vm230_vm8 = vcmp.eq.s32.totalorder %v6259_v32, %v5366_v54  ;;  %v6302_v45 = vpop.permute.xlu1 %67 }
  0xdc   :  { %vm245_vm9 = vcmp.eq.s32.totalorder %v6287_v36, %v5350_v50  ;;  %4999 = vset.pattern.permute.xlu1 %v9911_v13  ;;  %9940 = vst [vmem:[#allocation62_spill] sm:$0xff] %v6302_v45  ;;  %v2653_v46 = vpack.c.bf16 %v2405_v14, %v2397_v48  ;;  %v2655_v57 = vpack.c.bf16 %v2407_v59, %v2399_v17  ;;  %v6324_v17 = vsel %vm231_vm6, 1.0, %v9852_v58 }
  0xdd   :  { %v2652_v11 = vpack.c.bf16 %v2404_v51, %v2396_v25  ;;  %v2654_v5 = vpack.c.bf16 %v2406_v2, %v2398_v63  ;;  %1834 = vperm.xlu1 %4999, %v5316_v42   ;;  %vm173_vm10 = vcmp.eq.s32.totalorder %v6302_v45, %v5350_v50  ;;  %vm175_vm12 = vcmp.eq.s32.totalorder %v6302_v45, %v5359_v53  ;;  %v6316_v25 = vpop.permute.xlu0 %100  ;;  %v5048_v51 = vld [vmem:[%s9649_s1 + $0x188] sm:$0xff]  }
  0xde   :  { %vm172_vm11 = vcmp.eq.s32.totalorder %v6302_v45, %v5346_v49  ;;  %vm174_vm13 = vcmp.eq.s32.totalorder %v6302_v45, %v5366_v54  ;;  %9941 = vst [vmem:[#allocation63_spill] sm:$0xff] %v6316_v25  ;;  %3365 = vmatprep.mubr.bf16.mxu0 %v2653_v46  ;;  %3526 = vmatprep.mubr.bf16.mxu1 %v2655_v57  ;;  %v429_v48 = vsel %vm173_vm10, 1.0, %v9852_v58  ;;  %v431_v42 = vsel %vm175_vm12, 1.0, %v9852_v58 }
  0xdf   :  { %v6330_v63 = vsel %vm228_vm7, 1.0, %v9852_v58  ;;  %3366 = vmatmul.mubr.bf16.vlgmr.msra.gmra.mrb[0].mxu0 %v2652_v11  ;;  %3527 = vmatmul.mubr.bf16.vlgmr.msra.gmra.mrb[16].mxu1 %v2654_v5  ;;  %v428_v62 = vsel %vm172_vm11, 1.0, %v9852_v58  ;;  %v430_v22 = vsel %vm174_vm13, 1.0, %v9852_v58  ;;  %vm247_vm14 = vcmp.eq.s32.totalorder %v6287_v36, %v5359_v53  ;;  %v5078_v5 = vld [vmem:[%s9648_s0 + $0x80] sm:$0xff] }
  0xe0   :  { %vm244_vm15 = vcmp.eq.s32.totalorder %v6287_v36, %v5346_v49  ;;  %v6342_v3 = vsel %vm230_vm8, 1.0, %v9852_v58  ;;  %v6348_v14 = vsel %vm245_vm9, 1.0, %v9852_v58  ;;  %v6351_v59 = vsel %vm247_vm14, 1.0, %v9852_v58  ;;  %3817 = vmatpush1.bf16.msra.mxu1 %v5047_v30  ;;  %v6359_v2 = vpop.permute.xlu1 %931 }
  0xe1   :  { %9942 = vst [vmem:[#allocation64_spill] sm:$0xff] %v6348_v14  ;;  %9943 = vst [vmem:[#allocation65_spill] sm:$0xff] %v6351_v59  ;;  %vm246_vm0 = vcmp.eq.s32.totalorder %v6287_v36, %v5366_v54  ;;  %5000 = vset.pattern.permute.xlu1 %v9917_v29  ;;  %v6362_v46 = vsel %vm244_vm15, 1.0, %v9852_v58  ;;  %v6367_v11 = vpop.permute.xlu0 %106  ;;  %vm261_vm2 = vcmp.eq.s32.totalorder %v6316_v25, %v5350_v50  ;;  %3818 = vmatprep.subr.bf16.mxu1 %v9917_v29 }
  0xe2   :  { %9944 = vst [vmem:[#allocation66_spill] sm:$0xff] %v6359_v2  ;;  %9945 = vst [vmem:[#allocation67_spill] sm:$0xff] %v6362_v46  ;;  %v6365_v57 = vsel %vm246_vm0, 1.0, %v9852_v58  ;;  %vm263_vm3 = vcmp.eq.s32.totalorder %v6316_v25, %v5359_v53  ;;  %109 = vperm.xlu1 %5000, %v5078_v5   ;;  %vm1037_vm1 = vcmp.eq.s32.totalorder %v6359_v2, %v5350_v50  ;;  %v6393_v14 = vsel %vm261_vm2, 1.0, %v9852_v58 }
  0xe3   :  { %9946 = vst [vmem:[#allocation68_spill] sm:$0xff] %v6365_v57  ;;  %9947 = vst [vmem:[#allocation69_spill] sm:$0xff] %v6367_v11  ;;  %vm1039_vm6 = vcmp.eq.s32.totalorder %v6359_v2, %v5359_v53  ;;  %vm1036_vm7 = vcmp.eq.s32.totalorder %v6359_v2, %v5346_v49  ;;  %vm1038_vm8 = vcmp.eq.s32.totalorder %v6359_v2, %v5366_v54  ;;  %v1293_v30 = vsel %vm1037_vm1, 1.0, %v9852_v58 }
  0xe4   :  { %v1295_v36 = vsel %vm1039_vm6, 1.0, %v9852_v58  ;;  %v1292_v32 = vsel %vm1036_vm7, 1.0, %v9852_v58  ;;  %v1294_v45 = vsel %vm1038_vm8, 1.0, %v9852_v58  ;;  %v1549_v57 = vadd.f32 %v1293_v30, %v429_v48  ;;  %9948 = vst [vmem:[#allocation70_spill] sm:$0xff] %v6393_v14  ;;  %3819 = vmatpush1.bf16.msra.mxu1 %v5048_v51  ;;  %v6395_v28 = vpop.permute.xlu1 %934 }
  0xe5   :  { %v1551_v46 = vadd.f32 %v1295_v36, %v431_v42  ;;  %v1548_v59 = vadd.f32 %v1292_v32, %v428_v62  ;;  %9949 = vst [vmem:[#allocation71_spill] sm:$0xff] %v6395_v28  ;;  %v1550_v2 = vadd.f32 %v1294_v45, %v430_v22  ;;  %v6397_v55 = vpop.permute.xlu0 %112  ;;  %v6403_v38 = vsel %vm1981_vm4, 1.0, %v9852_v58  ;;  %3820 = vmatprep.subr.bf16.mxu1 %v9917_v29  ;;  %v5049_v45 = vld [vmem:[%s9649_s1 + $0x190] sm:$0xff]  }
  0xe6   :  { %9950 = vst [vmem:[#allocation72_spill] sm:$0xff] %v6397_v55  ;;  %v6409_v32 = vsel %vm263_vm3, 1.0, %v9852_v58  ;;  %v6415_v36 = vsel %vm1983_vm5, 1.0, %v9852_v58  ;;  %5001 = vset.pattern.permute.xlu1 %v9906_v8  ;;  %vm1045_vm4 = vcmp.eq.s32.totalorder %v6395_v28, %v5350_v50  ;;  %vm1047_vm9 = vcmp.eq.s32.totalorder %v6395_v28, %v5359_v53 }
  0xe7   :  { %9951 = vst [vmem:[#allocation73_spill] sm:$0xff] %v6409_v32  ;;  %vm260_vm10 = vcmp.eq.s32.totalorder %v6316_v25, %v5346_v49  ;;  %vm1980_vm12 = vcmp.eq.s32.totalorder %v6203_v47, %v5346_v49  ;;  %973 = vperm.xlu1 %5001, %v5078_v5   ;;  %v1301_v48 = vsel %vm1045_vm4, 1.0, %v9852_v58  ;;  %v2413_v42 = vadd.f32 %v6037_v35, %v1549_v57 }
  0xe8   :  { %v1303_v62 = vsel %vm1047_vm9, 1.0, %v9852_v58  ;;  %vm1044_vm5 = vcmp.eq.s32.totalorder %v6395_v28, %v5346_v49  ;;  %v2415_v22 = vadd.f32 %v6049_v44, %v1551_v46  ;;  %v2412_v30 = vadd.f32 %v6073_v12, %v1548_v59  ;;  %3821 = vmatpush1.bf16.msra.mxu1 %v5049_v45 }
  0xe9   :  { %v1300_v51 = vsel %vm1044_vm5, 1.0, %v9852_v58  ;;  %vm1046_vm11 = vcmp.eq.s32.totalorder %v6395_v28, %v5366_v54  ;;  %v1557_v5 = vadd.f32 %v1301_v48, %v5794_v10  ;;  %v1559_v32 = vadd.f32 %v1303_v62, %v5800_v34  ;;  %v6444_v14 = vpop.permute.xlu0 %118  ;;  %3822 = vmatprep.subr.bf16.mxu1 %v9917_v29  ;;  %v6447_v44 = vpop.permute.xlu1 %1798 }
  0xea   :  { %v1556_v35 = vadd.f32 %v1300_v51, %v5806_v6  ;;  %v1302_v57 = vsel %vm1046_vm11, 1.0, %v9852_v58  ;;  %9952 = vst [vmem:[#allocation74_spill] sm:$0xff] %v6444_v14  ;;  %9953 = vst [vmem:[#allocation75_spill] sm:$0xff] %v6447_v44  ;;  %v2414_v59 = vadd.f32 %v6084_v0, %v1550_v2  ;;  %v6455_v10 = vsel %vm260_vm10, 1.0, %v9852_v58  ;;  %v5079_v6 = vld [vmem:[%s9648_s0 + $0x88] sm:$0xff] }
  0xeb   :  { %v1558_v12 = vadd.f32 %v1302_v57, %v5839_v52  ;;  %v6461_v34 = vsel %vm1980_vm12, 1.0, %v9852_v58  ;;  %976 = vperm.xlu1 %5001, %v5079_v6   ;;  %vm1909_vm13 = vcmp.eq.s32.totalorder %v6447_v44, %v5350_v50  ;;  %vm1911_vm14 = vcmp.eq.s32.totalorder %v6447_v44, %v5359_v53 }
  0xec   :  { %vm1908_vm15 = vcmp.eq.s32.totalorder %v6447_v44, %v5346_v49  ;;  %vm1910_vm0 = vcmp.eq.s32.totalorder %v6447_v44, %v5366_v54  ;;  %v2165_v52 = vsel %vm1909_vm13, 1.0, %v9852_v58  ;;  %v2167_v0 = vsel %vm1911_vm14, 1.0, %v9852_v58 }
  0xed   :  { %v2164_v2 = vsel %vm1908_vm15, 1.0, %v9852_v58  ;;  %v2166_v46 = vsel %vm1910_vm0, 1.0, %v9852_v58  ;;  %v2421_v45 = vadd.f32 %v2165_v52, %v1557_v5  ;;  %v2423_v48 = vadd.f32 %v2167_v0, %v1559_v32  ;;  %v6489_v52 = vpop.permute.xlu0 %1831 }
  0xee   :  { %v2420_v62 = vadd.f32 %v2164_v2, %v1556_v35  ;;  %v2422_v51 = vadd.f32 %v2166_v46, %v1558_v12  ;;  %vm262_vm2 = vcmp.eq.s32.totalorder %v6316_v25, %v5366_v54  ;;  %vm1982_vm3 = vcmp.eq.s32.totalorder %v6203_v47, %v5366_v54  ;;  %v6487_v57 = vpop.permute.xlu1 %73  ;;  %9955 = vst [vmem:[#allocation77_spill] sm:$0xff] %v6489_v52  ;;  %v5050_v2 = vld [vmem:[%s9649_s1 + $0x140] sm:$0xff]   ;;  %v5051_v46 = vld [vmem:[%s9649_s1 + $0x198] sm:$0xff]  }
  0xef   :  { %vm277_vm1 = vcmp.eq.s32.totalorder %v6367_v11, %v5350_v50  ;;  %vm279_vm6 = vcmp.eq.s32.totalorder %v6367_v11, %v5359_v53  ;;  %5002 = vset.pattern.permute.xlu1 %v9911_v13  ;;  %9954 = vst [vmem:[#allocation76_spill] sm:$0xff] %v6487_v57  ;;  %v2661_v5 = vpack.c.bf16 %v2421_v45, %v2413_v42 }
  0xf0   :  { %v2663_v32 = vpack.c.bf16 %v2423_v48, %v2415_v22  ;;  %v2660_v35 = vpack.c.bf16 %v2420_v62, %v2412_v30  ;;  %v2662_v12 = vpack.c.bf16 %v2422_v51, %v2414_v59  ;;  %1840 = vperm.xlu1 %5002, %v5079_v6   ;;  %vm189_vm7 = vcmp.eq.s32.totalorder %v6487_v57, %v5350_v50 }
  0xf1   :  { %vm191_vm8 = vcmp.eq.s32.totalorder %v6487_v57, %v5359_v53  ;;  %vm188_vm4 = vcmp.eq.s32.totalorder %v6487_v57, %v5346_v49  ;;  %vm190_vm9 = vcmp.eq.s32.totalorder %v6487_v57, %v5366_v54  ;;  %3373 = vmatprep.mubr.bf16.mxu0 %v2661_v5  ;;  %v445_v42 = vsel %vm189_vm7, 1.0, %v9852_v58  ;;  %4726 = vmatprep.subr.bf16.mxu0 %v5050_v2  ;;  %v6572_v57 = vpop.permute.xlu0 %1837 }
  0xf2   :  { %3534 = vmatprep.mubr.bf16.mxu1 %v2663_v32  ;;  %v447_v22 = vsel %vm191_vm8, 1.0, %v9852_v58  ;;  %v6505_v30 = vsel %vm262_vm2, 1.0, %v9852_v58  ;;  %v6511_v59 = vsel %vm1982_vm3, 1.0, %v9852_v58  ;;  %3374 = vmatmul.mubr.bf16.gmra.mrb[4].mxu0 %v2660_v35  ;;  %v444_v6 = vsel %vm188_vm4, 1.0, %v9852_v58  ;;  %v5052_v32 = vld [vmem:[%s9649_s1 + $0x100] sm:$0xff]   ;;  %v5080_v35 = vld [vmem:[%s9648_s0 + $0x90] sm:$0xff] }
  0xf3   :  { %3535 = vmatmul.mubr.bf16.gmra.mrb[20].mxu1 %v2662_v12  ;;  %v446_v0 = vsel %vm190_vm9, 1.0, %v9852_v58  ;;  %vm1997_vm10 = vcmp.eq.s32.totalorder %v6489_v52, %v5350_v50  ;;  %vm1999_vm12 = vcmp.eq.s32.totalorder %v6489_v52, %v5359_v53  ;;  %v6529_v45 = vsel %vm277_vm1, 1.0, %v9852_v58  ;;  %v6543_v51 = vpop.permute.xlu1 %937  ;;  %9961 = vst [vmem:[#allocation83_spill] sm:$0xff] %v6572_v57  ;;  %4727 = vmatpush3.bf16.msra.mxu0 %v5052_v32 }
  0xf4   :  { %9956 = vst [vmem:[#allocation78_spill] sm:$0xff] %v6529_v45  ;;  %v6532_v48 = vsel %vm1997_vm10, 1.0, %v9852_v58  ;;  %v6538_v62 = vsel %vm279_vm6, 1.0, %v9852_v58  ;;  %vm276_vm5 = vcmp.eq.s32.totalorder %v6367_v11, %v5346_v49  ;;  %5003 = vset.pattern.permute.xlu1 %v9917_v29  ;;  %9959 = vst [vmem:[#allocation81_spill] sm:$0xff] %v6543_v51  ;;  %v6546_v5 = vsel %vm1999_vm12, 1.0, %v9852_v58  ;;  %3823 = vmatpush1.bf16.msra.mxu1 %v5051_v46 }
  0xf5   :  { %9957 = vst [vmem:[#allocation79_spill] sm:$0xff] %v6532_v48  ;;  %9958 = vst [vmem:[#allocation80_spill] sm:$0xff] %v6538_v62  ;;  %vm1996_vm11 = vcmp.eq.s32.totalorder %v6489_v52, %v5346_v49  ;;  %vm278_vm13 = vcmp.eq.s32.totalorder %v6367_v11, %v5366_v54  ;;  %vm1998_vm14 = vcmp.eq.s32.totalorder %v6489_v52, %v5366_v54  ;;  %115 = vperm.xlu1 %5003, %v5080_v35  }
  0xf6   :  { %9960 = vst [vmem:[#allocation82_spill] sm:$0xff] %v6546_v5  ;;  %vm1053_vm15 = vcmp.eq.s32.totalorder %v6543_v51, %v5350_v50  ;;  %vm1055_vm0 = vcmp.eq.s32.totalorder %v6543_v51, %v5359_v53  ;;  %vm1052_vm2 = vcmp.eq.s32.totalorder %v6543_v51, %v5346_v49  ;;  %vm1054_vm3 = vcmp.eq.s32.totalorder %v6543_v51, %v5366_v54 }
  0xf7   :  { %v1309_v12 = vsel %vm1053_vm15, 1.0, %v9852_v58  ;;  %v1311_v2 = vsel %vm1055_vm0, 1.0, %v9852_v58  ;;  %v1308_v47 = vsel %vm1052_vm2, 1.0, %v9852_v58  ;;  %v1310_v25 = vsel %vm1054_vm3, 1.0, %v9852_v58  ;;  %3824 = vmatprep.subr.bf16.mxu1 %v9917_v29  ;;  %v6581_v48 = vpop.permute.xlu1 %940 }
  0xf8   :  { %v1565_v62 = vadd.f32 %v1309_v12, %v445_v42  ;;  %v1567_v45 = vadd.f32 %v1311_v2, %v447_v22  ;;  %v1564_v5 = vadd.f32 %v1308_v47, %v444_v6  ;;  %v6578_v51 = vsel %vm276_vm5, 1.0, %v9852_v58  ;;  %9962 = vst [vmem:[#allocation84_spill] sm:$0xff] %v6581_v48 }
  0xf9   :  { %v1566_v44 = vadd.f32 %v1310_v25, %v446_v0  ;;  %v6587_v46 = vsel %vm1996_vm11, 1.0, %v9852_v58  ;;  %v6593_v47 = vsel %vm278_vm13, 1.0, %v9852_v58  ;;  %v6599_v42 = vsel %vm1998_vm14, 1.0, %v9852_v58  ;;  %5005 = vset.pattern.permute.xlu1 %v9906_v8 }
  0xfa   :  { %vm1061_vm1 = vcmp.eq.s32.totalorder %v6581_v48, %v5350_v50  ;;  %vm1063_vm6 = vcmp.eq.s32.totalorder %v6581_v48, %v5359_v53  ;;  %vm293_vm7 = vcmp.eq.s32.totalorder %v6397_v55, %v5350_v50  ;;  %vm2013_vm8 = vcmp.eq.s32.totalorder %v6572_v57, %v5350_v50  ;;  %979 = vperm.xlu1 %5005, %v5080_v35   ;;  %v5053_v35 = vld [vmem:[%s9649_s1 + $0x1a0] sm:$0xff]  }
  0xfb   :  { %v1317_v25 = vsel %vm1061_vm1, 1.0, %v9852_v58  ;;  %v2429_v22 = vadd.f32 %v6087_v26, %v1565_v62  ;;  %v1319_v6 = vsel %vm1063_vm6, 1.0, %v9852_v58  ;;  %vm1060_vm4 = vcmp.eq.s32.totalorder %v6581_v48, %v5346_v49  ;;  %3825 = vmatpush1.bf16.msra.mxu1 %v5053_v35 }
  0xfc   :  { %v2431_v0 = vadd.f32 %v6097_v39, %v1567_v45  ;;  %v1316_v32 = vsel %vm1060_vm4, 1.0, %v9852_v58  ;;  %v2428_v12 = vadd.f32 %v6104_v24, %v1564_v5  ;;  %vm1062_vm9 = vcmp.eq.s32.totalorder %v6581_v48, %v5366_v54  ;;  %v6627_v39 = vpop.permute.xlu1 %1804  ;;  %3826 = vmatprep.subr.bf16.mxu1 %v9917_v29 }
  0xfd   :  { %v1573_v26 = vadd.f32 %v1317_v25, %v5852_v4  ;;  %v1575_v62 = vadd.f32 %v1319_v6, %v5858_v43  ;;  %v1572_v2 = vadd.f32 %v1316_v32, %v5866_v23  ;;  %v1318_v52 = vsel %vm1062_vm9, 1.0, %v9852_v58  ;;  %9963 = vst [vmem:[#allocation85_spill] sm:$0xff] %v6627_v39  ;;  %v5054_v43 = vld [vmem:[%s9649_s1 + $0x148] sm:$0xff]  }
  0xfe   :  { %v1574_v45 = vadd.f32 %v1318_v52, %v5872_v15  ;;  %v2430_v24 = vadd.f32 %v6107_v9, %v1566_v44  ;;  %v6635_v5 = vsel %vm293_vm7, 1.0, %v9852_v58  ;;  %v6641_v4 = vsel %vm2013_vm8, 1.0, %v9852_v58  ;;  %v5055_v23 = vld [vmem:[%s9649_s1 + $0x108] sm:$0xff]   ;;  %v5081_v15 = vld [vmem:[%s9648_s0 + $0x98] sm:$0xff]  ;;  %4728 = vmatprep.subr.bf16.mxu0 %v5054_v43 }
  0xff   :  { %982 = vperm.xlu1 %5005, %v5081_v15   ;;  %vm1925_vm10 = vcmp.eq.s32.totalorder %v6627_v39, %v5350_v50  ;;  %vm1927_vm12 = vcmp.eq.s32.totalorder %v6627_v39, %v5359_v53  ;;  %vm1924_vm5 = vcmp.eq.s32.totalorder %v6627_v39, %v5346_v49  ;;  %vm1926_vm11 = vcmp.eq.s32.totalorder %v6627_v39, %v5366_v54  ;;  %v5058_v39 = vld [vmem:[%s9649_s1 + $0x110] sm:$0xff]  }
 0x100   :  { %v2181_v9 = vsel %vm1925_vm10, 1.0, %v9852_v58  ;;  %v2183_v44 = vsel %vm1927_vm12, 1.0, %v9852_v58  ;;  %v2180_v52 = vsel %vm1924_vm5, 1.0, %v9852_v58  ;;  %v2182_v25 = vsel %vm1926_vm11, 1.0, %v9852_v58  ;;  %4729 = vmatpush3.bf16.msra.mxu0 %v5055_v23  ;;  %v5056_v23 = vld [vmem:[%s9649_s1 + $0x1a8] sm:$0xff]  }
 0x101   :  { %v2437_v6 = vadd.f32 %v2181_v9, %v1573_v26  ;;  %v2439_v32 = vadd.f32 %v2183_v44, %v1575_v62  ;;  %v2436_v35 = vadd.f32 %v2180_v52, %v1572_v2  ;;  %v2438_v11 = vadd.f32 %v2182_v25, %v1574_v45  ;;  %v6674_v43 = vpop.permute.xlu1 %79  ;;  %3827 = vmatpush1.bf16.msra.mxu1 %v5056_v23 }
 0x102   :  { %vm295_vm13 = vcmp.eq.s32.totalorder %v6397_v55, %v5359_v53  ;;  %vm2015_vm14 = vcmp.eq.s32.totalorder %v6572_v57, %v5359_v53  ;;  %vm292_vm15 = vcmp.eq.s32.totalorder %v6397_v55, %v5346_v49  ;;  %vm2012_vm0 = vcmp.eq.s32.totalorder %v6572_v57, %v5346_v49  ;;  %9964 = vst [vmem:[#allocation86_spill] sm:$0xff] %v6674_v43 }
 0x103   :  { %5006 = vset.pattern.permute.xlu1 %v9911_v13  ;;  %v2669_v26 = vpack.c.bf16 %v2437_v6, %v2429_v22  ;;  %v2671_v62 = vpack.c.bf16 %v2439_v32, %v2431_v0  ;;  %v2668_v2 = vpack.c.bf16 %v2436_v35, %v2428_v12  ;;  %v2670_v45 = vpack.c.bf16 %v2438_v11, %v2430_v24  ;;  %v6701_v24 = vpop.permute.xlu0 %1843  ;;  %v5082_v35 = vld [vmem:[%s9648_s0 + $0xa0] sm:$0xff] }
 0x104   :  { %1846 = vperm.xlu1 %5006, %v5081_v15   ;;  %vm205_vm2 = vcmp.eq.s32.totalorder %v6674_v43, %v5350_v50  ;;  %vm207_vm3 = vcmp.eq.s32.totalorder %v6674_v43, %v5359_v53  ;;  %vm204_vm1 = vcmp.eq.s32.totalorder %v6674_v43, %v5346_v49  ;;  %vm206_vm6 = vcmp.eq.s32.totalorder %v6674_v43, %v5366_v54 }
 0x105   :  { %3381 = vmatprep.mubr.bf16.mxu0 %v2669_v26  ;;  %3542 = vmatprep.mubr.bf16.mxu1 %v2671_v62  ;;  %v461_v11 = vsel %vm205_vm2, 1.0, %v9852_v58  ;;  %v463_v22 = vsel %vm207_vm3, 1.0, %v9852_v58  ;;  %v6693_v0 = vsel %vm295_vm13, 1.0, %v9852_v58  ;;  %v6699_v12 = vsel %vm2015_vm14, 1.0, %v9852_v58  ;;  %9965 = vst [vmem:[#allocation87_spill] sm:$0xff] %v6701_v24 }
 0x106   :  { %3382 = vmatmul.mubr.bf16.gmra.mrb[8].mxu0 %v2668_v2  ;;  %3543 = vmatmul.mubr.bf16.gmra.mrb[24].mxu1 %v2670_v45  ;;  %v460_v15 = vsel %vm204_vm1, 1.0, %v9852_v58  ;;  %v462_v9 = vsel %vm206_vm6, 1.0, %v9852_v58  ;;  %vm294_vm7 = vcmp.eq.s32.totalorder %v6397_v55, %v5366_v54  ;;  %vm2014_vm8 = vcmp.eq.s32.totalorder %v6572_v57, %v5366_v54  ;;  %v6727_v6 = vpop.permute.xlu1 %943 }
 0x107   :  { %v6713_v44 = vsel %vm292_vm15, 1.0, %v9852_v58  ;;  %v6719_v52 = vsel %vm2012_vm0, 1.0, %v9852_v58  ;;  %v6722_v25 = vsel %vm294_vm7, 1.0, %v9852_v58  ;;  %vm309_vm4 = vcmp.eq.s32.totalorder %v6444_v14, %v5350_v50  ;;  %9967 = vst [vmem:[#allocation89_spill] sm:$0xff] %v6727_v6  ;;  %3828 = vmatprep.subr.bf16.mxu1 %v9917_v29 }
 0x108   :  { %9966 = vst [vmem:[#allocation88_spill] sm:$0xff] %v6722_v25  ;;  %5007 = vset.pattern.permute.xlu1 %v9917_v29  ;;  %v6730_v32 = vsel %vm2014_vm8, 1.0, %v9852_v58  ;;  %vm2029_vm9 = vcmp.eq.s32.totalorder %v6701_v24, %v5350_v50  ;;  %vm311_vm10 = vcmp.eq.s32.totalorder %v6444_v14, %v5359_v53  ;;  %vm2031_vm12 = vcmp.eq.s32.totalorder %v6701_v24, %v5359_v53 }
 0x109   :  { %121 = vperm.xlu1 %5007, %v5082_v35   ;;  %vm1069_vm5 = vcmp.eq.s32.totalorder %v6727_v6, %v5350_v50  ;;  %vm1071_vm11 = vcmp.eq.s32.totalorder %v6727_v6, %v5359_v53  ;;  %vm1068_vm13 = vcmp.eq.s32.totalorder %v6727_v6, %v5346_v49  ;;  %vm1070_vm14 = vcmp.eq.s32.totalorder %v6727_v6, %v5366_v54  ;;  %v5057_v6 = vld [vmem:[%s9649_s1 + $0x150] sm:$0xff]  }
 0x10a   :  { %v1325_v26 = vsel %vm1069_vm5, 1.0, %v9852_v58  ;;  %v1327_v62 = vsel %vm1071_vm11, 1.0, %v9852_v58  ;;  %v1324_v2 = vsel %vm1068_vm13, 1.0, %v9852_v58  ;;  %v1326_v45 = vsel %vm1070_vm14, 1.0, %v9852_v58  ;;  %v6766_v48 = vpop.permute.xlu1 %946  ;;  %4730 = vmatprep.subr.bf16.mxu0 %v5057_v6 }
 0x10b   :  { %v1581_v23 = vadd.f32 %v1325_v26, %v461_v11  ;;  %v1583_v57 = vadd.f32 %v1327_v62, %v463_v22  ;;  %v1580_v55 = vadd.f32 %v1324_v2, %v460_v15  ;;  %v6758_v43 = vsel %vm309_vm4, 1.0, %v9852_v58  ;;  %9969 = vst [vmem:[#allocation91_spill] sm:$0xff] %v6766_v48  ;;  %4731 = vmatpush3.bf16.msra.mxu0 %v5058_v39 }
 0x10c   :  { %9968 = vst [vmem:[#allocation90_spill] sm:$0xff] %v6758_v43  ;;  %v1582_v25 = vadd.f32 %v1326_v45, %v462_v9  ;;  %v6772_v11 = vsel %vm2029_vm9, 1.0, %v9852_v58  ;;  %v6778_v22 = vsel %vm311_vm10, 1.0, %v9852_v58  ;;  %v6784_v15 = vsel %vm2031_vm12, 1.0, %v9852_v58  ;;  %v5059_v9 = vld [vmem:[%s9649_s1 + $0x1b0] sm:$0xff]   ;;  %v6803_v45 = vpop.permute.xlu0 %1849 }
 0x10d   :  { %9970 = vst [vmem:[#allocation92_spill] sm:$0xff] %v6772_v11  ;;  %9971 = vst [vmem:[#allocation93_spill] sm:$0xff] %v6778_v22  ;;  %5008 = vset.pattern.permute.xlu1 %v9906_v8  ;;  %vm1077_vm15 = vcmp.eq.s32.totalorder %v6766_v48, %v5350_v50  ;;  %vm1079_vm0 = vcmp.eq.s32.totalorder %v6766_v48, %v5359_v53  ;;  %vm308_vm2 = vcmp.eq.s32.totalorder %v6444_v14, %v5346_v49 }
 0x10e   :  { %9972 = vst [vmem:[#allocation94_spill] sm:$0xff] %v6784_v15  ;;  %vm2028_vm3 = vcmp.eq.s32.totalorder %v6701_v24, %v5346_v49  ;;  %985 = vperm.xlu1 %5008, %v5082_v35   ;;  %v1333_v26 = vsel %vm1077_vm15, 1.0, %v9852_v58  ;;  %v2445_v62 = vadd.f32 %v6121_v16, %v1581_v23  ;;  %v1335_v2 = vsel %vm1079_vm0, 1.0, %v9852_v58  ;;  %9973 = vst [vmem:[#allocation95_spill] sm:$0xff] %v6803_v45 }
 0x10f   :  { %vm1076_vm1 = vcmp.eq.s32.totalorder %v6766_v48, %v5346_v49  ;;  %v2447_v22 = vadd.f32 %v6146_v56, %v1583_v57  ;;  %v2444_v15 = vadd.f32 %v6149_v20, %v1580_v55  ;;  %vm1078_vm6 = vcmp.eq.s32.totalorder %v6766_v48, %v5366_v54  ;;  %3829 = vmatpush1.bf16.msra.mxu1 %v5059_v9  ;;  %v6815_v56 = vpop.permute.xlu1 %1810 }
 0x110   :  { %v1332_v43 = vsel %vm1076_vm1, 1.0, %v9852_v58  ;;  %v1589_v16 = vadd.f32 %v1333_v26, %v5904_v37  ;;  %v1591_v35 = vadd.f32 %v1335_v2, %v5916_v19  ;;  %v1334_v11 = vsel %vm1078_vm6, 1.0, %v9852_v58  ;;  %3830 = vmatprep.subr.bf16.mxu1 %v9917_v29  ;;  %9974 = vst [vmem:[#allocation96_spill] sm:$0xff] %v6815_v56  ;;  %v5060_v19 = vld [vmem:[%s9649_s1 + $0x1b8] sm:$0xff]  }
 0x111   :  { %v1588_v23 = vadd.f32 %v1332_v43, %v5927_v33  ;;  %v1590_v57 = vadd.f32 %v1334_v11, %v5943_v18  ;;  %v2446_v20 = vadd.f32 %v6152_v41, %v1582_v25  ;;  %v6823_v55 = vsel %vm308_vm2, 1.0, %v9852_v58  ;;  %v5083_v33 = vld [vmem:[%s9648_s0 + $0xa8] sm:$0xff]  ;;  %v6845_v18 = vpop.permute.xlu0 %124 }
 0x112   :  { %v6829_v37 = vsel %vm2028_vm3, 1.0, %v9852_v58  ;;  %988 = vperm.xlu1 %5008, %v5083_v33   ;;  %vm1941_vm7 = vcmp.eq.s32.totalorder %v6815_v56, %v5350_v50  ;;  %vm1943_vm8 = vcmp.eq.s32.totalorder %v6815_v56, %v5359_v53  ;;  %vm1940_vm4 = vcmp.eq.s32.totalorder %v6815_v56, %v5346_v49  ;;  %9975 = vst [vmem:[#allocation97_spill] sm:$0xff] %v6845_v18 }
 0x113   :  { %vm1942_vm9 = vcmp.eq.s32.totalorder %v6815_v56, %v5366_v54  ;;  %v2197_v41 = vsel %vm1941_vm7, 1.0, %v9852_v58  ;;  %v2199_v39 = vsel %vm1943_vm8, 1.0, %v9852_v58  ;;  %v2196_v43 = vsel %vm1940_vm4, 1.0, %v9852_v58  ;;  %3831 = vmatpush1.bf16.msra.mxu1 %v5060_v19  ;;  %v5061_v19 = vld [vmem:[%s9649_s1 + $0x158] sm:$0xff]  }
 0x114   :  { %v2198_v25 = vsel %vm1942_vm9, 1.0, %v9852_v58  ;;  %v2453_v6 = vadd.f32 %v2197_v41, %v1589_v16  ;;  %v2455_v11 = vadd.f32 %v2199_v39, %v1591_v35  ;;  %v2452_v9 = vadd.f32 %v2196_v43, %v1588_v23  ;;  %3832 = vmatprep.subr.bf16.mxu1 %v9917_v29  ;;  %v6861_v2 = vpop.permute.xlu1 %85  ;;  %4732 = vmatprep.subr.bf16.mxu0 %v5061_v19 }
 0x115   :  { %v2454_v26 = vadd.f32 %v2198_v25, %v1590_v57  ;;  %vm310_vm10 = vcmp.eq.s32.totalorder %v6444_v14, %v5366_v54  ;;  %vm2030_vm12 = vcmp.eq.s32.totalorder %v6701_v24, %v5366_v54  ;;  %vm325_vm5 = vcmp.eq.s32.totalorder %v6845_v18, %v5350_v50  ;;  %9976 = vst [vmem:[#allocation98_spill] sm:$0xff] %v6861_v2 }
 0x116   :  { %vm2045_vm11 = vcmp.eq.s32.totalorder %v6803_v45, %v5350_v50  ;;  %5010 = vset.pattern.permute.xlu1 %v9911_v13  ;;  %v2677_v16 = vpack.c.bf16 %v2453_v6, %v2445_v62  ;;  %v2679_v35 = vpack.c.bf16 %v2455_v11, %v2447_v22  ;;  %v2676_v23 = vpack.c.bf16 %v2452_v9, %v2444_v15  ;;  %v5062_v22 = vld [vmem:[%s9649_s1 + $0x118] sm:$0xff]  }
 0x117   :  { %v2678_v57 = vpack.c.bf16 %v2454_v26, %v2446_v20  ;;  %1852 = vperm.xlu1 %5010, %v5083_v33   ;;  %vm221_vm13 = vcmp.eq.s32.totalorder %v6861_v2, %v5350_v50  ;;  %vm223_vm14 = vcmp.eq.s32.totalorder %v6861_v2, %v5359_v53  ;;  %vm220_vm15 = vcmp.eq.s32.totalorder %v6861_v2, %v5346_v49  ;;  %v5084_v26 = vld [vmem:[%s9648_s0 + $0xb0] sm:$0xff] }
 0x118   :  { %vm222_vm0 = vcmp.eq.s32.totalorder %v6861_v2, %v5366_v54  ;;  %3389 = vmatprep.mubr.bf16.mxu0 %v2677_v16  ;;  %3550 = vmatprep.mubr.bf16.mxu1 %v2679_v35  ;;  %v477_v15 = vsel %vm221_vm13, 1.0, %v9852_v58  ;;  %v479_v62 = vsel %vm223_vm14, 1.0, %v9852_v58  ;;  %v6883_v20 = vsel %vm310_vm10, 1.0, %v9852_v58 }
 0x119   :  { %v6889_v33 = vsel %vm2030_vm12, 1.0, %v9852_v58  ;;  %3390 = vmatmul.mubr.bf16.gmra.mrb[12].mxu0 %v2676_v23  ;;  %3551 = vmatmul.mubr.bf16.gmra.mrb[28].mxu1 %v2678_v57  ;;  %v476_v41 = vsel %vm220_vm15, 1.0, %v9852_v58  ;;  %v478_v39 = vsel %vm222_vm0, 1.0, %v9852_v58  ;;  %vm327_vm2 = vcmp.eq.s32.totalorder %v6845_v18, %v5359_v53  ;;  %v6915_v11 = vpop.permute.xlu1 %949  ;;  %v6952_v48 = vpop.permute.xlu0 %130 }
 0x11a   :  { %vm2047_vm3 = vcmp.eq.s32.totalorder %v6803_v45, %v5359_v53  ;;  %v6901_v43 = vsel %vm325_vm5, 1.0, %v9852_v58  ;;  %v6907_v25 = vsel %vm2045_vm11, 1.0, %v9852_v58  ;;  %v6910_v6 = vsel %vm327_vm2, 1.0, %v9852_v58  ;;  %9978 = vst [vmem:[#allocation100_spill] sm:$0xff] %v6915_v11  ;;  %4733 = vmatpush3.bf16.msra.mxu0 %v5062_v22  ;;  %9981 = vst [vmem:[#allocation103_spill] sm:$0xff] %v6952_v48 }
 0x11b   :  { %9977 = vst [vmem:[#allocation99_spill] sm:$0xff] %v6910_v6  ;;  %vm324_vm1 = vcmp.eq.s32.totalorder %v6845_v18, %v5346_v49  ;;  %5011 = vset.pattern.permute.xlu1 %v9917_v29  ;;  %v6918_v9 = vsel %vm2047_vm3, 1.0, %v9852_v58  ;;  %vm2044_vm6 = vcmp.eq.s32.totalorder %v6803_v45, %v5346_v49  ;;  %vm326_vm7 = vcmp.eq.s32.totalorder %v6845_v18, %v5366_v54 }
 0x11c   :  { %vm2046_vm8 = vcmp.eq.s32.totalorder %v6803_v45, %v5366_v54  ;;  %127 = vperm.xlu1 %5011, %v5084_v26   ;;  %vm1085_vm4 = vcmp.eq.s32.totalorder %v6915_v11, %v5350_v50  ;;  %vm1087_vm9 = vcmp.eq.s32.totalorder %v6915_v11, %v5359_v53  ;;  %vm1084_vm10 = vcmp.eq.s32.totalorder %v6915_v11, %v5346_v49 }
 0x11d   :  { %vm1086_vm12 = vcmp.eq.s32.totalorder %v6915_v11, %v5366_v54  ;;  %v1341_v16 = vsel %vm1085_vm4, 1.0, %v9852_v58  ;;  %v1343_v35 = vsel %vm1087_vm9, 1.0, %v9852_v58  ;;  %v1340_v23 = vsel %vm1084_vm10, 1.0, %v9852_v58  ;;  %v5063_v11 = vld [vmem:[%s9649_s1 + $0x1c0] sm:$0xff]   ;;  %v6950_v2 = vpop.permute.xlu1 %952 }
 0x11e   :  { %v1342_v57 = vsel %vm1086_vm12, 1.0, %v9852_v58  ;;  %v1597_v19 = vadd.f32 %v1341_v16, %v477_v15  ;;  %v1599_v22 = vadd.f32 %v1343_v35, %v479_v62  ;;  %v1596_v24 = vadd.f32 %v1340_v23, %v476_v41  ;;  %9980 = vst [vmem:[#allocation102_spill] sm:$0xff] %v6950_v2  ;;  %3833 = vmatpush1.bf16.msra.mxu1 %v5063_v11 }
 0x11f   :  { %v6945_v14 = vsel %vm324_vm1, 1.0, %v9852_v58  ;;  %v1598_v56 = vadd.f32 %v1342_v57, %v478_v39  ;;  %v6958_v15 = vsel %vm2044_vm6, 1.0, %v9852_v58  ;;  %v6964_v62 = vsel %vm326_vm7, 1.0, %v9852_v58  ;;  %3834 = vmatprep.subr.bf16.mxu1 %v9917_v29 }
 0x120   :  { %9979 = vst [vmem:[#allocation101_spill] sm:$0xff] %v6945_v14  ;;  %9982 = vst [vmem:[#allocation104_spill] sm:$0xff] %v6964_v62  ;;  %v6970_v41 = vsel %vm2046_vm8, 1.0, %v9852_v58  ;;  %5012 = vset.pattern.permute.xlu1 %v9906_v8  ;;  %vm1093_vm5 = vcmp.eq.s32.totalorder %v6950_v2, %v5350_v50  ;;  %v6976_v39 = vadd.f32 %v6167_v27, %v1597_v19 }
 0x121   :  { %9983 = vst [vmem:[#allocation105_spill] sm:$0xff] %v6970_v41  ;;  %vm1095_vm11 = vcmp.eq.s32.totalorder %v6950_v2, %v5359_v53  ;;  %v6981_v16 = vadd.f32 %v6173_v21, %v1599_v22  ;;  %991 = vperm.xlu1 %5012, %v5084_v26   ;;  %v1349_v35 = vsel %vm1093_vm5, 1.0, %v9852_v58  ;;  %vm1092_vm13 = vcmp.eq.s32.totalorder %v6950_v2, %v5346_v49  ;;  %v5064_v26 = vld [vmem:[%s9649_s1 + $0x160] sm:$0xff]   ;;  %v7035_v22 = vpop.permute.xlu0 %1855  ;;  %v10007_v41 = vld [vmem:[#allocation38_spill] sm:$0xff] }
 0x122   :  { %v1351_v23 = vsel %vm1095_vm11, 1.0, %v9852_v58  ;;  %v6988_v8 = vadd.f32 %v6209_v60, %v1596_v24  ;;  %v1605_v27 = vadd.f32 %v1349_v35, %v6272_v31  ;;  %v1348_v19 = vsel %vm1092_vm13, 1.0, %v9852_v58  ;;  %v9984_v31 = vld [vmem:[#allocation52_spill] sm:$0xff]  ;;  %9987 = vst [vmem:[#allocation108_spill] sm:$0xff] %v7035_v22  ;;  %4734 = vmatprep.subr.bf16.mxu0 %v5064_v26 }
 0x123   :  { %v1607_v57 = vadd.f32 %v1351_v23, %v6324_v17  ;;  %vm1094_vm14 = vcmp.eq.s32.totalorder %v6950_v2, %v5366_v54  ;;  %vm161_vm15 = vcmp.eq.s32.totalorder %v6130_v7, %v5388_v61  ;;  %v1604_v21 = vadd.f32 %v1348_v19, %v6330_v63  ;;  %v7005_v17 = vpop.permute.xlu1 %1816  ;;  %v5065_v63 = vld [vmem:[%s9649_s1 + $0x120] sm:$0xff]  }
 0x124   :  { %v1350_v60 = vsel %vm1094_vm14, 1.0, %v9852_v58  ;;  %v2462_v24 = vadd.f32 %v6217_v40, %v1598_v56  ;;  %vm341_vm0 = vcmp.eq.s32.totalorder %v6952_v48, %v5350_v50  ;;  %vm1025_vm2 = vcmp.eq.s32.totalorder %v9984_v31, %v5388_v61  ;;  %9985 = vst [vmem:[#allocation106_spill] sm:$0xff] %v7005_v17  ;;  %v5066_v40 = vld [vmem:[%s9649_s1 + $0x1c8] sm:$0xff]   ;;  %4735 = vmatpush3.bf16.msra.mxu0 %v5065_v63 }
 0x125   :  { %v1606_v11 = vadd.f32 %v1350_v60, %v6342_v3  ;;  %v7018_v56 = vsel %vm341_vm0, 1.0, %v9852_v58  ;;  %vm343_vm3 = vcmp.eq.s32.totalorder %v6952_v48, %v5359_v53  ;;  %vm340_vm1 = vcmp.eq.s32.totalorder %v6952_v48, %v5346_v49  ;;  %v5085_v3 = vld [vmem:[%s9648_s0 + $0xb8] sm:$0xff]  ;;  %3835 = vmatpush1.bf16.msra.mxu1 %v5066_v40  ;;  %v5067_v40 = vld [vmem:[%s9649_s1 + $0x168] sm:$0xff]  }
 0x126   :  { %9986 = vst [vmem:[#allocation107_spill] sm:$0xff] %v7018_v56  ;;  %994 = vperm.xlu1 %5012, %v5085_v3   ;;  %vm1957_vm6 = vcmp.eq.s32.totalorder %v7005_v17, %v5350_v50  ;;  %vm1959_vm7 = vcmp.eq.s32.totalorder %v7005_v17, %v5359_v53  ;;  %vm1956_vm8 = vcmp.eq.s32.totalorder %v7005_v17, %v5346_v49 }
 0x127   :  { %vm1958_vm4 = vcmp.eq.s32.totalorder %v7005_v17, %v5366_v54  ;;  %v2213_v35 = vsel %vm1957_vm6, 1.0, %v9852_v58  ;;  %v2215_v23 = vsel %vm1959_vm7, 1.0, %v9852_v58  ;;  %v2212_v19 = vsel %vm1956_vm8, 1.0, %v9852_v58  ;;  %3836 = vmatprep.subr.bf16.mxu1 %v9917_v29  ;;  %4736 = vmatprep.subr.bf16.mxu0 %v5067_v40 }
 0x128   :  { %v2214_v60 = vsel %vm1958_vm4, 1.0, %v9852_v58  ;;  %v2469_v45 = vadd.f32 %v2213_v35, %v1605_v27  ;;  %v2471_v18 = vadd.f32 %v2215_v23, %v1607_v57  ;;  %v2468_v2 = vadd.f32 %v2212_v19, %v1604_v21  ;;  %v7059_v57 = vpop.permute.xlu1 %91  ;;  %v5069_v35 = vld [vmem:[%s9649_s1 + $0x1d0] sm:$0xff]  }
 0x129   :  { %v2470_v56 = vadd.f32 %v2214_v60, %v1606_v11  ;;  %vm2061_vm9 = vcmp.eq.s32.totalorder %v7035_v22, %v5350_v50  ;;  %v7048_v17 = vsel %vm343_vm3, 1.0, %v9852_v58  ;;  %vm2063_vm10 = vcmp.eq.s32.totalorder %v7035_v22, %v5359_v53  ;;  %9990 = vst [vmem:[#allocation111_spill] sm:$0xff] %v7059_v57  ;;  %3837 = vmatpush1.bf16.msra.mxu1 %v5069_v35 }
 0x12a   :  { %9988 = vst [vmem:[#allocation109_spill] sm:$0xff] %v7048_v17  ;;  %v7056_v27 = vsel %vm340_vm1, 1.0, %v9852_v58  ;;  %5014 = vset.pattern.permute.xlu1 %v9911_v13  ;;  %v2685_v21 = vpack.c.bf16 %v2469_v45, %v6976_v39  ;;  %v2687_v11 = vpack.c.bf16 %v2471_v18, %v6981_v16  ;;  %v2684_v26 = vpack.c.bf16 %v2468_v2, %v6988_v8  ;;  %v5068_v13 = vld [vmem:[%s9649_s1 + $0x128] sm:$0xff]   ;;  %v10003_v17 = vld [vmem:[#allocation64_spill] sm:$0xff] }
 0x12b   :  { %9989 = vst [vmem:[#allocation110_spill] sm:$0xff] %v7056_v27  ;;  %v2686_v63 = vpack.c.bf16 %v2470_v56, %v2462_v24  ;;  %1858 = vperm.xlu1 %5014, %v5085_v3   ;;  %vm237_vm12 = vcmp.eq.s32.totalorder %v7059_v57, %v5350_v50  ;;  %vm239_vm5 = vcmp.eq.s32.totalorder %v7059_v57, %v5359_v53  ;;  %v7089_v16 = vsel %vm2061_vm9, 1.0, %v9852_v58 }
 0x12c   :  { %vm236_vm11 = vcmp.eq.s32.totalorder %v7059_v57, %v5346_v49  ;;  %vm238_vm13 = vcmp.eq.s32.totalorder %v7059_v57, %v5366_v54  ;;  %3397 = vmatprep.mubr.bf16.mxu0 %v2685_v21  ;;  %3558 = vmatprep.mubr.bf16.mxu1 %v2687_v11  ;;  %v493_v45 = vsel %vm237_vm12, 1.0, %v9852_v58  ;;  %v495_v18 = vsel %vm239_vm5, 1.0, %v9852_v58  ;;  %9991 = vst [vmem:[#allocation112_spill] sm:$0xff] %v7089_v16  ;;  %v9997_v21 = vld [vmem:[#allocation60_spill] sm:$0xff]  ;;  %v5070_v57 = vld [vmem:[%s9649_s1 + $0x170] sm:$0xff]   ;;  %v10006_v16 = vld [vmem:[#allocation58_spill] sm:$0xff] }
 0x12d   :  { %v492_v2 = vsel %vm236_vm11, 1.0, %v9852_v58  ;;  %v494_v39 = vsel %vm238_vm13, 1.0, %v9852_v58  ;;  %3398 = vmatmul.mubr.bf16.gmra.mrb[16].mxu0 %v2684_v26  ;;  %3559 = vmatmul.mubr.bf16.gmra.mrb[32].mxu1 %v2686_v63  ;;  %v7095_v8 = vsel %vm2063_vm10, 1.0, %v9852_v58  ;;  %vm2060_vm14 = vcmp.eq.s32.totalorder %v7035_v22, %v5346_v49  ;;  %v7113_v23 = vpop.permute.xlu1 %955 }
 0x12e   :  { %9992 = vst [vmem:[#allocation113_spill] sm:$0xff] %v7095_v8  ;;  %vm342_vm0 = vcmp.eq.s32.totalorder %v6952_v48, %v5366_v54  ;;  %v7102_v24 = vsel %vm2060_vm14, 1.0, %v9852_v58  ;;  %vm2062_vm3 = vcmp.eq.s32.totalorder %v7035_v22, %v5366_v54  ;;  %v417_v3 = vsel %vm161_vm15, 1.0, %v9852_v58  ;;  %9995 = vst [vmem:[#allocation116_spill] sm:$0xff] %v7113_v23  ;;  %4737 = vmatpush3.bf16.msra.mxu0 %v5068_v13  ;;  %v10004_v8 = vld [vmem:[#allocation65_spill] sm:$0xff] }
 0x12f   :  { %9993 = vst [vmem:[#allocation114_spill] sm:$0xff] %v7102_v24  ;;  %v7105_v56 = vsel %vm342_vm0, 1.0, %v9852_v58  ;;  %v7116_v19 = vsel %vm2062_vm3, 1.0, %v9852_v58  ;;  %vm1033_vm1 = vcmp.eq.s32.totalorder %v6211_v1, %v5388_v61  ;;  %v1281_v60 = vsel %vm1025_vm2, 1.0, %v9852_v58  ;;  %3838 = vmatprep.subr.bf16.mxu1 %v9917_v29  ;;  %4738 = vmatprep.subr.bf16.mxu0 %v5070_v57  ;;  %v10005_v57 = vld [vmem:[#allocation67_spill] sm:$0xff] }
 0x130   :  { %9994 = vst [vmem:[#allocation115_spill] sm:$0xff] %v7105_v56  ;;  %9996 = vst [vmem:[#allocation117_spill] sm:$0xff] %v7116_v19  ;;  %vm1897_vm6 = vcmp.eq.s32.totalorder %v9997_v21, %v5388_v61  ;;  %vm1101_vm15 = vcmp.eq.s32.totalorder %v7113_v23, %v5350_v50  ;;  %vm1103_vm7 = vcmp.eq.s32.totalorder %v7113_v23, %v5359_v53  ;;  %v1289_v19 = vsel %vm1033_vm1, 1.0, %v9852_v58 }
 0x131   :  { %vm1100_vm8 = vcmp.eq.s32.totalorder %v7113_v23, %v5346_v49  ;;  %vm1102_vm4 = vcmp.eq.s32.totalorder %v7113_v23, %v5366_v54  ;;  %v1357_v11 = vsel %vm1101_vm15, 1.0, %v9852_v58  ;;  %v1359_v26 = vsel %vm1103_vm7, 1.0, %v9852_v58  ;;  %v7142_v56 = vpop.permute.xlu1 %958  ;;  %v5071_v23 = vld [vmem:[%s9649_s1 + $0x130] sm:$0xff]  }
 0x132   :  { %v1356_v63 = vsel %vm1100_vm8, 1.0, %v9852_v58  ;;  %v1358_v40 = vsel %vm1102_vm4, 1.0, %v9852_v58  ;;  %v1613_v35 = vadd.f32 %v1357_v11, %v493_v45  ;;  %v1615_v13 = vadd.f32 %v1359_v26, %v495_v18  ;;  %9998 = vst [vmem:[#allocation118_spill] sm:$0xff] %v7142_v56  ;;  %v9999_v18 = vld [vmem:[#allocation9_spill] sm:$0xff]  ;;  %v10001_v11 = vld [vmem:[#allocation56_spill] sm:$0xff]  ;;  %4739 = vmatpush3.bf16.msra.mxu0 %v5071_v23 }
 0x133   :  { %v1612_v22 = vadd.f32 %v1356_v63, %v492_v2  ;;  %v1614_v48 = vadd.f32 %v1358_v40, %v494_v39  ;;  %v1537_v27 = vadd.f32 %v1281_v60, %v417_v3  ;;  %v2153_v45 = vsel %vm1897_vm6, 1.0, %v9852_v58  ;;  %v10000_v2 = vld [vmem:[#allocation55_spill] sm:$0xff]  ;;  %v10002_v63 = vld [vmem:[#allocation57_spill] sm:$0xff] }
 0x134   :  { %vm160_vm2 = vcmp.eq.s32.totalorder %v6130_v7, %v9999_v18  ;;  %vm1109_vm9 = vcmp.eq.s32.totalorder %v7142_v56, %v5350_v50  ;;  %v2477_v39 = vadd.f32 %v10000_v2, %v1613_v35  ;;  %vm1111_vm10 = vcmp.eq.s32.totalorder %v7142_v56, %v5359_v53 }
 0x135   :  { %v2479_v26 = vadd.f32 %v10001_v11, %v1615_v13  ;;  %v1365_v3 = vsel %vm1109_vm9, 1.0, %v9852_v58  ;;  %v1367_v60 = vsel %vm1111_vm10, 1.0, %v9852_v58  ;;  %vm1108_vm12 = vcmp.eq.s32.totalorder %v7142_v56, %v5346_v49 }
 0x136   :  { %v2476_v40 = vadd.f32 %v10002_v63, %v1612_v22  ;;  %v1621_v24 = vadd.f32 %v1365_v3, %v10003_v17  ;;  %v1623_v35 = vadd.f32 %v1367_v60, %v10004_v8  ;;  %v1364_v2 = vsel %vm1108_vm12, 1.0, %v9852_v58  ;;  %v7177_v6 = vpop.permute.xlu1 %1822  ;;  %v10009_v22 = vld [vmem:[#allocation68_spill] sm:$0xff]  ;;  %v10010_v17 = vld [vmem:[#allocation42_spill] sm:$0xff] }
 0x137   :  { %vm1110_vm5 = vcmp.eq.s32.totalorder %v7142_v56, %v5366_v54  ;;  %v1620_v13 = vadd.f32 %v1364_v2, %v10005_v57  ;;  %v2478_v62 = vadd.f32 %v10006_v16, %v1614_v48  ;;  %v1545_v14 = vadd.f32 %v1289_v19, %v10007_v41  ;;  %10008 = vst [vmem:[#allocation9_spill] sm:$0xff] %v7177_v6  ;;  %v5072_v8 = vld [vmem:[%s9649_s1 + $0x178] sm:$0xff]  }
 0x138   :  { %v1366_v11 = vsel %vm1110_vm5, 1.0, %v9852_v58  ;;  %v7181_v3 = vadd.f32 %v10010_v17, %v1537_v27  ;;  %v416_v60 = vsel %vm160_vm2, 1.0, %v9852_v58  ;;  %vm1024_vm11 = vcmp.eq.s32.totalorder %v9984_v31, %v9999_v18  ;;  %4740 = vmatprep.subr.bf16.mxu0 %v5072_v8  ;;  %v5073_v19 = vld [vmem:[%s9649_s1 + $0x138] sm:$0xff]  }
 0x139   :  { %v1622_v23 = vadd.f32 %v1366_v11, %v10009_v22  ;;  %vm1973_vm13 = vcmp.eq.s32.totalorder %v7177_v6, %v5350_v50  ;;  %vm1975_vm14 = vcmp.eq.s32.totalorder %v7177_v6, %v5359_v53  ;;  %vm1972_vm0 = vcmp.eq.s32.totalorder %v7177_v6, %v5346_v49  ;;  %v5074_v63 = vld [vmem:[%s9649_s1 + $0x1d8] sm:$0xff]   ;;  %4741 = vmatpush3.bf16.msra.mxu0 %v5073_v19 }
 0x13a   :  { %vm1974_vm3 = vcmp.eq.s32.totalorder %v7177_v6, %v5366_v54  ;;  %v2229_v48 = vsel %vm1973_vm13, 1.0, %v9852_v58  ;;  %v2231_v41 = vsel %vm1975_vm14, 1.0, %v9852_v58  ;;  %v2228_v27 = vsel %vm1972_vm0, 1.0, %v9852_v58  ;;  %3839 = vmatpush1.bf16.msra.mxu1 %v5074_v63  ;;  %v10013_v63 = vld [vmem:[#allocation62_spill] sm:$0xff] }
 0x13b   :  { %v2230_v16 = vsel %vm1974_vm3, 1.0, %v9852_v58  ;;  %v2485_v2 = vadd.f32 %v2229_v48, %v1621_v24  ;;  %v2487_v57 = vadd.f32 %v2231_v41, %v1623_v35  ;;  %v2484_v11 = vadd.f32 %v2228_v27, %v1620_v13  ;;  %v7220_v6 = vpop.permute.xlu1 %97  ;;  %3840 = vmatprep.subr.bf16.mxu1 %v9917_v29 }
 0x13c   :  { %v2486_v22 = vadd.f32 %v2230_v16, %v1622_v23  ;;  %v7210_v17 = vadd.f32 %v2153_v45, %v1545_v14  ;;  %vm1032_vm1 = vcmp.eq.s32.totalorder %v6211_v1, %v9999_v18  ;;  %v1280_v8 = vsel %vm1024_vm11, 1.0, %v9852_v58  ;;  %10011 = vst [vmem:[#allocation55_spill] sm:$0xff] %v7220_v6  ;;  %v5075_v45 = vld [vmem:[%s9649_s1 + $0x1e0] sm:$0xff]   ;;  %v10012_v16 = vld [vmem:[#allocation44_spill] sm:$0xff] }
 0x13d   :  { %vm1896_vm6 = vcmp.eq.s32.totalorder %v9997_v21, %v9999_v18  ;;  %v2693_v24 = vpack.c.bf16 %v2485_v2, %v2477_v39  ;;  %v2695_v35 = vpack.c.bf16 %v2487_v57, %v2479_v26  ;;  %v2692_v13 = vpack.c.bf16 %v2484_v11, %v2476_v40  ;;  %v10014_v2 = vld [vmem:[#allocation26_spill] sm:$0xff]  ;;  %v10020_v1 = vld [vmem:[#allocation40_spill] sm:$0xff] }
 0x13e   :  { %v2694_v14 = vpack.c.bf16 %v2486_v22, %v2478_v62  ;;  %vm253_vm15 = vcmp.eq.s32.totalorder %v7220_v6, %v5350_v50  ;;  %vm255_vm7 = vcmp.eq.s32.totalorder %v7220_v6, %v5359_v53  ;;  %vm252_vm8 = vcmp.eq.s32.totalorder %v7220_v6, %v5346_v49  ;;  %v10015_v57 = vld [vmem:[#allocation66_spill] sm:$0xff]  ;;  %3841 = vmatpush1.bf16.msra.mxu1 %v5075_v45 }
 0x13f   :  { %vm254_vm4 = vcmp.eq.s32.totalorder %v7220_v6, %v5366_v54  ;;  %3405 = vmatprep.mubr.bf16.mxu0 %v2693_v24  ;;  %3566 = vmatprep.mubr.bf16.mxu1 %v2695_v35  ;;  %v509_v62 = vsel %vm253_vm15, 1.0, %v9852_v58  ;;  %v511_v39 = vsel %vm255_vm7, 1.0, %v9852_v58  ;;  %v508_v26 = vsel %vm252_vm8, 1.0, %v9852_v58 }
 0x140   :  { %v510_v40 = vsel %vm254_vm4, 1.0, %v9852_v58  ;;  %3406 = vmatmul.mubr.bf16.gmra.mrb[20].mxu0 %v2692_v13  ;;  %3567 = vmatmul.mubr.bf16.gmra.mrb[36].mxu1 %v2694_v14  ;;  %v1288_v48 = vsel %vm1032_vm1, 1.0, %v9852_v58  ;;  %v1536_v41 = vadd.f32 %v1280_v8, %v416_v60  ;;  %v2152_v27 = vsel %vm1896_vm6, 1.0, %v9852_v58  ;;  %v7255_v11 = vpop.permute.xlu1 %961  ;;  %v10017_v60 = vld [vmem:[#allocation47_spill] sm:$0xff] }
 0x141   :  { %v1544_v19 = vadd.f32 %v1288_v48, %v10012_v16  ;;  %vm177_vm2 = vcmp.eq.s32.totalorder %v10013_v63, %v5388_v61  ;;  %vm185_vm9 = vcmp.eq.s32.totalorder %v10014_v2, %v5388_v61  ;;  %vm1041_vm10 = vcmp.eq.s32.totalorder %v10015_v57, %v5388_v61  ;;  %10016 = vst [vmem:[#allocation56_spill] sm:$0xff] %v7255_v11  ;;  %v10018_v48 = vld [vmem:[#allocation20_spill] sm:$0xff] }
 0x142   :  { %v7258_v22 = vadd.f32 %v10017_v60, %v1536_v41  ;;  %v433_v8 = vsel %vm177_vm2, 1.0, %v9852_v58  ;;  %v441_v24 = vsel %vm185_vm9, 1.0, %v9852_v58  ;;  %vm1049_vm12 = vcmp.eq.s32.totalorder %v6395_v28, %v5388_v61  ;;  %3842 = vmatprep.subr.bf16.mxu1 %v9917_v29 }
 0x143   :  { %vm1117_vm5 = vcmp.eq.s32.totalorder %v7255_v11, %v5350_v50  ;;  %vm1119_vm11 = vcmp.eq.s32.totalorder %v7255_v11, %v5359_v53  ;;  %vm1116_vm13 = vcmp.eq.s32.totalorder %v7255_v11, %v5346_v49  ;;  %vm1118_vm14 = vcmp.eq.s32.totalorder %v7255_v11, %v5366_v54 }
 0x144   :  { %v1373_v35 = vsel %vm1117_vm5, 1.0, %v9852_v58  ;;  %v1375_v13 = vsel %vm1119_vm11, 1.0, %v9852_v58  ;;  %v1372_v14 = vsel %vm1116_vm13, 1.0, %v9852_v58  ;;  %v1374_v45 = vsel %vm1118_vm14, 1.0, %v9852_v58  ;;  %v7279_v6 = vpop.permute.xlu1 %964 }
 0x145   :  { %vm2102_vm0 = vcmp.eq.s32.totalorder %v10018_v48, %v5366_v54  ;;  %v1629_v41 = vadd.f32 %v1373_v35, %v509_v62  ;;  %v1631_v16 = vadd.f32 %v1375_v13, %v511_v39  ;;  %v1628_v60 = vadd.f32 %v1372_v14, %v508_v26  ;;  %10019 = vst [vmem:[#allocation57_spill] sm:$0xff] %v7279_v6  ;;  %v10022_v13 = vld [vmem:[#allocation73_spill] sm:$0xff] }
 0x146   :  { %v1630_v23 = vadd.f32 %v1374_v45, %v510_v40  ;;  %v7281_v56 = vadd.f32 %v2152_v27, %v1544_v19  ;;  %v1297_v11 = vsel %vm1041_vm10, 1.0, %v9852_v58  ;;  %v1305_v21 = vsel %vm1049_vm12, 1.0, %v9852_v58  ;;  %v10021_v19 = vld [vmem:[#allocation70_spill] sm:$0xff] }
 0x147   :  { %vm1905_vm3 = vcmp.eq.s32.totalorder %v10020_v1, %v5388_v61  ;;  %vm1125_vm1 = vcmp.eq.s32.totalorder %v7279_v6, %v5350_v50  ;;  %v2493_v62 = vadd.f32 %v6403_v38, %v1629_v41  ;;  %vm1127_vm6 = vcmp.eq.s32.totalorder %v7279_v6, %v5359_v53 }
 0x148   :  { %v2495_v39 = vadd.f32 %v6415_v36, %v1631_v16  ;;  %v1381_v26 = vsel %vm1125_vm1, 1.0, %v9852_v58  ;;  %v1383_v40 = vsel %vm1127_vm6, 1.0, %v9852_v58  ;;  %vm1124_vm15 = vcmp.eq.s32.totalorder %v7279_v6, %v5346_v49 }
 0x149   :  { %v2492_v27 = vadd.f32 %v6461_v34, %v1628_v60  ;;  %v1637_v35 = vadd.f32 %v1381_v26, %v10021_v19  ;;  %v1639_v14 = vadd.f32 %v1383_v40, %v10022_v13  ;;  %v1380_v38 = vsel %vm1124_vm15, 1.0, %v9852_v58  ;;  %v7314_v31 = vpop.permute.xlu1 %1828  ;;  %v10024_v40 = vld [vmem:[#allocation75_spill] sm:$0xff] }
 0x14a   :  { %vm1126_vm7 = vcmp.eq.s32.totalorder %v7279_v6, %v5366_v54  ;;  %v1636_v36 = vadd.f32 %v1380_v38, %v6455_v10  ;;  %v2494_v41 = vadd.f32 %v6511_v59, %v1630_v23  ;;  %10023 = vst [vmem:[#allocation64_spill] sm:$0xff] %v7314_v31  ;;  %v1553_v60 = vadd.f32 %v1297_v11, %v433_v8  ;;  %v5076_v10 = vld [vmem:[%s9649_s1 + $0x1e8] sm:$0xff]  }
 0x14b   :  { %v1382_v45 = vsel %vm1126_vm7, 1.0, %v9852_v58  ;;  %v1561_v26 = vadd.f32 %v1305_v21, %v441_v24  ;;  %vm1913_vm8 = vcmp.eq.s32.totalorder %v10024_v40, %v5388_v61  ;;  %vm1989_vm4 = vcmp.eq.s32.totalorder %v7314_v31, %v5350_v50  ;;  %3843 = vmatpush1.bf16.msra.mxu1 %v5076_v10 }
 0x14c   :  { %v1638_v34 = vadd.f32 %v1382_v45, %v6505_v30  ;;  %vm1991_vm2 = vcmp.eq.s32.totalorder %v7314_v31, %v5359_v53  ;;  %vm1988_vm9 = vcmp.eq.s32.totalorder %v7314_v31, %v5346_v49  ;;  %vm1990_vm10 = vcmp.eq.s32.totalorder %v7314_v31, %v5366_v54  ;;  %3844 = vmatprep.subr.bf16.mxu1 %v9917_v29 }
 0x14d   :  { %v2245_v30 = vsel %vm1989_vm4, 1.0, %v9852_v58  ;;  %v2247_v59 = vsel %vm1991_vm2, 1.0, %v9852_v58  ;;  %v2244_v21 = vsel %vm1988_vm9, 1.0, %v9852_v58  ;;  %v2246_v23 = vsel %vm1990_vm10, 1.0, %v9852_v58 }
 0x14e   :  { %v2501_v11 = vadd.f32 %v2245_v30, %v1637_v35  ;;  %v2503_v8 = vadd.f32 %v2247_v59, %v1639_v14  ;;  %v2500_v24 = vadd.f32 %v2244_v21, %v1636_v36  ;;  %v2502_v19 = vadd.f32 %v2246_v23, %v1638_v34  ;;  %v7349_v14 = vpop.permute.xlu1 %103  ;;  %v10026_v59 = vld [vmem:[#allocation48_spill] sm:$0xff] }
 0x14f   :  { %v2161_v13 = vsel %vm1905_vm3, 1.0, %v9852_v58  ;;  %v2169_v38 = vsel %vm1913_vm8, 1.0, %v9852_v58  ;;  %v2358_v35 = vsel %vm2102_vm0, 1.0, %v9852_v58  ;;  %vm176_vm12 = vcmp.eq.s32.totalorder %v10013_v63, %v9999_v18  ;;  %10025 = vst [vmem:[#allocation65_spill] sm:$0xff] %v7349_v14  ;;  %v10051_v63 = vld [vmem:[#allocation43_spill] sm:$0xff] }
 0x150   :  { %v2701_v29 = vpack.c.bf16 %v2501_v11, %v2493_v62  ;;  %v2703_v36 = vpack.c.bf16 %v2503_v8, %v2495_v39  ;;  %v2700_v45 = vpack.c.bf16 %v2500_v24, %v2492_v27  ;;  %v2702_v34 = vpack.c.bf16 %v2502_v19, %v2494_v41  ;;  %v10028_v11 = vld [vmem:[#allocation50_spill] sm:$0xff] }
 0x151   :  { %vm269_vm5 = vcmp.eq.s32.totalorder %v7349_v14, %v5350_v50  ;;  %vm271_vm11 = vcmp.eq.s32.totalorder %v7349_v14, %v5359_v53  ;;  %vm268_vm13 = vcmp.eq.s32.totalorder %v7349_v14, %v5346_v49  ;;  %vm270_vm14 = vcmp.eq.s32.totalorder %v7349_v14, %v5366_v54 }
 0x152   :  { %3413 = vmatprep.mubr.bf16.mxu0 %v2701_v29  ;;  %3574 = vmatprep.mubr.bf16.mxu1 %v2703_v36  ;;  %v525_v10 = vsel %vm269_vm5, 1.0, %v9852_v58  ;;  %v527_v62 = vsel %vm271_vm11, 1.0, %v9852_v58  ;;  %v524_v39 = vsel %vm268_vm13, 1.0, %v9852_v58  ;;  %v526_v27 = vsel %vm270_vm14, 1.0, %v9852_v58 }
 0x153   :  { %3414 = vmatmul.mubr.bf16.gmra.mrb[24].mxu0 %v2700_v45  ;;  %3575 = vmatmul.mubr.bf16.gmra.mrb[40].mxu1 %v2702_v34  ;;  %v7363_v41 = vadd.f32 %v2161_v13, %v1553_v60  ;;  %v7365_v30 = vadd.f32 %v2169_v38, %v1561_v26  ;;  %v7368_v21 = vadd.f32 %v2358_v35, %v10026_v59  ;;  %v432_v23 = vsel %vm176_vm12, 1.0, %v9852_v58  ;;  %v7382_v60 = vpop.permute.xlu1 %967 }
 0x154   :  { %vm184_vm0 = vcmp.eq.s32.totalorder %v10014_v2, %v9999_v18  ;;  %vm1040_vm3 = vcmp.eq.s32.totalorder %v10015_v57, %v9999_v18  ;;  %vm1048_vm1 = vcmp.eq.s32.totalorder %v6395_v28, %v9999_v18  ;;  %vm1904_vm6 = vcmp.eq.s32.totalorder %v10020_v1, %v9999_v18  ;;  %10027 = vst [vmem:[#allocation67_spill] sm:$0xff] %v7382_v60 }
 0x155   :  { %v440_v24 = vsel %vm184_vm0, 1.0, %v9852_v58  ;;  %v1296_v19 = vsel %vm1040_vm3, 1.0, %v9852_v58  ;;  %vm1133_vm15 = vcmp.eq.s32.totalorder %v7382_v60, %v5350_v50  ;;  %vm1135_vm7 = vcmp.eq.s32.totalorder %v7382_v60, %v5359_v53 }
 0x156   :  { %vm1132_vm8 = vcmp.eq.s32.totalorder %v7382_v60, %v5346_v49  ;;  %vm1134_vm4 = vcmp.eq.s32.totalorder %v7382_v60, %v5366_v54  ;;  %v1389_v13 = vsel %vm1133_vm15, 1.0, %v9852_v58  ;;  %v1391_v38 = vsel %vm1135_vm7, 1.0, %v9852_v58 }
 0x157   :  { %v1388_v35 = vsel %vm1132_vm8, 1.0, %v9852_v58  ;;  %v1390_v29 = vsel %vm1134_vm4, 1.0, %v9852_v58  ;;  %v1645_v36 = vadd.f32 %v1389_v13, %v525_v10  ;;  %v1647_v45 = vadd.f32 %v1391_v38, %v527_v62  ;;  %v7402_v8 = vpop.permute.xlu1 %970  ;;  %v10030_v10 = vld [vmem:[#allocation79_spill] sm:$0xff]  ;;  %v10032_v38 = vld [vmem:[#allocation78_spill] sm:$0xff] }
 0x158   :  { %v1644_v34 = vadd.f32 %v1388_v35, %v524_v39  ;;  %v1646_v59 = vadd.f32 %v1390_v29, %v526_v27  ;;  %10029 = vst [vmem:[#allocation58_spill] sm:$0xff] %v7402_v8  ;;  %v1304_v26 = vsel %vm1048_vm1, 1.0, %v9852_v58  ;;  %v1552_v16 = vadd.f32 %v1296_v19, %v432_v23  ;;  %v10031_v39 = vld [vmem:[#allocation82_spill] sm:$0xff]  ;;  %v10033_v29 = vld [vmem:[#allocation80_spill] sm:$0xff] }
 0x159   :  { %vm1912_vm2 = vcmp.eq.s32.totalorder %v10024_v40, %v9999_v18  ;;  %v2160_v48 = vsel %vm1904_vm6, 1.0, %v9852_v58  ;;  %vm1141_vm9 = vcmp.eq.s32.totalorder %v7402_v8, %v5350_v50  ;;  %v2509_v62 = vadd.f32 %v10030_v10, %v1645_v36 }
 0x15a   :  { %vm1143_vm10 = vcmp.eq.s32.totalorder %v7402_v8, %v5359_v53  ;;  %v2511_v27 = vadd.f32 %v10031_v39, %v1647_v45  ;;  %v1397_v23 = vsel %vm1141_vm9, 1.0, %v9852_v58  ;;  %vm1140_vm12 = vcmp.eq.s32.totalorder %v7402_v8, %v5346_v49 }
 0x15b   :  { %v1399_v19 = vsel %vm1143_vm10, 1.0, %v9852_v58  ;;  %v2508_v13 = vadd.f32 %v6587_v46, %v1644_v34  ;;  %v1653_v35 = vadd.f32 %v1397_v23, %v10032_v38  ;;  %v1396_v36 = vsel %vm1140_vm12, 1.0, %v9852_v58 }
 0x15c   :  { %v1655_v60 = vadd.f32 %v1399_v19, %v10033_v29  ;;  %vm1142_vm5 = vcmp.eq.s32.totalorder %v7402_v8, %v5366_v54  ;;  %v1652_v45 = vadd.f32 %v1396_v36, %v6578_v51  ;;  %v2510_v39 = vadd.f32 %v6599_v42, %v1646_v59  ;;  %v7433_v31 = vpop.permute.xlu1 %1834  ;;  %v10035_v19 = vld [vmem:[#allocation23_spill] sm:$0xff]  ;;  %v10036_v29 = vld [vmem:[#allocation18_spill] sm:$0xff] }
 0x15d   :  { %v1398_v10 = vsel %vm1142_vm5, 1.0, %v9852_v58  ;;  %v1560_v14 = vadd.f32 %v1304_v26, %v440_v24  ;;  %10034 = vst [vmem:[#allocation38_spill] sm:$0xff] %v7433_v31  ;;  %v2168_v34 = vsel %vm1912_vm2, 1.0, %v9852_v58  ;;  %v7440_v23 = vadd.f32 %v2160_v48, %v1552_v16 }
 0x15e   :  { %v1654_v46 = vadd.f32 %v1398_v10, %v6593_v47  ;;  %vm383_vm11 = vcmp.eq.s32.totalorder %v10035_v19, %v5359_v53  ;;  %vm2005_vm13 = vcmp.eq.s32.totalorder %v7433_v31, %v5350_v50  ;;  %vm2007_vm14 = vcmp.eq.s32.totalorder %v7433_v31, %v5359_v53  ;;  %v10037_v10 = vld [vmem:[#allocation27_spill] sm:$0xff] }
 0x15f   :  { %vm2004_vm0 = vcmp.eq.s32.totalorder %v7433_v31, %v5346_v49  ;;  %vm2006_vm3 = vcmp.eq.s32.totalorder %v7433_v31, %v5366_v54  ;;  %v2261_v51 = vsel %vm2005_vm13, 1.0, %v9852_v58  ;;  %v2263_v47 = vsel %vm2007_vm14, 1.0, %v9852_v58 }
 0x160   :  { %v2260_v42 = vsel %vm2004_vm0, 1.0, %v9852_v58  ;;  %v2262_v48 = vsel %vm2006_vm3, 1.0, %v9852_v58  ;;  %v2517_v16 = vadd.f32 %v2261_v51, %v1653_v35  ;;  %v2519_v26 = vadd.f32 %v2263_v47, %v1655_v60 }
 0x161   :  { %v2516_v24 = vadd.f32 %v2260_v42, %v1652_v45  ;;  %v2518_v59 = vadd.f32 %v2262_v48, %v1654_v46  ;;  %v7456_v38 = vadd.f32 %v2168_v34, %v1560_v14  ;;  %vm391_vm1 = vcmp.eq.s32.totalorder %v10036_v29, %v5359_v53  ;;  %v7463_v31 = vpop.permute.xlu1 %109  ;;  %v10043_v42 = vld [vmem:[#allocation76_spill] sm:$0xff] }
 0x162   :  { %v639_v36 = vsel %vm383_vm11, 1.0, %v9852_v58  ;;  %vm1247_vm6 = vcmp.eq.s32.totalorder %v10037_v10, %v5359_v53  ;;  %10038 = vst [vmem:[#allocation68_spill] sm:$0xff] %v7463_v31  ;;  %v2709_v8 = vpack.c.bf16 %v2517_v16, %v2509_v62  ;;  %v2711_v6 = vpack.c.bf16 %v2519_v26, %v2511_v27 }
 0x163   :  { %v2708_v40 = vpack.c.bf16 %v2516_v24, %v2508_v13  ;;  %v2710_v1 = vpack.c.bf16 %v2518_v59, %v2510_v39  ;;  %vm285_vm15 = vcmp.eq.s32.totalorder %v7463_v31, %v5350_v50  ;;  %vm287_vm7 = vcmp.eq.s32.totalorder %v7463_v31, %v5359_v53  ;;  %v10041_v39 = vld [vmem:[#allocation32_spill] sm:$0xff] }
 0x164   :  { %vm284_vm8 = vcmp.eq.s32.totalorder %v7463_v31, %v5346_v49  ;;  %vm286_vm4 = vcmp.eq.s32.totalorder %v7463_v31, %v5366_v54  ;;  %3421 = vmatprep.mubr.bf16.mxu0 %v2709_v8  ;;  %3582 = vmatprep.mubr.bf16.mxu1 %v2711_v6  ;;  %v541_v14 = vsel %vm285_vm15, 1.0, %v9852_v58  ;;  %v543_v60 = vsel %vm287_vm7, 1.0, %v9852_v58  ;;  %v10039_v6 = vld [vmem:[#allocation30_spill] sm:$0xff] }
 0x165   :  { %v540_v62 = vsel %vm284_vm8, 1.0, %v9852_v58  ;;  %v542_v27 = vsel %vm286_vm4, 1.0, %v9852_v58  ;;  %3422 = vmatmul.mubr.bf16.gmra.mrb[28].mxu0 %v2708_v40  ;;  %3583 = vmatmul.mubr.bf16.gmra.mrb[44].mxu1 %v2710_v1  ;;  %v647_v35 = vsel %vm391_vm1, 1.0, %v9852_v58  ;;  %vm1255_vm2 = vcmp.eq.s32.totalorder %v10039_v6, %v5359_v53  ;;  %v10040_v1 = vld [vmem:[#allocation10_spill] sm:$0xff] }
 0x166   :  { %v1503_v8 = vsel %vm1247_vm6, 1.0, %v9852_v58  ;;  %v1511_v45 = vsel %vm1255_vm2, 1.0, %v9852_v58  ;;  %vm2111_vm9 = vcmp.eq.s32.totalorder %v10040_v1, %v5359_v53  ;;  %vm2119_vm10 = vcmp.eq.s32.totalorder %v10041_v39, %v5359_v53  ;;  %v7494_v46 = vpop.permute.xlu1 %973 }
 0x167   :  { %v1759_v40 = vadd.f32 %v1503_v8, %v639_v36  ;;  %10042 = vst [vmem:[#allocation42_spill] sm:$0xff] %v7494_v46  ;;  %v1767_v34 = vadd.f32 %v1511_v45, %v647_v35  ;;  %v2367_v51 = vsel %vm2111_vm9, 1.0, %v9852_v58  ;;  %v2375_v47 = vsel %vm2119_vm10, 1.0, %v9852_v58 }
 0x168   :  { %vm193_vm12 = vcmp.eq.s32.totalorder %v10043_v42, %v5388_v61  ;;  %vm1149_vm5 = vcmp.eq.s32.totalorder %v7494_v46, %v5350_v50  ;;  %vm1151_vm11 = vcmp.eq.s32.totalorder %v7494_v46, %v5359_v53  ;;  %vm1148_vm13 = vcmp.eq.s32.totalorder %v7494_v46, %v5346_v49 }
 0x169   :  { %vm1150_vm14 = vcmp.eq.s32.totalorder %v7494_v46, %v5366_v54  ;;  %v1405_v48 = vsel %vm1149_vm5, 1.0, %v9852_v58  ;;  %v1407_v16 = vsel %vm1151_vm11, 1.0, %v9852_v58  ;;  %v1404_v26 = vsel %vm1148_vm13, 1.0, %v9852_v58  ;;  %v10045_v46 = vld [vmem:[#allocation29_spill] sm:$0xff] }
 0x16a   :  { %v1406_v24 = vsel %vm1150_vm14, 1.0, %v9852_v58  ;;  %v1661_v59 = vadd.f32 %v1405_v48, %v541_v14  ;;  %v1663_v36 = vadd.f32 %v1407_v16, %v543_v60  ;;  %v1660_v35 = vadd.f32 %v1404_v26, %v540_v62  ;;  %v7512_v45 = vpop.permute.xlu1 %976 }
 0x16b   :  { %v1662_v8 = vadd.f32 %v1406_v24, %v542_v27  ;;  %10044 = vst [vmem:[#allocation44_spill] sm:$0xff] %v7512_v45  ;;  %v7514_v13 = vadd.f32 %v2367_v51, %v1759_v40  ;;  %v7516_v31 = vadd.f32 %v2375_v47, %v1767_v34  ;;  %vm201_vm0 = vcmp.eq.s32.totalorder %v10045_v46, %v5388_v61  ;;  %v10048_v24 = vld [vmem:[#allocation81_spill] sm:$0xff] }
 0x16c   :  { %v449_v28 = vsel %vm193_vm12, 1.0, %v9852_v58  ;;  %vm1157_vm3 = vcmp.eq.s32.totalorder %v7512_v45, %v5350_v50  ;;  %v2525_v14 = vadd.f32 %v6641_v4, %v1661_v59  ;;  %vm1159_vm1 = vcmp.eq.s32.totalorder %v7512_v45, %v5359_v53 }
 0x16d   :  { %v2527_v60 = vadd.f32 %v6699_v12, %v1663_v36  ;;  %v1413_v62 = vsel %vm1157_vm3, 1.0, %v9852_v58  ;;  %v1415_v27 = vsel %vm1159_vm1, 1.0, %v9852_v58  ;;  %vm1156_vm6 = vcmp.eq.s32.totalorder %v7512_v45, %v5346_v49 }
 0x16e   :  { %v2524_v40 = vadd.f32 %v6719_v52, %v1660_v35  ;;  %v1669_v34 = vadd.f32 %v1413_v62, %v6635_v5  ;;  %v1671_v51 = vadd.f32 %v1415_v27, %v6693_v0  ;;  %v1412_v4 = vsel %vm1156_vm6, 1.0, %v9852_v58  ;;  %v10047_v52 = vld [vmem:[#allocation88_spill] sm:$0xff] }
 0x16f   :  { %vm1158_vm15 = vcmp.eq.s32.totalorder %v7512_v45, %v5366_v54  ;;  %v1668_v12 = vadd.f32 %v1412_v4, %v6713_v44  ;;  %v2526_v48 = vadd.f32 %v6730_v32, %v1662_v8  ;;  %v7545_v26 = vpop.permute.xlu1 %1840  ;;  %v457_v0 = vsel %vm201_vm0, 1.0, %v9852_v58  ;;  %v10049_v44 = vld [vmem:[#allocation84_spill] sm:$0xff]  ;;  %v4590_v59 = vpop.f32.mrb[0].mxu1 }
 0x170   :  { %v1414_v47 = vsel %vm1158_vm15, 1.0, %v9852_v58  ;;  %10046 = vst [vmem:[#allocation47_spill] sm:$0xff] %v7545_v26  ;;  %vm1057_vm7 = vcmp.eq.s32.totalorder %v10048_v24, %v5388_v61  ;;  %vm1065_vm8 = vcmp.eq.s32.totalorder %v10049_v44, %v5388_v61  ;;  %vm2021_vm4 = vcmp.eq.s32.totalorder %v7545_v26, %v5350_v50  ;;  %v4591_v32 = vpop.f32.mrb[1].mxu1 }
 0x171   :  { %v1670_v5 = vadd.f32 %v1414_v47, %v10047_v52  ;;  %vm2023_vm2 = vcmp.eq.s32.totalorder %v7545_v26, %v5359_v53  ;;  %vm2020_vm9 = vcmp.eq.s32.totalorder %v7545_v26, %v5346_v49  ;;  %vm2022_vm10 = vcmp.eq.s32.totalorder %v7545_v26, %v5366_v54  ;;  %v4593_v4 = vpop.f32.mrb[2].mxu1 }
 0x172   :  { %v2277_v36 = vsel %vm2021_vm4, 1.0, %v9852_v58  ;;  %v2279_v35 = vsel %vm2023_vm2, 1.0, %v9852_v58  ;;  %v2276_v8 = vsel %vm2020_vm9, 1.0, %v9852_v58  ;;  %v2278_v62 = vsel %vm2022_vm10, 1.0, %v9852_v58  ;;  %v4594_v45 = vpop.f32.mrb[3].mxu1 }
 0x173   :  { %v7568_v27 = vadd.f32 %v4591_v32, %v4590_v59  ;;  %v2533_v47 = vadd.f32 %v2277_v36, %v1669_v34  ;;  %v2535_v52 = vadd.f32 %v2279_v35, %v1671_v51  ;;  %v2532_v16 = vadd.f32 %v2276_v8, %v1668_v12 }
 0x174   :  { %v2534_v57 = vadd.f32 %v2278_v62, %v1670_v5  ;;  %v1313_v26 = vsel %vm1057_vm7, 1.0, %v9852_v58  ;;  %v1321_v2 = vsel %vm1065_vm8, 1.0, %v9852_v58  ;;  %vm1921_vm12 = vcmp.eq.s32.totalorder %v10051_v63, %v5388_v61  ;;  %v7582_v34 = vpop.permute.xlu1 %115 }
 0x175   :  { %10050 = vst [vmem:[#allocation70_spill] sm:$0xff] %v7568_v27  ;;  %v7580_v59 = vadd.f32 %v4594_v45, %v4593_v4  ;;  %v2717_v51 = vpack.c.bf16 %v2533_v47, %v2525_v14  ;;  %v2719_v12 = vpack.c.bf16 %v2535_v52, %v2527_v60  ;;  %v2716_v5 = vpack.c.bf16 %v2532_v16, %v2524_v40 }
 0x176   :  { %v2718_v32 = vpack.c.bf16 %v2534_v57, %v2526_v48  ;;  %vm301_vm5 = vcmp.eq.s32.totalorder %v7582_v34, %v5350_v50  ;;  %vm303_vm11 = vcmp.eq.s32.totalorder %v7582_v34, %v5359_v53  ;;  %vm300_vm13 = vcmp.eq.s32.totalorder %v7582_v34, %v5346_v49  ;;  %v10053_v48 = vld [vmem:[#allocation85_spill] sm:$0xff] }
 0x177   :  { %10052 = vst [vmem:[#allocation73_spill] sm:$0xff] %v7580_v59  ;;  %3429 = vmatprep.mubr.bf16.mxu0 %v2717_v51  ;;  %3590 = vmatprep.mubr.bf16.mxu1 %v2719_v12  ;;  %v557_v45 = vsel %vm301_vm5, 1.0, %v9852_v58  ;;  %v559_v36 = vsel %vm303_vm11, 1.0, %v9852_v58  ;;  %v556_v14 = vsel %vm300_vm13, 1.0, %v9852_v58  ;;  %vm302_vm14 = vcmp.eq.s32.totalorder %v7582_v34, %v5366_v54 }
 0x178   :  { %3430 = vmatmul.mubr.bf16.gmra.mrb[32].mxu0 %v2716_v5  ;;  %3591 = vmatmul.mubr.bf16.gmra.mrb[48].mxu1 %v2718_v32  ;;  %v558_v57 = vsel %vm302_vm14, 1.0, %v9852_v58  ;;  %v1569_v60 = vadd.f32 %v1313_v26, %v449_v28  ;;  %v1577_v40 = vadd.f32 %v1321_v2, %v457_v0  ;;  %vm1929_vm0 = vcmp.eq.s32.totalorder %v10053_v48, %v5388_v61  ;;  %v4596_v8 = vpop.f32.mrb[4].mxu1 }
 0x179   :  { %v2177_v16 = vsel %vm1921_vm12, 1.0, %v9852_v58  ;;  %v2185_v35 = vsel %vm1929_vm0, 1.0, %v9852_v58  ;;  %vm382_vm3 = vcmp.eq.s32.totalorder %v10035_v19, %v5366_v54  ;;  %vm390_vm1 = vcmp.eq.s32.totalorder %v10036_v29, %v5366_v54  ;;  %v7607_v62 = vpop.permute.xlu1 %979  ;;  %v4597_v4 = vpop.f32.mrb[5].mxu1 }
 0x17a   :  { %10054 = vst [vmem:[#allocation48_spill] sm:$0xff] %v7607_v62  ;;  %v7609_v28 = vadd.f32 %v2177_v16, %v1569_v60  ;;  %v7611_v2 = vadd.f32 %v2185_v35, %v1577_v40  ;;  %v638_v26 = vsel %vm382_vm3, 1.0, %v9852_v58  ;;  %v646_v0 = vsel %vm390_vm1, 1.0, %v9852_v58  ;;  %v4599_v52 = vpop.f32.mrb[6].mxu1 }
 0x17b   :  { %vm1165_vm6 = vcmp.eq.s32.totalorder %v7607_v62, %v5350_v50  ;;  %vm1167_vm15 = vcmp.eq.s32.totalorder %v7607_v62, %v5359_v53  ;;  %vm1164_vm7 = vcmp.eq.s32.totalorder %v7607_v62, %v5346_v49  ;;  %vm1166_vm8 = vcmp.eq.s32.totalorder %v7607_v62, %v5366_v54  ;;  %v4600_v32 = vpop.f32.mrb[7].mxu1 }
 0x17c   :  { %v7623_v47 = vadd.f32 %v4597_v4, %v4596_v8  ;;  %v1421_v51 = vsel %vm1165_vm6, 1.0, %v9852_v58  ;;  %v1423_v12 = vsel %vm1167_vm15, 1.0, %v9852_v58  ;;  %v1420_v5 = vsel %vm1164_vm7, 1.0, %v9852_v58  ;;  %v10058_v4 = vld [vmem:[#allocation92_spill] sm:$0xff] }
 0x17d   :  { %v1677_v60 = vadd.f32 %v1421_v51, %v557_v45  ;;  %v1679_v40 = vadd.f32 %v1423_v12, %v559_v36  ;;  %v1676_v16 = vadd.f32 %v1420_v5, %v556_v14  ;;  %v1422_v35 = vsel %vm1166_vm8, 1.0, %v9852_v58  ;;  %v10059_v36 = vld [vmem:[#allocation94_spill] sm:$0xff] }
 0x17e   :  { %10055 = vst [vmem:[#allocation50_spill] sm:$0xff] %v7623_v47  ;;  %v7629_v59 = vadd.f32 %v4600_v32, %v4599_v52  ;;  %v7631_v27 = vpop.permute.xlu1 %982  ;;  %v1678_v29 = vadd.f32 %v1422_v35, %v558_v57  ;;  %vm1246_vm4 = vcmp.eq.s32.totalorder %v10037_v10, %v5366_v54  ;;  %v10060_v12 = vld [vmem:[#allocation90_spill] sm:$0xff]  ;;  %v10061_v32 = vld [vmem:[#allocation93_spill] sm:$0xff]  ;;  %vm1254_vm5 = vcmp.eq.s32.totalorder %v10039_v6, %v5366_v54 }
 0x17f   :  { %10057 = vst [vmem:[#allocation82_spill] sm:$0xff] %v7631_v27  ;;  %vm1173_vm2 = vcmp.eq.s32.totalorder %v7631_v27, %v5350_v50  ;;  %v2541_v45 = vadd.f32 %v10058_v4, %v1677_v60  ;;  %vm1175_vm9 = vcmp.eq.s32.totalorder %v7631_v27, %v5359_v53  ;;  %v2543_v14 = vadd.f32 %v10059_v36, %v1679_v40 }
 0x180   :  { %10056 = vst [vmem:[#allocation79_spill] sm:$0xff] %v7629_v59  ;;  %v1429_v52 = vsel %vm1173_vm2, 1.0, %v9852_v58  ;;  %v1431_v57 = vsel %vm1175_vm9, 1.0, %v9852_v58  ;;  %vm1172_vm10 = vcmp.eq.s32.totalorder %v7631_v27, %v5346_v49  ;;  %v2540_v51 = vadd.f32 %v6829_v37, %v1676_v16 }
 0x181   :  { %v1685_v5 = vadd.f32 %v1429_v52, %v10060_v12  ;;  %v1687_v35 = vadd.f32 %v1431_v57, %v10061_v32  ;;  %v1428_v60 = vsel %vm1172_vm10, 1.0, %v9852_v58  ;;  %vm1174_vm12 = vcmp.eq.s32.totalorder %v7631_v27, %v5366_v54 }
 0x182   :  { %v1684_v40 = vadd.f32 %v1428_v60, %v6823_v55  ;;  %v1430_v4 = vsel %vm1174_vm12, 1.0, %v9852_v58  ;;  %v2542_v36 = vadd.f32 %v6889_v33, %v1678_v29  ;;  %v1502_v16 = vsel %vm1246_vm4, 1.0, %v9852_v58 }
 0x183   :  { %v7658_v8 = vpop.permute.xlu1 %1846  ;;  %v1686_v37 = vadd.f32 %v1430_v4, %v6883_v20  ;;  %v1510_v52 = vsel %vm1254_vm5, 1.0, %v9852_v58  ;;  %vm2110_vm11 = vcmp.eq.s32.totalorder %v10040_v1, %v5366_v54  ;;  %v1758_v4 = vadd.f32 %v1502_v16, %v638_v26 }
 0x184   :  { %10062 = vst [vmem:[#allocation78_spill] sm:$0xff] %v7658_v8  ;;  %vm2037_vm13 = vcmp.eq.s32.totalorder %v7658_v8, %v5350_v50  ;;  %vm2039_vm14 = vcmp.eq.s32.totalorder %v7658_v8, %v5359_v53  ;;  %vm2036_vm0 = vcmp.eq.s32.totalorder %v7658_v8, %v5346_v49  ;;  %vm2038_vm3 = vcmp.eq.s32.totalorder %v7658_v8, %v5366_v54 }
 0x185   :  { %v2293_v55 = vsel %vm2037_vm13, 1.0, %v9852_v58  ;;  %v2295_v20 = vsel %vm2039_vm14, 1.0, %v9852_v58  ;;  %v2292_v33 = vsel %vm2036_vm0, 1.0, %v9852_v58  ;;  %v2294_v29 = vsel %vm2038_vm3, 1.0, %v9852_v58 }
 0x186   :  { %v2549_v57 = vadd.f32 %v2293_v55, %v1685_v5  ;;  %v2551_v12 = vadd.f32 %v2295_v20, %v1687_v35  ;;  %v2548_v32 = vadd.f32 %v2292_v33, %v1684_v40  ;;  %v2550_v60 = vadd.f32 %v2294_v29, %v1686_v37 }
 0x187   :  { %v1766_v59 = vadd.f32 %v1510_v52, %v646_v0  ;;  %vm2118_vm1 = vcmp.eq.s32.totalorder %v10041_v39, %v5366_v54  ;;  %v2366_v47 = vsel %vm2110_vm11, 1.0, %v9852_v58  ;;  %vm192_vm4 = vcmp.eq.s32.totalorder %v10043_v42, %v9999_v18 }
 0x188   :  { %v7686_v6 = vpop.permute.xlu1 %121  ;;  %v2725_v10 = vpack.c.bf16 %v2549_v57, %v2541_v45  ;;  %v2727_v19 = vpack.c.bf16 %v2551_v12, %v2543_v14  ;;  %v2724_v8 = vpack.c.bf16 %v2548_v32, %v2540_v51  ;;  %v2726_v27 = vpack.c.bf16 %v2550_v60, %v2542_v36 }
 0x189   :  { %10063 = vst [vmem:[#allocation80_spill] sm:$0xff] %v7686_v6  ;;  %vm317_vm6 = vcmp.eq.s32.totalorder %v7686_v6, %v5350_v50  ;;  %vm319_vm15 = vcmp.eq.s32.totalorder %v7686_v6, %v5359_v53  ;;  %vm316_vm7 = vcmp.eq.s32.totalorder %v7686_v6, %v5346_v49  ;;  %vm318_vm8 = vcmp.eq.s32.totalorder %v7686_v6, %v5366_v54 }
 0x18a   :  { %3437 = vmatprep.mubr.bf16.mxu0 %v2725_v10  ;;  %3598 = vmatprep.mubr.bf16.mxu1 %v2727_v19  ;;  %v573_v26 = vsel %vm317_vm6, 1.0, %v9852_v58  ;;  %v575_v0 = vsel %vm319_vm15, 1.0, %v9852_v58  ;;  %v572_v45 = vsel %vm316_vm7, 1.0, %v9852_v58  ;;  %v574_v14 = vsel %vm318_vm8, 1.0, %v9852_v58 }
 0x18b   :  { %3438 = vmatmul.mubr.bf16.gmra.mrb[36].mxu0 %v2724_v8  ;;  %3599 = vmatmul.mubr.bf16.gmra.mrb[52].mxu1 %v2726_v27  ;;  %v2374_v51 = vsel %vm2118_vm1, 1.0, %v9852_v58  ;;  %v7704_v5 = vadd.f32 %v2366_v47, %v1758_v4  ;;  %vm200_vm2 = vcmp.eq.s32.totalorder %v10045_v46, %v9999_v18  ;;  %v448_v10 = vsel %vm192_vm4, 1.0, %v9852_v58  ;;  %v10072_v4 = vld [vmem:[#allocation104_spill] sm:$0xff] }
 0x18c   :  { %v7710_v19 = vadd.f32 %v2374_v51, %v1766_v59  ;;  %v456_v8 = vsel %vm200_vm2, 1.0, %v9852_v58  ;;  %vm1056_vm9 = vcmp.eq.s32.totalorder %v10048_v24, %v9999_v18  ;;  %v4602_v27 = vpop.f32.mrb[8].mxu1  ;;  %vm1064_vm10 = vcmp.eq.s32.totalorder %v10049_v44, %v9999_v18 }
 0x18d   :  { %v7716_v35 = vpop.permute.xlu1 %985  ;;  %v1312_v47 = vsel %vm1056_vm9, 1.0, %v9852_v58  ;;  %vm1920_vm12 = vcmp.eq.s32.totalorder %v10051_v63, %v9999_v18  ;;  %vm1928_vm5 = vcmp.eq.s32.totalorder %v10053_v48, %v9999_v18  ;;  %v4603_v59 = vpop.f32.mrb[9].mxu1  ;;  %v1320_v51 = vsel %vm1064_vm10, 1.0, %v9852_v58 }
 0x18e   :  { %10064 = vst [vmem:[#allocation76_spill] sm:$0xff] %v7716_v35  ;;  %vm1181_vm11 = vcmp.eq.s32.totalorder %v7716_v35, %v5350_v50  ;;  %vm1183_vm13 = vcmp.eq.s32.totalorder %v7716_v35, %v5359_v53  ;;  %vm1180_vm14 = vcmp.eq.s32.totalorder %v7716_v35, %v5346_v49  ;;  %vm1182_vm0 = vcmp.eq.s32.totalorder %v7716_v35, %v5366_v54  ;;  %v4605_v36 = vpop.f32.mrb[10].mxu1 }
 0x18f   :  { %v7733_v40 = vadd.f32 %v4603_v59, %v4602_v27  ;;  %v1437_v37 = vsel %vm1181_vm11, 1.0, %v9852_v58  ;;  %v1439_v16 = vsel %vm1183_vm13, 1.0, %v9852_v58  ;;  %v1436_v52 = vsel %vm1180_vm14, 1.0, %v9852_v58  ;;  %v4606_v55 = vpop.f32.mrb[11].mxu1 }
 0x190   :  { %v1693_v20 = vadd.f32 %v1437_v37, %v573_v26  ;;  %v1695_v33 = vadd.f32 %v1439_v16, %v575_v0  ;;  %v1692_v29 = vadd.f32 %v1436_v52, %v572_v45  ;;  %v1438_v57 = vsel %vm1182_vm0, 1.0, %v9852_v58  ;;  %v10069_v16 = vld [vmem:[#allocation101_spill] sm:$0xff] }
 0x191   :  { %10065 = vst [vmem:[#allocation29_spill] sm:$0xff] %v7733_v40  ;;  %v7739_v12 = vadd.f32 %v4606_v55, %v4605_v36  ;;  %v7741_v32 = vpop.permute.xlu1 %988  ;;  %v1694_v60 = vadd.f32 %v1438_v57, %v574_v14  ;;  %v10068_v36 = vld [vmem:[#allocation99_spill] sm:$0xff]  ;;  %v10070_v55 = vld [vmem:[#allocation105_spill] sm:$0xff] }
 0x192   :  { %10067 = vst [vmem:[#allocation81_spill] sm:$0xff] %v7741_v32  ;;  %vm1189_vm3 = vcmp.eq.s32.totalorder %v7741_v32, %v5350_v50  ;;  %v2557_v26 = vadd.f32 %v6907_v25, %v1693_v20  ;;  %vm1191_vm1 = vcmp.eq.s32.totalorder %v7741_v32, %v5359_v53  ;;  %v2559_v0 = vadd.f32 %v6918_v9, %v1695_v33 }
 0x193   :  { %10066 = vst [vmem:[#allocation88_spill] sm:$0xff] %v7739_v12  ;;  %v1445_v45 = vsel %vm1189_vm3, 1.0, %v9852_v58  ;;  %v1447_v14 = vsel %vm1191_vm1, 1.0, %v9852_v58  ;;  %vm1188_vm6 = vcmp.eq.s32.totalorder %v7741_v32, %v5346_v49  ;;  %v2556_v27 = vadd.f32 %v6958_v15, %v1692_v29 }
 0x194   :  { %v1701_v59 = vadd.f32 %v1445_v45, %v6901_v43  ;;  %v1703_v37 = vadd.f32 %v1447_v14, %v10068_v36  ;;  %v1444_v25 = vsel %vm1188_vm6, 1.0, %v9852_v58  ;;  %vm1190_vm15 = vcmp.eq.s32.totalorder %v7741_v32, %v5366_v54 }
 0x195   :  { %v1700_v9 = vadd.f32 %v1444_v25, %v10069_v16  ;;  %v1446_v52 = vsel %vm1190_vm15, 1.0, %v9852_v58  ;;  %v2558_v20 = vadd.f32 %v10070_v55, %v1694_v60  ;;  %v1568_v33 = vadd.f32 %v1312_v47, %v448_v10  ;;  %v10074_v55 = vld [vmem:[#allocation22_spill] sm:$0xff] }
 0x196   :  { %v7768_v57 = vpop.permute.xlu1 %1852  ;;  %v1702_v15 = vadd.f32 %v1446_v52, %v10072_v4  ;;  %v1576_v29 = vadd.f32 %v1320_v51, %v456_v8  ;;  %v2176_v43 = vsel %vm1920_vm12, 1.0, %v9852_v58  ;;  %v2184_v45 = vsel %vm1928_vm5, 1.0, %v9852_v58  ;;  %v10073_v52 = vld [vmem:[#allocation34_spill] sm:$0xff] }
 0x197   :  { %10071 = vst [vmem:[#allocation84_spill] sm:$0xff] %v7768_v57  ;;  %vm2053_vm7 = vcmp.eq.s32.totalorder %v7768_v57, %v5350_v50  ;;  %vm2055_vm8 = vcmp.eq.s32.totalorder %v7768_v57, %v5359_v53  ;;  %vm2052_vm4 = vcmp.eq.s32.totalorder %v7768_v57, %v5346_v49  ;;  %vm2054_vm2 = vcmp.eq.s32.totalorder %v7768_v57, %v5366_v54 }
 0x198   :  { %v2309_v10 = vsel %vm2053_vm7, 1.0, %v9852_v58  ;;  %v2311_v8 = vsel %vm2055_vm8, 1.0, %v9852_v58  ;;  %v2308_v47 = vsel %vm2052_vm4, 1.0, %v9852_v58  ;;  %v2310_v60 = vsel %vm2054_vm2, 1.0, %v9852_v58 }
 0x199   :  { %v2565_v4 = vadd.f32 %v2309_v10, %v1701_v59  ;;  %v2567_v51 = vadd.f32 %v2311_v8, %v1703_v37  ;;  %v2564_v14 = vadd.f32 %v2308_v47, %v1700_v9  ;;  %v2566_v36 = vadd.f32 %v2310_v60, %v1702_v15  ;;  %v10080_v15 = vld [vmem:[#allocation45_spill] sm:$0xff] }
 0x19a   :  { %v7791_v25 = vadd.f32 %v2176_v43, %v1568_v33  ;;  %v7793_v16 = vadd.f32 %v2184_v45, %v1576_v29  ;;  %vm399_vm9 = vcmp.eq.s32.totalorder %v10073_v52, %v5359_v53  ;;  %vm407_vm10 = vcmp.eq.s32.totalorder %v10074_v55, %v5359_v53  ;;  %v10078_v33 = vld [vmem:[#allocation41_spill] sm:$0xff] }
 0x19b   :  { %v7799_v12 = vpop.permute.xlu1 %127  ;;  %v2733_v40 = vpack.c.bf16 %v2565_v4, %v2557_v26  ;;  %v2735_v39 = vpack.c.bf16 %v2567_v51, %v2559_v0  ;;  %v2732_v1 = vpack.c.bf16 %v2564_v14, %v2556_v27  ;;  %v2734_v58 = vpack.c.bf16 %v2566_v36, %v2558_v20 }
 0x19c   :  { %10075 = vst [vmem:[#allocation43_spill] sm:$0xff] %v7799_v12  ;;  %vm333_vm12 = vcmp.eq.s32.totalorder %v7799_v12, %v5350_v50  ;;  %vm335_vm5 = vcmp.eq.s32.totalorder %v7799_v12, %v5359_v53  ;;  %vm332_vm11 = vcmp.eq.s32.totalorder %v7799_v12, %v5346_v49  ;;  %vm334_vm13 = vcmp.eq.s32.totalorder %v7799_v12, %v5366_v54 }
 0x19d   :  { %3445 = vmatprep.mubr.bf16.mxu0 %v2733_v40  ;;  %3606 = vmatprep.mubr.bf16.mxu1 %v2735_v39  ;;  %v10076_v59 = vmov 0.0   ;;  %v10077_v40 = vld [vmem:[#allocation39_spill] sm:$0xff]  ;;  %vm1271_vm0 = vcmp.eq.s32.totalorder %v10078_v33, %v5359_v53  ;;  %vm2135_vm1 = vcmp.eq.s32.totalorder %v10080_v15, %v5359_v53 }
 0x19e   :  { %v589_v37 = vsel %vm333_vm12, 1.0, %v10076_v59  ;;  %v591_v26 = vsel %vm335_vm5, 1.0, %v10076_v59  ;;  %v588_v0 = vsel %vm332_vm11, 1.0, %v10076_v59  ;;  %v590_v27 = vsel %vm334_vm13, 1.0, %v10076_v59  ;;  %3446 = vmatmul.mubr.bf16.gmra.mrb[40].mxu0 %v2732_v1  ;;  %3607 = vmatmul.mubr.bf16.gmra.mrb[56].mxu1 %v2734_v58  ;;  %v10079_v1 = vld [vmem:[#allocation33_spill] sm:$0xff] }
 0x19f   :  { %v655_v20 = vsel %vm399_vm9, 1.0, %v10076_v59  ;;  %v663_v39 = vsel %vm407_vm10, 1.0, %v10076_v59  ;;  %vm1263_vm14 = vcmp.eq.s32.totalorder %v10077_v40, %v5359_v53  ;;  %vm2127_vm3 = vcmp.eq.s32.totalorder %v10079_v1, %v5359_v53  ;;  %v4608_v29 = vpop.f32.mrb[12].mxu1 }
 0x1a0   :  { %v1519_v58 = vsel %vm1263_vm14, 1.0, %v10076_v59  ;;  %v7832_v43 = vpop.permute.xlu1 %991  ;;  %v1527_v45 = vsel %vm1271_vm0, 1.0, %v10076_v59  ;;  %v2383_v8 = vsel %vm2127_vm3, 1.0, %v10076_v59  ;;  %v2391_v47 = vsel %vm2135_vm1, 1.0, %v10076_v59  ;;  %v4609_v60 = vpop.f32.mrb[13].mxu1 }
 0x1a1   :  { %10081 = vst [vmem:[#allocation85_spill] sm:$0xff] %v7832_v43  ;;  %v1775_v10 = vadd.f32 %v1519_v58, %v655_v20  ;;  %vm1197_vm6 = vcmp.eq.s32.totalorder %v7832_v43, %v5350_v50  ;;  %vm1199_vm15 = vcmp.eq.s32.totalorder %v7832_v43, %v5359_v53  ;;  %vm1196_vm7 = vcmp.eq.s32.totalorder %v7832_v43, %v5346_v49  ;;  %v4611_v51 = vpop.f32.mrb[14].mxu1 }
 0x1a2   :  { %vm1198_vm8 = vcmp.eq.s32.totalorder %v7832_v43, %v5366_v54  ;;  %v7845_v4 = vadd.f32 %v4609_v60, %v4608_v29  ;;  %v1453_v14 = vsel %vm1197_vm6, 1.0, %v10076_v59  ;;  %v1455_v36 = vsel %vm1199_vm15, 1.0, %v10076_v59  ;;  %v4612_v58 = vpop.f32.mrb[15].mxu1 }
 0x1a3   :  { %v1452_v20 = vsel %vm1196_vm7, 1.0, %v10076_v59  ;;  %v1709_v9 = vadd.f32 %v1453_v14, %v589_v37  ;;  %v1711_v12 = vadd.f32 %v1455_v36, %v591_v26  ;;  %v1454_v32 = vsel %vm1198_vm8, 1.0, %v10076_v59  ;;  %v10086_v37 = vld [vmem:[#allocation113_spill] sm:$0xff] }
 0x1a4   :  { %10082 = vst [vmem:[#allocation92_spill] sm:$0xff] %v7845_v4  ;;  %v1708_v57 = vadd.f32 %v1452_v20, %v588_v0  ;;  %v7851_v35 = vadd.f32 %v4612_v58, %v4611_v51  ;;  %v1710_v43 = vadd.f32 %v1454_v32, %v590_v27  ;;  %v1783_v29 = vadd.f32 %v1527_v45, %v663_v39  ;;  %v10085_v4 = vld [vmem:[#allocation112_spill] sm:$0xff]  ;;  %v10087_v32 = vld [vmem:[#allocation114_spill] sm:$0xff]  ;;  %v10088_v39 = vld [vmem:[#allocation107_spill] sm:$0xff] }
 0x1a5   :  { %v7853_v6 = vpop.permute.xlu1 %994  ;;  %v7855_v60 = vadd.f32 %v2383_v8, %v1775_v10  ;;  %v2573_v62 = vadd.f32 %v10085_v4, %v1709_v9  ;;  %v2575_v26 = vadd.f32 %v10086_v37, %v1711_v12  ;;  %v10089_v10 = vld [vmem:[#allocation109_spill] sm:$0xff]  ;;  %v10090_v4 = vld [vmem:[#allocation110_spill] sm:$0xff]  ;;  %vm398_vm7 = vcmp.eq.s32.totalorder %v10073_v52, %v5366_v54 }
 0x1a6   :  { %10083 = vst [vmem:[#allocation94_spill] sm:$0xff] %v7851_v35  ;;  %10084 = vst [vmem:[#allocation90_spill] sm:$0xff] %v7853_v6  ;;  %vm1205_vm4 = vcmp.eq.s32.totalorder %v7853_v6, %v5350_v50  ;;  %vm1207_vm2 = vcmp.eq.s32.totalorder %v7853_v6, %v5359_v53  ;;  %vm1204_vm9 = vcmp.eq.s32.totalorder %v7853_v6, %v5346_v49  ;;  %v10091_v36 = vld [vmem:[#allocation117_spill] sm:$0xff]  ;;  %v10097_v35 = vld [vmem:[#allocation91_spill] sm:$0xff] }
 0x1a7   :  { %v1461_v0 = vsel %vm1205_vm4, 1.0, %v10076_v59  ;;  %v1463_v51 = vsel %vm1207_vm2, 1.0, %v10076_v59  ;;  %v2572_v27 = vadd.f32 %v10087_v32, %v1708_v57  ;;  %v1460_v9 = vsel %vm1204_vm9, 1.0, %v10076_v59  ;;  %v10093_v57 = vld [vmem:[#allocation115_spill] sm:$0xff] }
 0x1a8   :  { %v1717_v45 = vadd.f32 %v1461_v0, %v10088_v39  ;;  %v1719_v8 = vadd.f32 %v1463_v51, %v10089_v10  ;;  %vm1206_vm10 = vcmp.eq.s32.totalorder %v7853_v6, %v5366_v54  ;;  %v1716_v12 = vadd.f32 %v1460_v9, %v10090_v4  ;;  %v10094_v0 = vld [vmem:[#allocation86_spill] sm:$0xff]  ;;  %v10095_v51 = vld [vmem:[#allocation31_spill] sm:$0xff]  ;;  %v10096_v39 = vld [vmem:[#allocation89_spill] sm:$0xff] }
 0x1a9   :  { %v1462_v14 = vsel %vm1206_vm10, 1.0, %v10076_v59  ;;  %v2574_v20 = vadd.f32 %v10091_v36, %v1710_v43  ;;  %v7876_v58 = vadd.f32 %v2391_v47, %v1783_v29  ;;  %vm209_vm12 = vcmp.eq.s32.totalorder %v10094_v0, %v5388_v61 }
 0x1aa   :  { %v7878_v37 = vpop.permute.xlu1 %1858  ;;  %v1718_v32 = vadd.f32 %v1462_v14, %v10093_v57  ;;  %vm217_vm5 = vcmp.eq.s32.totalorder %v10095_v51, %v5388_v61  ;;  %vm1073_vm11 = vcmp.eq.s32.totalorder %v10096_v39, %v5388_v61  ;;  %v465_v36 = vsel %vm209_vm12, 1.0, %v10076_v59 }
 0x1ab   :  { %10092 = vst [vmem:[#allocation93_spill] sm:$0xff] %v7878_v37  ;;  %vm2069_vm13 = vcmp.eq.s32.totalorder %v7878_v37, %v5350_v50  ;;  %vm2071_vm14 = vcmp.eq.s32.totalorder %v7878_v37, %v5359_v53  ;;  %vm2068_vm0 = vcmp.eq.s32.totalorder %v7878_v37, %v5346_v49  ;;  %vm2070_vm3 = vcmp.eq.s32.totalorder %v7878_v37, %v5366_v54 }
 0x1ac   :  { %v2325_v43 = vsel %vm2069_vm13, 1.0, %v10076_v59  ;;  %v2327_v47 = vsel %vm2071_vm14, 1.0, %v10076_v59  ;;  %v2324_v29 = vsel %vm2068_vm0, 1.0, %v10076_v59  ;;  %v2326_v10 = vsel %vm2070_vm3, 1.0, %v10076_v59 }
 0x1ad   :  { %v2581_v9 = vadd.f32 %v2325_v43, %v1717_v45  ;;  %v2583_v4 = vadd.f32 %v2327_v47, %v1719_v8  ;;  %v2580_v50 = vadd.f32 %v2324_v29, %v1716_v12  ;;  %v2582_v14 = vadd.f32 %v2326_v10, %v1718_v32  ;;  %v10098_v29 = vld [vmem:[#allocation46_spill] sm:$0xff]  ;;  %v10099_v10 = vld [vmem:[#allocation96_spill] sm:$0xff] }
 0x1ae   :  { %v473_v57 = vsel %vm217_vm5, 1.0, %v10076_v59  ;;  %vm1081_vm1 = vcmp.eq.s32.totalorder %v10097_v35, %v5388_v61  ;;  %v1329_v43 = vsel %vm1073_vm11, 1.0, %v10076_v59  ;;  %vm1937_vm6 = vcmp.eq.s32.totalorder %v10098_v29, %v5388_v61 }
 0x1af   :  { %v2741_v45 = vpack.c.bf16 %v2581_v9, %v2573_v62  ;;  %v2743_v8 = vpack.c.bf16 %v2583_v4, %v2575_v26  ;;  %v2740_v12 = vpack.c.bf16 %v2580_v50, %v2572_v27  ;;  %v2742_v32 = vpack.c.bf16 %v2582_v14, %v2574_v20  ;;  %v10100_v20 = vld [vmem:[#allocation21_spill] sm:$0xff]  ;;  %v10101_v9 = vld [vmem:[#allocation19_spill] sm:$0xff] }
 0x1b0   :  { %v1337_v47 = vsel %vm1081_vm1, 1.0, %v10076_v59  ;;  %vm1945_vm15 = vcmp.eq.s32.totalorder %v10099_v10, %v5388_v61  ;;  %v1585_v53 = vadd.f32 %v1329_v43, %v465_v36  ;;  %v2193_v26 = vsel %vm1937_vm6, 1.0, %v10076_v59 }
 0x1b1   :  { %3453 = vmatprep.mubr.bf16.mxu0 %v2741_v45  ;;  %3614 = vmatprep.mubr.bf16.mxu1 %v2743_v8  ;;  %v1593_v62 = vadd.f32 %v1337_v47, %v473_v57  ;;  %v2201_v27 = vsel %vm1945_vm15, 1.0, %v10076_v59  ;;  %vm406_vm8 = vcmp.eq.s32.totalorder %v10074_v55, %v5366_v54  ;;  %vm1262_vm4 = vcmp.eq.s32.totalorder %v10077_v40, %v5366_v54 }
 0x1b2   :  { %3454 = vmatmul.mubr.bf16.gmra.mrb[44].mxu0 %v2740_v12  ;;  %3615 = vmatmul.mubr.bf16.gmra.mrb[60].mxu1 %v2742_v32  ;;  %v10102_v4 = vpack.c.bf16 %v10100_v20, %v10101_v9  ;;  %v10103_v50 = vpack.c.bf16 %v7210_v17, %v7181_v3  ;;  %v7934_v14 = vadd.f32 %v2193_v26, %v1585_v53  ;;  %v654_v57 = vsel %vm398_vm7, 1.0, %v10076_v59  ;;  %v4518_v8 = vpop.f32.mrb[0].mxu0  ;;  %v4630_v12 = vpop.f32.mrb[16].mxu1  ;;  %v10106_v53 = vld [vmem:[#allocation28_spill] sm:$0xff] }
 0x1b3   :  { %v7936_v36 = vadd.f32 %v2201_v27, %v1593_v62  ;;  %v662_v45 = vsel %vm406_vm8, 1.0, %v10076_v59  ;;  %vm1270_vm2 = vcmp.eq.s32.totalorder %v10078_v33, %v5366_v54  ;;  %v1518_v32 = vsel %vm1262_vm4, 1.0, %v10076_v59  ;;  %v4519_v3 = vpop.f32.mrb[1].mxu0  ;;  %v4631_v17 = vpop.f32.mrb[17].mxu1 }
 0x1b4   :  { %3622 = vmatprep.mubr.bf16.mxu1 %v10102_v4  ;;  %3687 = vmatprep.mubr.bf16.mxu0 %v10103_v50  ;;  %vm2126_vm9 = vcmp.eq.s32.totalorder %v10079_v1, %v5366_v54  ;;  %vm2134_vm10 = vcmp.eq.s32.totalorder %v10080_v15, %v5366_v54  ;;  %v1526_v43 = vsel %vm1270_vm2, 1.0, %v10076_v59  ;;  %v1774_v47 = vadd.f32 %v1518_v32, %v654_v57  ;;  %v4521_v27 = vpop.f32.mrb[2].mxu0  ;;  %v4633_v20 = vpop.f32.mrb[18].mxu1  ;;  %v5077_v57 = vld [vmem:[%s9649_s1 + $0x1f0] ss:$0 sps:$4 sm:$0xff]   ;;  %v10107_v1 = vld [vmem:[#allocation25_spill] sm:$0xff] }
 0x1b5   :  { %vm3329_vm12 = vcmask 1043456   ;;  %v4520_v62 = vadd.f32 %v4519_v3, %v4518_v8  ;;  %v4632_v26 = vadd.f32 %v4631_v17, %v4630_v12  ;;  %v1782_v9 = vadd.f32 %v1526_v43, %v662_v45  ;;  %v4522_v50 = vpop.f32.mrb[3].mxu0  ;;  %v4634_v33 = vpop.f32.mrb[19].mxu1 }
 0x1b6   :  { %v2390_v4 = vsel %vm2134_vm10, 1.0, %v10076_v59  ;;  %v2382_v15 = vsel %vm2126_vm9, 1.0, %v10076_v59  ;;  %vm208_vm5 = vcmp.eq.s32.totalorder %v10094_v0, %v9999_v18  ;;  %vm216_vm11 = vcmp.eq.s32.totalorder %v10095_v51, %v9999_v18 }
 0x1b7   :  { %vm1072_vm13 = vcmp.eq.s32.totalorder %v10096_v39, %v9999_v18  ;;  %v7964_v45 = vadd.f32 %v4632_v26, %v4520_v62  ;;  %v4523_v8 = vadd.f32 %v4522_v50, %v4521_v27  ;;  %v4635_v12 = vadd.f32 %v4634_v33, %v4633_v20  ;;  %v10110_v20 = vld [vmem:[#allocation35_spill] sm:$0xff] }
 0x1b8   :  { %v7966_v32 = vadd.f32 %v2390_v4, %v1782_v9  ;;  %v464_v54 = vsel %vm208_vm5, 1.0, %v10076_v59  ;;  %v472_v3 = vsel %vm216_vm11, 1.0, %v10076_v59  ;;  %vm1080_vm14 = vcmp.eq.s32.totalorder %v10097_v35, %v9999_v18  ;;  %v10111_v9 = vld [vmem:[#allocation36_spill] sm:$0xff] }
 0x1b9   :  { %10104 = vst [vmem:[#allocation99_spill] sm:$0xff] %v7964_v45  ;;  %v1328_v17 = vsel %vm1072_vm13, 1.0, %v10076_v59  ;;  %v7973_v43 = vadd.f32 %v4635_v12, %v4523_v8  ;;  %v10108_v40 = vpack.c.bf16 %v10106_v53, %v10107_v1  ;;  %v10109_v33 = vpack.c.bf16 %v7281_v56, %v7258_v22  ;;  %v10114_v1 = vld [vmem:[#allocation98_spill] sm:$0xff] }
 0x1ba   :  { %v7981_v62 = vadd.f32 %v2382_v15, %v1774_v47  ;;  %v1336_v26 = vsel %vm1080_vm14, 1.0, %v10076_v59  ;;  %v1584_v27 = vadd.f32 %v1328_v17, %v464_v54  ;;  %v10112_v4 = vpack.c.bf16 %v10110_v20, %v10111_v9  ;;  %v10117_v12 = vld [vmem:[#allocation102_spill] sm:$0xff]  ;;  %v10118_v54 = vld [vmem:[#allocation49_spill] sm:$0xff] }
 0x1bb   :  { %10105 = vst [vmem:[#allocation101_spill] sm:$0xff] %v7973_v43  ;;  %3623 = vmatmul.mubr.bf16.gmra.mrb[64].mxu1 %v10108_v40  ;;  %3688 = vmatmul.mubr.bf16.vlgmr.msra.gmra.mrb[48].mxu0 %v10109_v33  ;;  %v10113_v50 = vpack.c.bf16 %v7365_v30, %v7363_v41  ;;  %v1592_v8 = vadd.f32 %v1336_v26, %v472_v3  ;;  %v3331_v56 = vsel %vm3329_vm12, %v5077_v57, 0  ;;  %v10115_v41 = vld [vmem:[#allocation59_spill] sm:$0xff]  ;;  %v10116_v57 = vld [vmem:[#allocation100_spill] sm:$0xff]  ;;  %v10119_v3 = vld [vmem:[#allocation106_spill] sm:$0xff] }
 0x1bc   :  { %3630 = vmatprep.mubr.bf16.mxu1 %v10112_v4  ;;  %vm1936_vm0 = vcmp.eq.s32.totalorder %v10098_v29, %v9999_v18  ;;  %vm1944_vm3 = vcmp.eq.s32.totalorder %v10099_v10, %v9999_v18  ;;  %3845 = vmatpush1.bf16.msra.mxu1 %v3331_v56  ;;  %vm225_vm1 = vcmp.eq.s32.totalorder %v10114_v1, %v5388_v61 }
 0x1bd   :  { %3695 = vmatprep.mubr.bf16.mxu0 %v10113_v50  ;;  %v2192_v22 = vsel %vm1936_vm0, 1.0, %v10076_v59  ;;  %v2200_v40 = vsel %vm1944_vm3, 1.0, %v10076_v59  ;;  %vm233_vm6 = vcmp.eq.s32.totalorder %v10115_v41, %v5388_v61  ;;  %vm1089_vm15 = vcmp.eq.s32.totalorder %v10116_v57, %v5388_v61 }
 0x1be   :  { %v8003_v15 = vadd.f32 %v2192_v22, %v1584_v27  ;;  %v8005_v53 = vadd.f32 %v2200_v40, %v1592_v8  ;;  %v489_v47 = vsel %vm233_vm6, 1.0, %v10076_v59  ;;  %vm1097_vm7 = vcmp.eq.s32.totalorder %v10117_v12, %v5388_v61 }
 0x1bf   :  { %vm1953_vm8 = vcmp.eq.s32.totalorder %v10118_v54, %v5388_v61  ;;  %vm1961_vm4 = vcmp.eq.s32.totalorder %v10119_v3, %v5388_v61  ;;  %v481_v17 = vsel %vm225_vm1, 1.0, %v10076_v59  ;;  %v1345_v33 = vsel %vm1089_vm15, 1.0, %v10076_v59 }
 0x1c0   :  { %v1353_v26 = vsel %vm1097_vm7, 1.0, %v10076_v59  ;;  %v2209_v27 = vsel %vm1953_vm8, 1.0, %v10076_v59  ;;  %v1601_v20 = vadd.f32 %v1345_v33, %v481_v17  ;;  %v2217_v4 = vsel %vm1961_vm4, 1.0, %v10076_v59 }
 0x1c1   :  { %v1609_v9 = vadd.f32 %v1353_v26, %v489_v47  ;;  %v8022_v50 = vadd.s32 896, %v5346_v49  ;;  %vm224_vm2 = vcmp.eq.s32.totalorder %v10114_v1, %v9999_v18  ;;  %vm232_vm9 = vcmp.eq.s32.totalorder %v10115_v41, %v9999_v18  ;;  %v10126_v26 = vld [vmem:[#allocation54_spill] sm:$0xff] }
 0x1c2   :  { %vm1088_vm10 = vcmp.eq.s32.totalorder %v10116_v57, %v9999_v18  ;;  %v10120_v56 = vpack.c.bf16 %v7368_v21, %v10028_v11  ;;  %v10121_v22 = vpack.c.bf16 %v7456_v38, %v7440_v23  ;;  %v8038_v40 = vadd.f32 %v2209_v27, %v1601_v20  ;;  %v10124_v11 = vld [vmem:[#allocation24_spill] sm:$0xff] }
 0x1c3   :  { %v8040_v47 = vadd.f32 %v2217_v4, %v1609_v9  ;;  %vm163_vm12 = vcmp.eq.s32.totalorder %v6130_v7, %v8022_v50  ;;  %v480_v17 = vsel %vm224_vm2, 1.0, %v10076_v59  ;;  %v10122_v33 = vpack.c.bf16 %v7516_v31, %v7514_v13  ;;  %v10125_v38 = vld [vmem:[#allocation52_spill] sm:$0xff]  ;;  %v10127_v9 = vld [vmem:[#allocation37_spill] sm:$0xff] }
 0x1c4   :  { %3631 = vmatmul.mubr.bf16.gmra.mrb[68].mxu1 %v10120_v56  ;;  %3696 = vmatmul.mubr.bf16.gmra.mrb[52].mxu0 %v10121_v22  ;;  %v10123_v21 = vpack.c.bf16 %v7611_v2, %v7609_v28  ;;  %vm171_vm5 = vcmp.eq.s32.totalorder %v10124_v11, %v8022_v50  ;;  %v419_v23 = vsel %vm163_vm12, 1.0, %v10076_v59  ;;  %vm1027_vm11 = vcmp.eq.s32.totalorder %v10125_v38, %v8022_v50  ;;  %v10128_v4 = vld [vmem:[#allocation60_spill] sm:$0xff] }
 0x1c5   :  { %3638 = vmatprep.mubr.bf16.mxu1 %v10122_v33  ;;  %vm1035_vm13 = vcmp.eq.s32.totalorder %v10126_v26, %v8022_v50  ;;  %v427_v31 = vsel %vm171_vm5, 1.0, %v10076_v59  ;;  %v1283_v13 = vsel %vm1027_vm11, 1.0, %v10076_v59  ;;  %vm1891_vm14 = vcmp.eq.s32.totalorder %v10127_v9, %v8022_v50 }
 0x1c6   :  { %3703 = vmatprep.mubr.bf16.mxu0 %v10123_v21  ;;  %v1291_v28 = vsel %vm1035_vm13, 1.0, %v10076_v59  ;;  %v1539_v2 = vadd.f32 %v1283_v13, %v419_v23  ;;  %vm1899_vm0 = vcmp.eq.s32.totalorder %v10128_v4, %v8022_v50  ;;  %v2147_v56 = vsel %vm1891_vm14, 1.0, %v10076_v59  ;;  %v4524_v21 = vpop.f32.mrb[4].mxu0  ;;  %v4636_v23 = vpop.f32.mrb[20].mxu1 }
 0x1c7   :  { %v1547_v20 = vadd.f32 %v1291_v28, %v427_v31  ;;  %v2155_v22 = vsel %vm1899_vm0, 1.0, %v10076_v59  ;;  %v488_v33 = vsel %vm232_vm9, 1.0, %v10076_v59  ;;  %vm1096_vm3 = vcmp.eq.s32.totalorder %v10117_v12, %v9999_v18  ;;  %v4525_v8 = vpop.f32.mrb[5].mxu0  ;;  %v4637_v30 = vpop.f32.mrb[21].mxu1 }
 0x1c8   :  { %v8075_v31 = vadd.f32 %v2147_v56, %v1539_v2  ;;  %v1344_v28 = vsel %vm1088_vm10, 1.0, %v10076_v59  ;;  %v1352_v27 = vsel %vm1096_vm3, 1.0, %v10076_v59  ;;  %vm3280_vm1 = vcmask 850944   ;;  %v4527_v56 = vpop.f32.mrb[6].mxu0 }
 0x1c9   :  { %v2411_v13 = vadd.f32 %v2155_v22, %v1547_v20  ;;  %v1600_v43 = vadd.f32 %v1344_v28, %v480_v17  ;;  %v1608_v45 = vadd.f32 %v1352_v27, %v488_v33  ;;  %vm1952_vm6 = vcmp.eq.s32.totalorder %v10118_v54, %v9999_v18  ;;  %v4639_v22 = vpop.f32.mrb[22].mxu1  ;;  %v4528_v37 = vpop.f32.mrb[7].mxu0 }
 0x1ca   :  { %vm1960_vm15 = vcmp.eq.s32.totalorder %v10119_v3, %v9999_v18  ;;  %v4526_v2 = vadd.f32 %v4525_v8, %v4524_v21  ;;  %v4638_v20 = vadd.f32 %v4637_v30, %v4636_v23  ;;  %v2208_v52 = vsel %vm1952_vm6, 1.0, %v10076_v59  ;;  %v4640_v6 = vpop.f32.mrb[23].mxu1  ;;  %v10131_v21 = vld [vmem:[#allocation111_spill] sm:$0xff] }
 0x1cb   :  { %v2659_v55 = vpack.c.bf16 %v2411_v13, %v8075_v31  ;;  %v10129_v17 = vpack.c.bf16 %v7710_v19, %v7704_v5  ;;  %v10130_v27 = vpack.c.bf16 %v7793_v16, %v7791_v25  ;;  %v2216_v33 = vsel %vm1960_vm15, 1.0, %v10076_v59 }
 0x1cc   :  { %v8095_v8 = vadd.f32 %v2208_v52, %v1600_v43  ;;  %v8098_v30 = vadd.s32 768, %v5346_v49  ;;  %vm241_vm7 = vcmp.eq.s32.totalorder %v10131_v21, %v5388_v61  ;;  %v8102_v23 = vadd.f32 %v4638_v20, %v4526_v2  ;;  %v10136_v43 = vld [vmem:[#allocation61_spill] sm:$0xff] }
 0x1cd   :  { %3639 = vmatmul.mubr.bf16.gmra.mrb[72].mxu1 %v10129_v17  ;;  %3704 = vmatmul.mubr.bf16.gmra.mrb[56].mxu0 %v10130_v27  ;;  %v4529_v31 = vadd.f32 %v4528_v37, %v4527_v56  ;;  %v4641_v13 = vadd.f32 %v4640_v6, %v4639_v22  ;;  %v10133_v5 = vpack.c.bf16 %v7876_v58, %v7855_v60  ;;  %v497_v25 = vsel %vm241_vm7, 1.0, %v10076_v59  ;;  %v10141_v17 = vld [vmem:[#allocation51_spill] sm:$0xff]  ;;  %v10142_v27 = vld [vmem:[#allocation9_spill] sm:$0xff] }
 0x1ce   :  { %10132 = vst [vmem:[#allocation105_spill] sm:$0xff] %v8102_v23  ;;  %v10134_v19 = vpack.c.bf16 %v7936_v36, %v7934_v14  ;;  %v2472_v16 = vadd.f32 %v2216_v33, %v1608_v45  ;;  %vm162_vm8 = vcmp.eq.s32.totalorder %v6130_v7, %v8098_v30  ;;  %vm170_vm4 = vcmp.eq.s32.totalorder %v10124_v11, %v8098_v30  ;;  %v10137_v11 = vld [vmem:[#allocation116_spill] sm:$0xff] }
 0x1cf   :  { %3646 = vmatprep.mubr.bf16.mxu1 %v10133_v5  ;;  %vm1026_vm2 = vcmp.eq.s32.totalorder %v10125_v38, %v8098_v30  ;;  %v8117_v49 = vadd.f32 %v4641_v13, %v4529_v31  ;;  %v418_v6 = vsel %vm162_vm8, 1.0, %v10076_v59  ;;  %v426_v52 = vsel %vm170_vm4, 1.0, %v10076_v59  ;;  %v10138_v38 = vld [vmem:[#allocation118_spill] sm:$0xff] }
 0x1d0   :  { %3711 = vmatprep.mubr.bf16.mxu0 %v10134_v19  ;;  %vm1034_vm9 = vcmp.eq.s32.totalorder %v10126_v26, %v8098_v30  ;;  %v2688_v60 = vpack.c.bf16 %v2472_v16, %v8095_v8  ;;  %v1282_v58 = vsel %vm1026_vm2, 1.0, %v10076_v59  ;;  %vm1890_vm10 = vcmp.eq.s32.totalorder %v10127_v9, %v8098_v30  ;;  %v10144_v31 = vld [vmem:[#allocation62_spill] sm:$0xff]  ;;  %v10147_v19 = vld [vmem:[#allocation71_spill] sm:$0xff] }
 0x1d1   :  { %10135 = vst [vmem:[#allocation104_spill] sm:$0xff] %v8117_v49  ;;  %v1290_v7 = vsel %vm1034_vm9, 1.0, %v10076_v59  ;;  %v1538_v37 = vadd.f32 %v1282_v58, %v418_v6  ;;  %vm1898_vm12 = vcmp.eq.s32.totalorder %v10128_v4, %v8098_v30  ;;  %v2146_v36 = vsel %vm1890_vm10, 1.0, %v10076_v59  ;;  %v10145_v13 = vld [vmem:[#allocation26_spill] sm:$0xff]  ;;  %v10148_v6 = vld [vmem:[#allocation40_spill] sm:$0xff] }
 0x1d2   :  { %v1546_v14 = vadd.f32 %v1290_v7, %v426_v52  ;;  %v2154_v45 = vsel %vm1898_vm12, 1.0, %v10076_v59  ;;  %vm249_vm5 = vcmp.eq.s32.totalorder %v10136_v43, %v5388_v61  ;;  %vm1105_vm11 = vcmp.eq.s32.totalorder %v10137_v11, %v5388_v61  ;;  %v10146_v5 = vld [vmem:[#allocation66_spill] sm:$0xff]  ;;  %v10149_v52 = vld [vmem:[#allocation75_spill] sm:$0xff] }
 0x1d3   :  { %vm1113_vm13 = vcmp.eq.s32.totalorder %v10138_v38, %v5388_v61  ;;  %v2402_v26 = vadd.f32 %v2146_v36, %v1538_v37  ;;  %v505_v28 = vsel %vm249_vm5, 1.0, %v10076_v59  ;;  %v1361_v2 = vsel %vm1105_vm11, 1.0, %v10076_v59 }
 0x1d4   :  { %v2410_v9 = vadd.f32 %v2154_v45, %v1546_v14  ;;  %v10139_v4 = vpack.c.bf16 %v7966_v32, %v7981_v62  ;;  %v10140_v20 = vpack.c.bf16 %v8005_v53, %v8003_v15  ;;  %v1369_v56 = vsel %vm1113_vm13, 1.0, %v10076_v59 }
 0x1d5   :  { %v1617_v22 = vadd.f32 %v1361_v2, %v497_v25  ;;  %vm1969_vm14 = vcmp.eq.s32.totalorder %v10141_v17, %v5388_v61  ;;  %vm1977_vm0 = vcmp.eq.s32.totalorder %v10142_v27, %v5388_v61  ;;  %v10143_v33 = vpack.c.bf16 %v8040_v47, %v8038_v40 }
 0x1d6   :  { %3647 = vmatmul.mubr.bf16.gmra.mrb[76].mxu1 %v10139_v4  ;;  %3712 = vmatmul.mubr.bf16.gmra.mrb[60].mxu0 %v10140_v20  ;;  %v2658_v32 = vpack.c.bf16 %v2410_v9, %v2402_v26  ;;  %v1625_v62 = vadd.f32 %v1369_v56, %v505_v28  ;;  %v2225_v15 = vsel %vm1969_vm14, 1.0, %v10076_v59  ;;  %v2233_v53 = vsel %vm1977_vm0, 1.0, %v10076_v59 }
 0x1d7   :  { %3719 = vmatprep.mubr.bf16.mxu0 %v10143_v33  ;;  %4453 = vmatprep.mubr.msk.bf16.mxu1 %vm3280_vm1, %v2659_v55  ;;  %v2481_v8 = vadd.f32 %v2225_v15, %v1617_v22  ;;  %vm179_vm3 = vcmp.eq.s32.totalorder %v10144_v31, %v8022_v50  ;;  %vm187_vm6 = vcmp.eq.s32.totalorder %v10145_v13, %v8022_v50 }
 0x1d8   :  { %vm1043_vm15 = vcmp.eq.s32.totalorder %v10146_v5, %v8022_v50  ;;  %v2489_v40 = vadd.f32 %v2233_v53, %v1625_v62  ;;  %v435_v47 = vsel %vm179_vm3, 1.0, %v10076_v59  ;;  %v443_v55 = vsel %vm187_vm6, 1.0, %v10076_v59 }
 0x1d9   :  { %vm1051_vm7 = vcmp.eq.s32.totalorder %v10147_v19, %v8022_v50  ;;  %v1299_v25 = vsel %vm1043_vm15, 1.0, %v10076_v59  ;;  %vm1907_vm8 = vcmp.eq.s32.totalorder %v10148_v6, %v8022_v50  ;;  %vm1915_vm4 = vcmp.eq.s32.totalorder %v10149_v52, %v8022_v50  ;;  %v4530_v2 = vpop.f32.mrb[8].mxu0  ;;  %v4642_v4 = vpop.f32.mrb[24].mxu1 }
 0x1da   :  { %v1307_v16 = vsel %vm1051_vm7, 1.0, %v10076_v59  ;;  %v2697_v58 = vpack.c.bf16 %v2489_v40, %v2481_v8  ;;  %v1555_v7 = vadd.f32 %v1299_v25, %v435_v47  ;;  %v2163_v14 = vsel %vm1907_vm8, 1.0, %v10076_v59  ;;  %v4531_v56 = vpop.f32.mrb[9].mxu0  ;;  %v4643_v22 = vpop.f32.mrb[25].mxu1 }
 0x1db   :  { %v1563_v37 = vadd.f32 %v1307_v16, %v443_v55  ;;  %v2171_v36 = vsel %vm1915_vm4, 1.0, %v10076_v59  ;;  %vm240_vm2 = vcmp.eq.s32.totalorder %v10131_v21, %v9999_v18  ;;  %vm248_vm9 = vcmp.eq.s32.totalorder %v10136_v43, %v9999_v18  ;;  %v4533_v8 = vpop.f32.mrb[10].mxu0  ;;  %v4645_v40 = vpop.f32.mrb[26].mxu1 }
 0x1dc   :  { %vm1104_vm10 = vcmp.eq.s32.totalorder %v10137_v11, %v9999_v18  ;;  %v2419_v45 = vadd.f32 %v2163_v14, %v1555_v7  ;;  %v496_v9 = vsel %vm240_vm2, 1.0, %v10076_v59  ;;  %v504_v28 = vsel %vm248_vm9, 1.0, %v10076_v59  ;;  %v4534_v25 = vpop.f32.mrb[11].mxu0  ;;  %v4646_v16 = vpop.f32.mrb[27].mxu1 }
 0x1dd   :  { %v2427_v26 = vadd.f32 %v2171_v36, %v1563_v37  ;;  %vm1112_vm12 = vcmp.eq.s32.totalorder %v10138_v38, %v9999_v18  ;;  %v1360_v20 = vsel %vm1104_vm10, 1.0, %v10076_v59  ;;  %vm1968_vm5 = vcmp.eq.s32.totalorder %v10141_v17, %v9999_v18 }
 0x1de   :  { %3720 = vmatmul.mubr.bf16.gmra.mrb[64].mxu0 %v2688_v60  ;;  %3849 = vmatmul.mubr.bf16.vlgmr.msra.gmra.mrb[80].mxu1 %v2658_v32  ;;  %vm1976_vm11 = vcmp.eq.s32.totalorder %v10142_v27, %v9999_v18  ;;  %v1368_v62 = vsel %vm1112_vm12, 1.0, %v10076_v59  ;;  %v1616_v15 = vadd.f32 %v1360_v20, %v496_v9  ;;  %v2224_v60 = vsel %vm1968_vm5, 1.0, %v10076_v59 }
 0x1df   :  { %3727 = vmatprep.mubr.bf16.mxu0 %v2697_v58  ;;  %v2667_v33 = vpack.c.bf16 %v2427_v26, %v2419_v45  ;;  %v4532_v32 = vadd.f32 %v4531_v56, %v4530_v2  ;;  %v4644_v53 = vadd.f32 %v4643_v22, %v4642_v4  ;;  %v1624_v47 = vadd.f32 %v1368_v62, %v504_v28  ;;  %v10152_v4 = vld [vmem:[#allocation55_spill] sm:$0xff] }
 0x1e0   :  { %v2232_v55 = vsel %vm1976_vm11, 1.0, %v10076_v59  ;;  %v2480_v7 = vadd.f32 %v2224_v60, %v1616_v15  ;;  %vm178_vm13 = vcmp.eq.s32.totalorder %v10144_v31, %v8098_v30  ;;  %vm186_vm14 = vcmp.eq.s32.totalorder %v10145_v13, %v8098_v30  ;;  %v10153_v56 = vld [vmem:[#allocation63_spill] sm:$0xff]  ;;  %v10154_v15 = vld [vmem:[#allocation56_spill] sm:$0xff] }
 0x1e1   :  { %4454 = vmatprep.mubr.msk.bf16.mxu1 %vm3280_vm1, %v2667_v33  ;;  %vm1042_vm0 = vcmp.eq.s32.totalorder %v10146_v5, %v8098_v30  ;;  %v8200_v58 = vadd.f32 %v4644_v53, %v4532_v32  ;;  %v4535_v37 = vadd.f32 %v4534_v25, %v4533_v8  ;;  %v4647_v14 = vadd.f32 %v4646_v16, %v4645_v40  ;;  %v10156_v32 = vld [vmem:[#allocation53_spill] sm:$0xff]  ;;  %v10157_v53 = vld [vmem:[#allocation64_spill] sm:$0xff] }
 0x1e2   :  { %v2488_v36 = vadd.f32 %v2232_v55, %v1624_v47  ;;  %v434_v45 = vsel %vm178_vm13, 1.0, %v10076_v59  ;;  %v442_v26 = vsel %vm186_vm14, 1.0, %v10076_v59  ;;  %vm1050_vm3 = vcmp.eq.s32.totalorder %v10147_v19, %v8098_v30 }
 0x1e3   :  { %10150 = vst [vmem:[#allocation112_spill] sm:$0xff] %v8200_v58  ;;  %v1298_v31 = vsel %vm1042_vm0, 1.0, %v10076_v59  ;;  %v8207_v9 = vadd.f32 %v4647_v14, %v4535_v37  ;;  %v1306_v28 = vsel %vm1050_vm3, 1.0, %v10076_v59  ;;  %vm1906_vm6 = vcmp.eq.s32.totalorder %v10148_v6, %v8098_v30 }
 0x1e4   :  { %v2696_v13 = vpack.c.bf16 %v2488_v36, %v2480_v7  ;;  %v1554_v5 = vadd.f32 %v1298_v31, %v434_v45  ;;  %v1562_v2 = vadd.f32 %v1306_v28, %v442_v26  ;;  %vm1914_vm15 = vcmp.eq.s32.totalorder %v10149_v52, %v8098_v30  ;;  %v10155_v52 = vld [vmem:[#allocation57_spill] sm:$0xff] }
 0x1e5   :  { %10151 = vst [vmem:[#allocation113_spill] sm:$0xff] %v8207_v9  ;;  %vm257_vm7 = vcmp.eq.s32.totalorder %v10152_v4, %v5388_v61  ;;  %v2162_v19 = vsel %vm1906_vm6, 1.0, %v10076_v59  ;;  %v2170_v20 = vsel %vm1914_vm15, 1.0, %v10076_v59  ;;  %vm265_vm8 = vcmp.eq.s32.totalorder %v10153_v56, %v5388_v61 }
 0x1e6   :  { %3728 = vmatmul.mubr.bf16.gmra.mrb[68].mxu0 %v2696_v13  ;;  %v513_v22 = vsel %vm257_vm7, 1.0, %v10076_v59  ;;  %v2418_v33 = vadd.f32 %v2162_v19, %v1554_v5  ;;  %v2426_v62 = vadd.f32 %v2170_v20, %v1562_v2  ;;  %v521_v6 = vsel %vm265_vm8, 1.0, %v10076_v59 }
 0x1e7   :  { %vm1121_vm4 = vcmp.eq.s32.totalorder %v10154_v15, %v5388_v61  ;;  %vm1129_vm2 = vcmp.eq.s32.totalorder %v10155_v52, %v5388_v61  ;;  %vm1985_vm9 = vcmp.eq.s32.totalorder %v10156_v32, %v5388_v61  ;;  %vm1993_vm10 = vcmp.eq.s32.totalorder %v10157_v53, %v5388_v61 }
 0x1e8   :  { %v1377_v60 = vsel %vm1121_vm4, 1.0, %v10076_v59  ;;  %v2666_v8 = vpack.c.bf16 %v2426_v62, %v2418_v33  ;;  %v1385_v40 = vsel %vm1129_vm2, 1.0, %v10076_v59  ;;  %v2241_v55 = vsel %vm1985_vm9, 1.0, %v10076_v59 }
 0x1e9   :  { %v1633_v47 = vadd.f32 %v1377_v60, %v513_v22  ;;  %v1641_v25 = vadd.f32 %v1385_v40, %v521_v6  ;;  %v2249_v16 = vsel %vm1993_vm10, 1.0, %v10076_v59  ;;  %vm195_vm12 = vcmp.eq.s32.totalorder %v10043_v42, %v8022_v50 }
 0x1ea   :  { %vm203_vm5 = vcmp.eq.s32.totalorder %v10045_v46, %v8022_v50  ;;  %3857 = vmatmul.mubr.bf16.gmra.mrb[84].mxu1 %v2666_v8  ;;  %v451_v37 = vsel %vm195_vm12, 1.0, %v10076_v59  ;;  %vm1059_vm11 = vcmp.eq.s32.totalorder %v10048_v24, %v8022_v50  ;;  %vm1067_vm13 = vcmp.eq.s32.totalorder %v10049_v44, %v8022_v50 }
 0x1eb   :  { %v2497_v7 = vadd.f32 %v2241_v55, %v1633_v47  ;;  %v459_v14 = vsel %vm203_vm5, 1.0, %v10076_v59  ;;  %v2505_v36 = vadd.f32 %v2249_v16, %v1641_v25  ;;  %v1315_v45 = vsel %vm1059_vm11, 1.0, %v10076_v59 }
 0x1ec   :  { %vm1923_vm14 = vcmp.eq.s32.totalorder %v10051_v63, %v8022_v50  ;;  %v1323_v26 = vsel %vm1067_vm13, 1.0, %v10076_v59  ;;  %v1571_v31 = vadd.f32 %v1315_v45, %v451_v37  ;;  %vm1931_vm0 = vcmp.eq.s32.totalorder %v10053_v48, %v8022_v50  ;;  %v8268_v8 = vpop.f32.mrb[12].mxu0  ;;  %v8270_v40 = vpop.f32.mrb[28].mxu1 }
 0x1ed   :  { %v2179_v13 = vsel %vm1923_vm14, 1.0, %v10076_v59  ;;  %v2705_v28 = vpack.c.bf16 %v2505_v36, %v2497_v7  ;;  %v1579_v5 = vadd.f32 %v1323_v26, %v459_v14  ;;  %v2187_v2 = vsel %vm1931_vm0, 1.0, %v10076_v59  ;;  %v4537_v7 = vpop.f32.mrb[13].mxu0  ;;  %v4649_v37 = vpop.f32.mrb[29].mxu1 }
 0x1ee   :  { %vm256_vm3 = vcmp.eq.s32.totalorder %v10152_v4, %v9999_v18  ;;  %v2435_v19 = vadd.f32 %v2179_v13, %v1571_v31  ;;  %vm264_vm6 = vcmp.eq.s32.totalorder %v10153_v56, %v9999_v18  ;;  %vm1120_vm15 = vcmp.eq.s32.totalorder %v10154_v15, %v9999_v18  ;;  %v4539_v36 = vpop.f32.mrb[14].mxu0  ;;  %v4651_v45 = vpop.f32.mrb[30].mxu1 }
 0x1ef   :  { %v512_v20 = vsel %vm256_vm3, 1.0, %v10076_v59  ;;  %3735 = vmatprep.mubr.bf16.mxu0 %v2705_v28  ;;  %v2443_v22 = vadd.f32 %v2187_v2, %v1579_v5  ;;  %v520_v33 = vsel %vm264_vm6, 1.0, %v10076_v59  ;;  %vm1128_vm7 = vcmp.eq.s32.totalorder %v10155_v52, %v9999_v18  ;;  %v4540_v28 = vpop.f32.mrb[15].mxu0 }
 0x1f0   :  { %v1376_v62 = vsel %vm1120_vm15, 1.0, %v10076_v59  ;;  %v1384_v6 = vsel %vm1128_vm7, 1.0, %v10076_v59  ;;  %vm1984_vm8 = vcmp.eq.s32.totalorder %v10156_v32, %v9999_v18  ;;  %vm1992_vm4 = vcmp.eq.s32.totalorder %v10157_v53, %v9999_v18 }
 0x1f1   :  { %v1632_v60 = vadd.f32 %v1376_v62, %v512_v20  ;;  %v2675_v47 = vpack.c.bf16 %v2443_v22, %v2435_v19  ;;  %v1640_v55 = vadd.f32 %v1384_v6, %v520_v33  ;;  %v2240_v25 = vsel %vm1984_vm8, 1.0, %v10076_v59  ;;  %v10159_v33 = vld [vmem:[#allocation69_spill] sm:$0xff]  ;;  %v10160_v62 = vld [vmem:[#allocation67_spill] sm:$0xff] }
 0x1f2   :  { %v2248_v16 = vsel %vm1992_vm4, 1.0, %v10076_v59  ;;  %vm194_vm2 = vcmp.eq.s32.totalorder %v10043_v42, %v8098_v30  ;;  %vm202_vm9 = vcmp.eq.s32.totalorder %v10045_v46, %v8098_v30  ;;  %vm1058_vm10 = vcmp.eq.s32.totalorder %v10048_v24, %v8098_v30  ;;  %v4652_v42 = vpop.f32.mrb[31].mxu1 }
 0x1f3   :  { %v2496_v14 = vadd.f32 %v2240_v25, %v1632_v60  ;;  %4455 = vmatprep.mubr.msk.bf16.mxu1 %vm3280_vm1, %v2675_v47  ;;  %v2504_v26 = vadd.f32 %v2248_v16, %v1640_v55  ;;  %v450_v31 = vsel %vm194_vm2, 1.0, %v10076_v59  ;;  %v458_v13 = vsel %vm202_vm9, 1.0, %v10076_v59  ;;  %v10161_v47 = vld [vmem:[#allocation58_spill] sm:$0xff]  ;;  %v10162_v25 = vld [vmem:[#allocation77_spill] sm:$0xff] }
 0x1f4   :  { %vm1066_vm12 = vcmp.eq.s32.totalorder %v10049_v44, %v8098_v30  ;;  %v1314_v5 = vsel %vm1058_vm10, 1.0, %v10076_v59  ;;  %vm1922_vm5 = vcmp.eq.s32.totalorder %v10051_v63, %v8098_v30  ;;  %vm1930_vm11 = vcmp.eq.s32.totalorder %v10053_v48, %v8098_v30  ;;  %v10158_v44 = vld [vmem:[#allocation65_spill] sm:$0xff]  ;;  %v10163_v16 = vld [vmem:[#allocation38_spill] sm:$0xff] }
 0x1f5   :  { %v1322_v46 = vsel %vm1066_vm12, 1.0, %v10076_v59  ;;  %v2704_v24 = vpack.c.bf16 %v2504_v26, %v2496_v14  ;;  %v1570_v2 = vadd.f32 %v1314_v5, %v450_v31  ;;  %v2178_v20 = vsel %vm1922_vm5, 1.0, %v10076_v59 }
 0x1f6   :  { %v1578_v19 = vadd.f32 %v1322_v46, %v458_v13  ;;  %v2186_v22 = vsel %vm1930_vm11, 1.0, %v10076_v59  ;;  %vm273_vm13 = vcmp.eq.s32.totalorder %v10158_v44, %v5388_v61  ;;  %vm281_vm14 = vcmp.eq.s32.totalorder %v10159_v33, %v5388_v61 }
 0x1f7   :  { %vm1137_vm0 = vcmp.eq.s32.totalorder %v10160_v62, %v5388_v61  ;;  %3736 = vmatmul.mubr.bf16.gmra.mrb[72].mxu0 %v2704_v24  ;;  %v2434_v63 = vadd.f32 %v2178_v20, %v1570_v2  ;;  %v529_v48 = vsel %vm273_vm13, 1.0, %v10076_v59  ;;  %v537_v60 = vsel %vm281_vm14, 1.0, %v10076_v59 }
 0x1f8   :  { %v2442_v6 = vadd.f32 %v2186_v22, %v1578_v19  ;;  %vm1145_vm3 = vcmp.eq.s32.totalorder %v10161_v47, %v5388_v61  ;;  %v1393_v55 = vsel %vm1137_vm0, 1.0, %v10076_v59  ;;  %vm2001_vm6 = vcmp.eq.s32.totalorder %v10162_v25, %v5388_v61 }
 0x1f9   :  { %vm2009_vm15 = vcmp.eq.s32.totalorder %v10163_v16, %v5388_v61  ;;  %v1401_v26 = vsel %vm1145_vm3, 1.0, %v10076_v59  ;;  %v1649_v31 = vadd.f32 %v1393_v55, %v529_v48  ;;  %v2257_v13 = vsel %vm2001_vm6, 1.0, %v10076_v59 }
 0x1fa   :  { %v2674_v14 = vpack.c.bf16 %v2442_v6, %v2434_v63  ;;  %v1657_v5 = vadd.f32 %v1401_v26, %v537_v60  ;;  %v2265_v46 = vsel %vm2009_vm15, 1.0, %v10076_v59  ;;  %vm211_vm7 = vcmp.eq.s32.totalorder %v10094_v0, %v8022_v50 }
 0x1fb   :  { %vm219_vm8 = vcmp.eq.s32.totalorder %v10095_v51, %v8022_v50  ;;  %v2513_v24 = vadd.f32 %v2257_v13, %v1649_v31  ;;  %v467_v2 = vsel %vm211_vm7, 1.0, %v10076_v59  ;;  %vm1075_vm4 = vcmp.eq.s32.totalorder %v10096_v39, %v8022_v50 }
 0x1fc   :  { %3865 = vmatmul.mubr.bf16.gmra.mrb[88].mxu1 %v2674_v14  ;;  %v475_v19 = vsel %vm219_vm8, 1.0, %v10076_v59  ;;  %v2521_v20 = vadd.f32 %v2265_v46, %v1657_v5  ;;  %vm1083_vm2 = vcmp.eq.s32.totalorder %v10097_v35, %v8022_v50  ;;  %v1331_v22 = vsel %vm1075_vm4, 1.0, %v10076_v59 }
 0x1fd   :  { %vm1939_vm9 = vcmp.eq.s32.totalorder %v10098_v29, %v8022_v50  ;;  %v1339_v63 = vsel %vm1083_vm2, 1.0, %v10076_v59  ;;  %v1587_v6 = vadd.f32 %v1331_v22, %v467_v2  ;;  %vm1947_vm10 = vcmp.eq.s32.totalorder %v10099_v10, %v8022_v50 }
 0x1fe   :  { %v2195_v48 = vsel %vm1939_vm9, 1.0, %v10076_v59  ;;  %v2713_v60 = vpack.c.bf16 %v2521_v20, %v2513_v24  ;;  %v1595_v55 = vadd.f32 %v1339_v63, %v475_v19  ;;  %v2203_v14 = vsel %vm1947_vm10, 1.0, %v10076_v59 }
 0x1ff   :  { %v4538_v26 = vadd.f32 %v4537_v7, %v8268_v8  ;;  %v2451_v31 = vadd.f32 %v2195_v48, %v1587_v6  ;;  %v4650_v13 = vadd.f32 %v4649_v37, %v8270_v40  ;;  %v4541_v5 = vadd.f32 %v4540_v28, %v4539_v36 }
 0x200   :  { %v4653_v46 = vadd.f32 %v4652_v42, %v4651_v45  ;;  %3743 = vmatprep.mubr.bf16.mxu0 %v2713_v60  ;;  %v2459_v9 = vadd.f32 %v2203_v14, %v1595_v55  ;;  %vm272_vm12 = vcmp.eq.s32.totalorder %v10158_v44, %v9999_v18  ;;  %vm280_vm5 = vcmp.eq.s32.totalorder %v10159_v33, %v9999_v18  ;;  %v8352_v42 = vpop.f32.mrb[16].mxu0  ;;  %v8354_v19 = vpop.f32.mrb[32].mxu1 }
 0x201   :  { %vm1136_vm11 = vcmp.eq.s32.totalorder %v10160_v62, %v9999_v18  ;;  %v8337_v24 = vadd.f32 %v4650_v13, %v4538_v26  ;;  %v528_v8 = vsel %vm272_vm12, 1.0, %v10076_v59  ;;  %v536_v40 = vsel %vm280_vm5, 1.0, %v10076_v59  ;;  %v8362_v22 = vpop.f32.mrb[17].mxu0  ;;  %v8364_v63 = vpop.f32.mrb[33].mxu1 }
 0x202   :  { %v8339_v2 = vadd.f32 %v4653_v46, %v4541_v5  ;;  %v2683_v7 = vpack.c.bf16 %v2459_v9, %v2451_v31  ;;  %vm1144_vm13 = vcmp.eq.s32.totalorder %v10161_v47, %v9999_v18  ;;  %v1392_v37 = vsel %vm1136_vm11, 1.0, %v10076_v59  ;;  %v8370_v55 = vpop.f32.mrb[18].mxu0  ;;  %v8372_v14 = vpop.f32.mrb[34].mxu1 }
 0x203   :  { %10164 = vst [vmem:[#allocation114_spill] sm:$0xff] %v8337_v24  ;;  %vm2000_vm14 = vcmp.eq.s32.totalorder %v10162_v25, %v9999_v18  ;;  %v1400_v36 = vsel %vm1144_vm13, 1.0, %v10076_v59  ;;  %v1648_v45 = vadd.f32 %v1392_v37, %v528_v8  ;;  %vm2008_vm0 = vcmp.eq.s32.totalorder %v10163_v16, %v9999_v18  ;;  %v8379_v26 = vpop.f32.mrb[19].mxu0  ;;  %v8381_v31 = vpop.f32.mrb[35].mxu1  ;;  %v10178_v24 = vld [vmem:[#allocation78_spill] sm:$0xff] }
 0x204   :  { %10165 = vst [vmem:[#allocation107_spill] sm:$0xff] %v8339_v2  ;;  %v2256_v28 = vsel %vm2000_vm14, 1.0, %v10076_v59  ;;  %4456 = vmatprep.mubr.msk.bf16.mxu1 %vm3280_vm1, %v2683_v7  ;;  %v1656_v9 = vadd.f32 %v1400_v36, %v536_v40  ;;  %v2264_v20 = vsel %vm2008_vm0, 1.0, %v10076_v59  ;;  %vm210_vm3 = vcmp.eq.s32.totalorder %v10094_v0, %v8098_v30  ;;  %v10166_v40 = vld [vmem:[#allocation68_spill] sm:$0xff]  ;;  %v10168_v36 = vld [vmem:[#allocation42_spill] sm:$0xff] }
 0x205   :  { %vm218_vm6 = vcmp.eq.s32.totalorder %v10095_v51, %v8098_v30  ;;  %v2512_v6 = vadd.f32 %v2256_v28, %v1648_v45  ;;  %v466_v48 = vsel %vm210_vm3, 1.0, %v10076_v59  ;;  %vm1074_vm15 = vcmp.eq.s32.totalorder %v10096_v39, %v8098_v30  ;;  %v10167_v7 = vld [vmem:[#allocation72_spill] sm:$0xff] }
 0x206   :  { %v474_v60 = vsel %vm218_vm6, 1.0, %v10076_v59  ;;  %v2520_v0 = vadd.f32 %v2264_v20, %v1656_v9  ;;  %vm1082_vm7 = vcmp.eq.s32.totalorder %v10097_v35, %v8098_v30  ;;  %v1330_v51 = vsel %vm1074_vm15, 1.0, %v10076_v59  ;;  %v10169_v28 = vld [vmem:[#allocation44_spill] sm:$0xff] }
 0x207   :  { %vm1938_vm8 = vcmp.eq.s32.totalorder %v10098_v29, %v8098_v30  ;;  %v1338_v13 = vsel %vm1082_vm7, 1.0, %v10076_v59  ;;  %v1586_v39 = vadd.f32 %v1330_v51, %v466_v48  ;;  %vm1946_vm4 = vcmp.eq.s32.totalorder %v10099_v10, %v8098_v30  ;;  %v10170_v48 = vld [vmem:[#allocation83_spill] sm:$0xff] }
 0x208   :  { %v2194_v5 = vsel %vm1938_vm8, 1.0, %v10076_v59  ;;  %v2712_v46 = vpack.c.bf16 %v2520_v0, %v2512_v6  ;;  %v1594_v8 = vadd.f32 %v1338_v13, %v474_v60  ;;  %v2202_v35 = vsel %vm1946_vm4, 1.0, %v10076_v59  ;;  %v10171_v60 = vld [vmem:[#allocation47_spill] sm:$0xff] }
 0x209   :  { %vm289_vm2 = vcmp.eq.s32.totalorder %v10166_v40, %v5388_v61  ;;  %v2450_v29 = vadd.f32 %v2194_v5, %v1586_v39  ;;  %vm297_vm9 = vcmp.eq.s32.totalorder %v10167_v7, %v5388_v61  ;;  %vm1153_vm10 = vcmp.eq.s32.totalorder %v10168_v36, %v5388_v61 }
 0x20a   :  { %v545_v37 = vsel %vm289_vm2, 1.0, %v10076_v59  ;;  %3744 = vmatmul.mubr.bf16.gmra.mrb[76].mxu0 %v2712_v46  ;;  %v2458_v10 = vadd.f32 %v2202_v35, %v1594_v8  ;;  %v553_v45 = vsel %vm297_vm9, 1.0, %v10076_v59  ;;  %vm1161_vm12 = vcmp.eq.s32.totalorder %v10169_v28, %v5388_v61 }
 0x20b   :  { %v1409_v9 = vsel %vm1153_vm10, 1.0, %v10076_v59  ;;  %v1417_v20 = vsel %vm1161_vm12, 1.0, %v10076_v59  ;;  %vm2017_vm5 = vcmp.eq.s32.totalorder %v10170_v48, %v5388_v61  ;;  %vm2025_vm11 = vcmp.eq.s32.totalorder %v10171_v60, %v5388_v61 }
 0x20c   :  { %v1665_v6 = vadd.f32 %v1409_v9, %v545_v37  ;;  %v2682_v0 = vpack.c.bf16 %v2458_v10, %v2450_v29  ;;  %v1673_v51 = vadd.f32 %v1417_v20, %v553_v45  ;;  %v2273_v13 = vsel %vm2017_vm5, 1.0, %v10076_v59 }
 0x20d   :  { %v2281_v39 = vsel %vm2025_vm11, 1.0, %v10076_v59  ;;  %vm227_vm13 = vcmp.eq.s32.totalorder %v10114_v1, %v8022_v50  ;;  %vm235_vm14 = vcmp.eq.s32.totalorder %v10115_v41, %v8022_v50  ;;  %vm1091_vm0 = vcmp.eq.s32.totalorder %v10116_v57, %v8022_v50 }
 0x20e   :  { %v2529_v5 = vadd.f32 %v2273_v13, %v1665_v6  ;;  %3873 = vmatmul.mubr.bf16.gmra.mrb[92].mxu1 %v2682_v0  ;;  %v2537_v46 = vadd.f32 %v2281_v39, %v1673_v51  ;;  %v483_v8 = vsel %vm227_vm13, 1.0, %v10076_v59  ;;  %v491_v35 = vsel %vm235_vm14, 1.0, %v10076_v59 }
 0x20f   :  { %vm1099_vm3 = vcmp.eq.s32.totalorder %v10117_v12, %v8022_v50  ;;  %v1347_v29 = vsel %vm1091_vm0, 1.0, %v10076_v59  ;;  %vm1955_vm6 = vcmp.eq.s32.totalorder %v10118_v54, %v8022_v50  ;;  %vm1963_vm15 = vcmp.eq.s32.totalorder %v10119_v3, %v8022_v50 }
 0x210   :  { %v1355_v37 = vsel %vm1099_vm3, 1.0, %v10076_v59  ;;  %v2721_v10 = vpack.c.bf16 %v2537_v46, %v2529_v5  ;;  %v1603_v45 = vadd.f32 %v1347_v29, %v483_v8  ;;  %v2211_v20 = vsel %vm1955_vm6, 1.0, %v10076_v59 }
 0x211   :  { %v1611_v9 = vadd.f32 %v1355_v37, %v491_v35  ;;  %v2219_v6 = vsel %vm1963_vm15, 1.0, %v10076_v59  ;;  %vm288_vm7 = vcmp.eq.s32.totalorder %v10166_v40, %v9999_v18  ;;  %vm296_vm8 = vcmp.eq.s32.totalorder %v10167_v7, %v9999_v18 }
 0x212   :  { %vm1152_vm4 = vcmp.eq.s32.totalorder %v10168_v36, %v9999_v18  ;;  %3751 = vmatprep.mubr.bf16.mxu0 %v2721_v10  ;;  %v2467_v0 = vadd.f32 %v2211_v20, %v1603_v45  ;;  %v544_v13 = vsel %vm288_vm7, 1.0, %v10076_v59  ;;  %v552_v39 = vsel %vm296_vm8, 1.0, %v10076_v59 }
 0x213   :  { %v2475_v51 = vadd.f32 %v2219_v6, %v1611_v9  ;;  %vm1160_vm2 = vcmp.eq.s32.totalorder %v10169_v28, %v9999_v18  ;;  %v1408_v5 = vsel %vm1152_vm4, 1.0, %v10076_v59  ;;  %vm2016_vm9 = vcmp.eq.s32.totalorder %v10170_v48, %v9999_v18  ;;  %v8451_v6 = vpop.f32.mrb[20].mxu0 }
 0x214   :  { %vm2024_vm10 = vcmp.eq.s32.totalorder %v10171_v60, %v9999_v18  ;;  %v1416_v8 = vsel %vm1160_vm2, 1.0, %v10076_v59  ;;  %v1664_v35 = vadd.f32 %v1408_v5, %v544_v13  ;;  %v2272_v29 = vsel %vm2016_vm9, 1.0, %v10076_v59 }
 0x215   :  { %v2691_v46 = vpack.c.bf16 %v2475_v51, %v2467_v0  ;;  %v1672_v37 = vadd.f32 %v1416_v8, %v552_v39  ;;  %v2280_v10 = vsel %vm2024_vm10, 1.0, %v10076_v59  ;;  %vm226_vm12 = vcmp.eq.s32.totalorder %v10114_v1, %v8098_v30  ;;  %v8453_v0 = vpop.f32.mrb[36].mxu1 }
 0x216   :  { %vm234_vm5 = vcmp.eq.s32.totalorder %v10115_v41, %v8098_v30  ;;  %v2528_v45 = vadd.f32 %v2272_v29, %v1664_v35  ;;  %v482_v9 = vsel %vm226_vm12, 1.0, %v10076_v59  ;;  %vm1090_vm11 = vcmp.eq.s32.totalorder %v10116_v57, %v8098_v30  ;;  %v8460_v41 = vpop.f32.mrb[21].mxu0  ;;  %v8462_v13 = vpop.f32.mrb[37].mxu1 }
 0x217   :  { %4457 = vmatprep.mubr.msk.bf16.mxu1 %vm3280_vm1, %v2691_v46  ;;  %v490_v20 = vsel %vm234_vm5, 1.0, %v10076_v59  ;;  %v2536_v51 = vadd.f32 %v2280_v10, %v1672_v37  ;;  %vm1098_vm13 = vcmp.eq.s32.totalorder %v10117_v12, %v8098_v30  ;;  %v1346_v1 = vsel %vm1090_vm11, 1.0, %v10076_v59  ;;  %v8468_v46 = vpop.f32.mrb[22].mxu0  ;;  %v8470_v12 = vpop.f32.mrb[38].mxu1 }
 0x218   :  { %vm1954_vm14 = vcmp.eq.s32.totalorder %v10118_v54, %v8098_v30  ;;  %v1354_v39 = vsel %vm1098_vm13, 1.0, %v10076_v59  ;;  %v1602_v57 = vadd.f32 %v1346_v1, %v482_v9  ;;  %vm1962_vm0 = vcmp.eq.s32.totalorder %v10119_v3, %v8098_v30  ;;  %10172 = vst [vmem:[#allocation109_spill] sm:$0xff] %v8470_v12  ;;  %v8475_v29 = vpop.f32.mrb[23].mxu0  ;;  %v8477_v37 = vpop.f32.mrb[39].mxu1  ;;  %v10174_v3 = vld [vmem:[#allocation74_spill] sm:$0xff]  ;;  %v10175_v1 = vld [vmem:[#allocation48_spill] sm:$0xff] }
 0x219   :  { %v2210_v5 = vsel %vm1954_vm14, 1.0, %v10076_v59  ;;  %v2720_v8 = vpack.c.bf16 %v2536_v51, %v2528_v45  ;;  %v1610_v35 = vadd.f32 %v1354_v39, %v490_v20  ;;  %v2218_v54 = vsel %vm1962_vm0, 1.0, %v10076_v59  ;;  %10173 = vst [vmem:[#allocation110_spill] sm:$0xff] %v8477_v37  ;;  %v10176_v51 = vld [vmem:[#allocation82_spill] sm:$0xff] }
 0x21a   :  { %vm305_vm3 = vcmp.eq.s32.totalorder %v7582_v34, %v5388_v61  ;;  %v2466_v10 = vadd.f32 %v2210_v5, %v1602_v57  ;;  %vm313_vm6 = vcmp.eq.s32.totalorder %v10174_v3, %v5388_v61  ;;  %vm1169_vm15 = vcmp.eq.s32.totalorder %v10175_v1, %v5388_v61  ;;  %v10177_v5 = vld [vmem:[#allocation87_spill] sm:$0xff] }
 0x21b   :  { %v561_v9 = vsel %vm305_vm3, 1.0, %v10076_v59  ;;  %3752 = vmatmul.mubr.bf16.gmra.mrb[80].mxu0 %v2720_v8  ;;  %v2474_v45 = vadd.f32 %v2218_v54, %v1610_v35  ;;  %v569_v20 = vsel %vm313_vm6, 1.0, %v10076_v59  ;;  %vm1177_vm7 = vcmp.eq.s32.totalorder %v10176_v51, %v5388_v61 }
 0x21c   :  { %v1425_v39 = vsel %vm1169_vm15, 1.0, %v10076_v59  ;;  %v1433_v2 = vsel %vm1177_vm7, 1.0, %v10076_v59  ;;  %vm2033_vm8 = vcmp.eq.s32.totalorder %v10177_v5, %v5388_v61  ;;  %vm2041_vm4 = vcmp.eq.s32.totalorder %v10178_v24, %v5388_v61 }
 0x21d   :  { %v1681_v57 = vadd.f32 %v1425_v39, %v561_v9  ;;  %v2690_v58 = vpack.c.bf16 %v2474_v45, %v2466_v10  ;;  %v1689_v49 = vadd.f32 %v1433_v2, %v569_v20  ;;  %v2289_v8 = vsel %vm2033_vm8, 1.0, %v10076_v59 }
 0x21e   :  { %v2297_v35 = vsel %vm2041_vm4, 1.0, %v10076_v59  ;;  %vm243_vm2 = vcmp.eq.s32.totalorder %v10131_v21, %v8022_v50  ;;  %vm251_vm9 = vcmp.eq.s32.totalorder %v10136_v43, %v8022_v50  ;;  %vm1107_vm10 = vcmp.eq.s32.totalorder %v10137_v11, %v8022_v50 }
 0x21f   :  { %v2545_v54 = vadd.f32 %v2289_v8, %v1681_v57  ;;  %3881 = vmatmul.mubr.bf16.gmra.mrb[96].mxu1 %v2690_v58  ;;  %v2553_v9 = vadd.f32 %v2297_v35, %v1689_v49  ;;  %v499_v39 = vsel %vm243_vm2, 1.0, %v10076_v59  ;;  %v507_v2 = vsel %vm251_vm9, 1.0, %v10076_v59 }
 0x220   :  { %vm1115_vm12 = vcmp.eq.s32.totalorder %v10138_v38, %v8022_v50  ;;  %v1363_v10 = vsel %vm1107_vm10, 1.0, %v10076_v59  ;;  %vm1971_vm5 = vcmp.eq.s32.totalorder %v10141_v17, %v8022_v50  ;;  %vm1979_vm11 = vcmp.eq.s32.totalorder %v10142_v27, %v8022_v50 }
 0x221   :  { %v1371_v45 = vsel %vm1115_vm12, 1.0, %v10076_v59  ;;  %v2729_v20 = vpack.c.bf16 %v2553_v9, %v2545_v54  ;;  %v1619_v58 = vadd.f32 %v1363_v10, %v499_v39  ;;  %v2227_v57 = vsel %vm1971_vm5, 1.0, %v10076_v59 }
 0x222   :  { %v1627_v49 = vadd.f32 %v1371_v45, %v507_v2  ;;  %v2235_v8 = vsel %vm1979_vm11, 1.0, %v10076_v59  ;;  %v4544_v35 = vadd.f32 %v8362_v22, %v8352_v42  ;;  %v4656_v23 = vadd.f32 %v8364_v63, %v8354_v19 }
 0x223   :  { %vm304_vm13 = vcmp.eq.s32.totalorder %v7582_v34, %v9999_v18  ;;  %3759 = vmatprep.mubr.bf16.mxu0 %v2729_v20  ;;  %v2483_v37 = vadd.f32 %v2227_v57, %v1619_v58  ;;  %vm312_vm14 = vcmp.eq.s32.totalorder %v10174_v3, %v9999_v18  ;;  %vm1168_vm0 = vcmp.eq.s32.totalorder %v10175_v1, %v9999_v18 }
 0x224   :  { %v2491_v12 = vadd.f32 %v2235_v8, %v1627_v49  ;;  %v560_v54 = vsel %vm304_vm13, 1.0, %v10076_v59  ;;  %v8522_v9 = vadd.f32 %v4656_v23, %v4544_v35  ;;  %v568_v39 = vsel %vm312_vm14, 1.0, %v10076_v59 }
 0x225   :  { %vm1176_vm3 = vcmp.eq.s32.totalorder %v10176_v51, %v9999_v18  ;;  %v1424_v19 = vsel %vm1168_vm0, 1.0, %v10076_v59  ;;  %vm2032_vm6 = vcmp.eq.s32.totalorder %v10177_v5, %v9999_v18  ;;  %vm2040_vm15 = vcmp.eq.s32.totalorder %v10178_v24, %v9999_v18 }
 0x226   :  { %10179 = vst [vmem:[#allocation117_spill] sm:$0xff] %v8522_v9  ;;  %v2699_v42 = vpack.c.bf16 %v2491_v12, %v2483_v37  ;;  %v1432_v22 = vsel %vm1176_vm3, 1.0, %v10076_v59  ;;  %v1680_v63 = vadd.f32 %v1424_v19, %v560_v54  ;;  %v2288_v23 = vsel %vm2032_vm6, 1.0, %v10076_v59  ;;  %v10197_v9 = vld [vmem:[#allocation108_spill] sm:$0xff] }
 0x227   :  { %v1688_v2 = vadd.f32 %v1432_v22, %v568_v39  ;;  %v2296_v10 = vsel %vm2040_vm15, 1.0, %v10076_v59  ;;  %vm242_vm7 = vcmp.eq.s32.totalorder %v10131_v21, %v8098_v30  ;;  %vm250_vm8 = vcmp.eq.s32.totalorder %v10136_v43, %v8098_v30  ;;  %v8553_v21 = vpop.f32.mrb[24].mxu0  ;;  %v8555_v43 = vpop.f32.mrb[40].mxu1 }
 0x228   :  { %4458 = vmatprep.mubr.msk.bf16.mxu1 %vm3280_vm1, %v2699_v42  ;;  %vm1106_vm4 = vcmp.eq.s32.totalorder %v10137_v11, %v8098_v30  ;;  %v2544_v12 = vadd.f32 %v2288_v23, %v1680_v63  ;;  %v498_v45 = vsel %vm242_vm7, 1.0, %v10076_v59  ;;  %v506_v20 = vsel %vm250_vm8, 1.0, %v10076_v59  ;;  %v8559_v35 = vpop.f32.mrb[25].mxu0  ;;  %v10180_v63 = vld [vmem:[#allocation80_spill] sm:$0xff] }
 0x229   :  { %v2552_v37 = vadd.f32 %v2296_v10, %v1688_v2  ;;  %vm1114_vm2 = vcmp.eq.s32.totalorder %v10138_v38, %v8098_v30  ;;  %v1362_v58 = vsel %vm1106_vm4, 1.0, %v10076_v59  ;;  %vm1970_vm9 = vcmp.eq.s32.totalorder %v10141_v17, %v8098_v30  ;;  %v8561_v38 = vpop.f32.mrb[41].mxu1  ;;  %v8568_v42 = vpop.f32.mrb[26].mxu0  ;;  %v10181_v2 = vld [vmem:[#allocation97_spill] sm:$0xff]  ;;  %v10182_v23 = vld [vmem:[#allocation76_spill] sm:$0xff] }
 0x22a   :  { %vm1978_vm10 = vcmp.eq.s32.totalorder %v10142_v27, %v8098_v30  ;;  %v1370_v49 = vsel %vm1114_vm2, 1.0, %v10076_v59  ;;  %v1618_v57 = vadd.f32 %v1362_v58, %v498_v45  ;;  %v2226_v8 = vsel %vm1970_vm9, 1.0, %v10076_v59  ;;  %v8570_v19 = vpop.f32.mrb[42].mxu1  ;;  %v8578_v10 = vpop.f32.mrb[27].mxu0  ;;  %v10186_v58 = vld [vmem:[#allocation84_spill] sm:$0xff] }
 0x22b   :  { %v2728_v11 = vpack.c.bf16 %v2552_v37, %v2544_v12  ;;  %v1626_v54 = vadd.f32 %v1370_v49, %v506_v20  ;;  %v2234_v17 = vsel %vm1978_vm10, 1.0, %v10076_v59  ;;  %v4547_v27 = vadd.f32 %v8379_v26, %v8370_v55  ;;  %v8580_v55 = vpop.f32.mrb[43].mxu1  ;;  %v10184_v37 = vld [vmem:[#allocation81_spill] sm:$0xff]  ;;  %v10185_v20 = vld [vmem:[#allocation95_spill] sm:$0xff] }
 0x22c   :  { %v4659_v39 = vadd.f32 %v8381_v31, %v8372_v14  ;;  %v2482_v22 = vadd.f32 %v2226_v8, %v1618_v57  ;;  %vm321_vm12 = vcmp.eq.s32.totalorder %v10180_v63, %v5388_v61  ;;  %vm329_vm5 = vcmp.eq.s32.totalorder %v10181_v2, %v5388_v61 }
 0x22d   :  { %3760 = vmatmul.mubr.bf16.gmra.mrb[84].mxu0 %v2728_v11  ;;  %vm1185_vm11 = vcmp.eq.s32.totalorder %v10182_v23, %v5388_v61  ;;  %v2490_v14 = vadd.f32 %v2234_v17, %v1626_v54  ;;  %v577_v31 = vsel %vm321_vm12, 1.0, %v10076_v59  ;;  %v585_v12 = vsel %vm329_vm5, 1.0, %v10076_v59 }
 0x22e   :  { %v8582_v26 = vadd.f32 %v4659_v39, %v4547_v27  ;;  %vm1193_vm13 = vcmp.eq.s32.totalorder %v10184_v37, %v5388_v61  ;;  %v1441_v45 = vsel %vm1185_vm11, 1.0, %v10076_v59  ;;  %vm2049_vm14 = vcmp.eq.s32.totalorder %v10185_v20, %v5388_v61 }
 0x22f   :  { %vm2057_vm0 = vcmp.eq.s32.totalorder %v10186_v58, %v5388_v61  ;;  %v2698_v11 = vpack.c.bf16 %v2490_v14, %v2482_v22  ;;  %v1449_v49 = vsel %vm1193_vm13, 1.0, %v10076_v59  ;;  %v1697_v57 = vadd.f32 %v1441_v45, %v577_v31 }
 0x230   :  { %10183 = vst [vmem:[#allocation115_spill] sm:$0xff] %v8582_v26  ;;  %v2305_v8 = vsel %vm2049_vm14, 1.0, %v10076_v59  ;;  %v1705_v54 = vadd.f32 %v1449_v49, %v585_v12  ;;  %v2313_v17 = vsel %vm2057_vm0, 1.0, %v10076_v59  ;;  %vm259_vm3 = vcmp.eq.s32.totalorder %v10152_v4, %v8022_v50 }
 0x231   :  { %vm267_vm6 = vcmp.eq.s32.totalorder %v10153_v56, %v8022_v50  ;;  %3889 = vmatmul.mubr.bf16.gmra.mrb[100].mxu1 %v2698_v11  ;;  %v2561_v27 = vadd.f32 %v2305_v8, %v1697_v57  ;;  %v515_v39 = vsel %vm259_vm3, 1.0, %v10076_v59  ;;  %vm1123_vm15 = vcmp.eq.s32.totalorder %v10154_v15, %v8022_v50 }
 0x232   :  { %v523_v22 = vsel %vm267_vm6, 1.0, %v10076_v59  ;;  %v2569_v14 = vadd.f32 %v2313_v17, %v1705_v54  ;;  %vm1131_vm7 = vcmp.eq.s32.totalorder %v10155_v52, %v8022_v50  ;;  %v1379_v31 = vsel %vm1123_vm15, 1.0, %v10076_v59 }
 0x233   :  { %vm1987_vm8 = vcmp.eq.s32.totalorder %v10156_v32, %v8022_v50  ;;  %v1387_v12 = vsel %vm1131_vm7, 1.0, %v10076_v59  ;;  %v1635_v45 = vadd.f32 %v1379_v31, %v515_v39  ;;  %vm1995_vm4 = vcmp.eq.s32.totalorder %v10157_v53, %v8022_v50 }
 0x234   :  { %v2243_v11 = vsel %vm1987_vm8, 1.0, %v10076_v59  ;;  %v2737_v49 = vpack.c.bf16 %v2569_v14, %v2561_v27  ;;  %v1643_v57 = vadd.f32 %v1387_v12, %v523_v22  ;;  %v2251_v8 = vsel %vm1995_vm4, 1.0, %v10076_v59 }
 0x235   :  { %vm320_vm2 = vcmp.eq.s32.totalorder %v10180_v63, %v9999_v18  ;;  %v2499_v54 = vadd.f32 %v2243_v11, %v1635_v45  ;;  %vm328_vm9 = vcmp.eq.s32.totalorder %v10181_v2, %v9999_v18  ;;  %vm1184_vm10 = vcmp.eq.s32.totalorder %v10182_v23, %v9999_v18 }
 0x236   :  { %v576_v17 = vsel %vm320_vm2, 1.0, %v10076_v59  ;;  %3767 = vmatprep.mubr.bf16.mxu0 %v2737_v49  ;;  %v2507_v39 = vadd.f32 %v2251_v8, %v1643_v57  ;;  %v584_v31 = vsel %vm328_vm9, 1.0, %v10076_v59  ;;  %vm1192_vm12 = vcmp.eq.s32.totalorder %v10184_v37, %v9999_v18 }
 0x237   :  { %v1440_v27 = vsel %vm1184_vm10, 1.0, %v10076_v59  ;;  %v1448_v22 = vsel %vm1192_vm12, 1.0, %v10076_v59  ;;  %vm2048_vm5 = vcmp.eq.s32.totalorder %v10185_v20, %v9999_v18  ;;  %vm2056_vm11 = vcmp.eq.s32.totalorder %v10186_v58, %v9999_v18 }
 0x238   :  { %v1696_v14 = vadd.f32 %v1440_v27, %v576_v17  ;;  %v2707_v12 = vpack.c.bf16 %v2507_v39, %v2499_v54  ;;  %v1704_v45 = vadd.f32 %v1448_v22, %v584_v31  ;;  %v2304_v11 = vsel %vm2048_vm5, 1.0, %v10076_v59  ;;  %v8650_v22 = vpop.f32.mrb[28].mxu0 }
 0x239   :  { %v2312_v49 = vsel %vm2056_vm11, 1.0, %v10076_v59  ;;  %vm258_vm13 = vcmp.eq.s32.totalorder %v10152_v4, %v8098_v30  ;;  %vm266_vm14 = vcmp.eq.s32.totalorder %v10153_v56, %v8098_v30  ;;  %vm1122_vm0 = vcmp.eq.s32.totalorder %v10154_v15, %v8098_v30  ;;  %10187 = vst [vmem:[#allocation86_spill] sm:$0xff] %v8650_v22 }
 0x23a   :  { %v2560_v57 = vadd.f32 %v2304_v11, %v1696_v14  ;;  %4459 = vmatprep.mubr.msk.bf16.mxu1 %vm3280_vm1, %v2707_v12  ;;  %v2568_v8 = vadd.f32 %v2312_v49, %v1704_v45  ;;  %v514_v54 = vsel %vm258_vm13, 1.0, %v10076_v59  ;;  %v522_v17 = vsel %vm266_vm14, 1.0, %v10076_v59  ;;  %v8652_v14 = vpop.f32.mrb[44].mxu1  ;;  %v10189_v12 = vld [vmem:[#allocation43_spill] sm:$0xff] }
 0x23b   :  { %vm1130_vm3 = vcmp.eq.s32.totalorder %v10155_v52, %v8098_v30  ;;  %v1378_v39 = vsel %vm1122_vm0, 1.0, %v10076_v59  ;;  %vm1986_vm6 = vcmp.eq.s32.totalorder %v10156_v32, %v8098_v30  ;;  %vm1994_vm15 = vcmp.eq.s32.totalorder %v10157_v53, %v8098_v30  ;;  %10188 = vst [vmem:[#allocation31_spill] sm:$0xff] %v8652_v14  ;;  %v10190_v45 = vld [vmem:[#allocation103_spill] sm:$0xff]  ;;  %v10191_v32 = vld [vmem:[#allocation85_spill] sm:$0xff]  ;;  %v8661_v53 = vpop.f32.mrb[29].mxu0  ;;  %v8663_v11 = vpop.f32.mrb[45].mxu1 }
 0x23c   :  { %v1386_v4 = vsel %vm1130_vm3, 1.0, %v10076_v59  ;;  %v2736_v56 = vpack.c.bf16 %v2568_v8, %v2560_v57  ;;  %v1634_v15 = vadd.f32 %v1378_v39, %v514_v54  ;;  %v2242_v27 = vsel %vm1986_vm6, 1.0, %v10076_v59  ;;  %10192 = vst [vmem:[#allocation89_spill] sm:$0xff] %v8661_v53  ;;  %10193 = vst [vmem:[#allocation91_spill] sm:$0xff] %v8663_v11  ;;  %v8669_v39 = vpop.f32.mrb[46].mxu1 }
 0x23d   :  { %v1642_v31 = vadd.f32 %v1386_v4, %v522_v17  ;;  %v2250_v52 = vsel %vm1994_vm15, 1.0, %v10076_v59  ;;  %vm337_vm7 = vcmp.eq.s32.totalorder %v10189_v12, %v5388_v61  ;;  %vm345_vm8 = vcmp.eq.s32.totalorder %v10190_v45, %v5388_v61  ;;  %v8667_v17 = vpop.f32.mrb[30].mxu0  ;;  %10195 = vst [vmem:[#allocation96_spill] sm:$0xff] %v8669_v39  ;;  %v10196_v4 = vld [vmem:[#allocation90_spill] sm:$0xff] }
 0x23e   :  { %vm1201_vm4 = vcmp.eq.s32.totalorder %v10191_v32, %v5388_v61  ;;  %3768 = vmatmul.mubr.bf16.gmra.mrb[88].mxu0 %v2736_v56  ;;  %v2498_v49 = vadd.f32 %v2242_v27, %v1634_v15  ;;  %v593_v8 = vsel %vm337_vm7, 1.0, %v10076_v59  ;;  %v601_v54 = vsel %vm345_vm8, 1.0, %v10076_v59  ;;  %10194 = vst [vmem:[#allocation46_spill] sm:$0xff] %v8667_v17  ;;  %v10198_v56 = vld [vmem:[#allocation93_spill] sm:$0xff]  ;;  %v8678_v15 = vpop.f32.mrb[31].mxu0 }
 0x23f   :  { %v2506_v57 = vadd.f32 %v2250_v52, %v1642_v31  ;;  %vm1209_vm2 = vcmp.eq.s32.totalorder %v10196_v4, %v5388_v61  ;;  %v1457_v26 = vsel %vm1201_vm4, 1.0, %v10076_v59  ;;  %vm2065_vm9 = vcmp.eq.s32.totalorder %v10197_v9, %v5388_v61  ;;  %10199 = vst [vmem:[#allocation21_spill] sm:$0xff] %v8678_v15  ;;  %v8680_v31 = vpop.f32.mrb[47].mxu1 }
 0x240   :  { %vm2073_vm10 = vcmp.eq.s32.totalorder %v10198_v56, %v5388_v61  ;;  %10200 = vst [vmem:[#allocation19_spill] sm:$0xff] %v8680_v31  ;;  %v1465_v52 = vsel %vm1209_vm2, 1.0, %v10076_v59  ;;  %v1713_v17 = vadd.f32 %v1457_v26, %v593_v8  ;;  %v2321_v39 = vsel %vm2065_vm9, 1.0, %v10076_v59 }
 0x241   :  { %v2706_v27 = vpack.c.bf16 %v2506_v57, %v2498_v49  ;;  %v1721_v11 = vadd.f32 %v1465_v52, %v601_v54  ;;  %v2329_v14 = vsel %vm2073_vm10, 1.0, %v10076_v59  ;;  %vm275_vm12 = vcmp.eq.s32.totalorder %v10158_v44, %v8022_v50 }
 0x242   :  { %vm283_vm5 = vcmp.eq.s32.totalorder %v10159_v33, %v8022_v50  ;;  %v2577_v53 = vadd.f32 %v2321_v39, %v1713_v17  ;;  %v531_v15 = vsel %vm275_vm12, 1.0, %v10076_v59  ;;  %vm1139_vm11 = vcmp.eq.s32.totalorder %v10160_v62, %v8022_v50 }
 0x243   :  { %3897 = vmatmul.mubr.bf16.gmra.mrb[104].mxu1 %v2706_v27  ;;  %v539_v49 = vsel %vm283_vm5, 1.0, %v10076_v59  ;;  %v2585_v26 = vadd.f32 %v2329_v14, %v1721_v11  ;;  %vm1147_vm13 = vcmp.eq.s32.totalorder %v10161_v47, %v8022_v50  ;;  %v1395_v57 = vsel %vm1139_vm11, 1.0, %v10076_v59 }
 0x244   :  { %vm2003_vm14 = vcmp.eq.s32.totalorder %v10162_v25, %v8022_v50  ;;  %v1403_v8 = vsel %vm1147_vm13, 1.0, %v10076_v59  ;;  %v1651_v54 = vadd.f32 %v1395_v57, %v531_v15  ;;  %vm2011_vm0 = vcmp.eq.s32.totalorder %v10163_v16, %v8022_v50 }
 0x245   :  { %v2259_v17 = vsel %vm2003_vm14, 1.0, %v10076_v59  ;;  %v2745_v39 = vpack.c.bf16 %v2585_v26, %v2577_v53  ;;  %v1659_v27 = vadd.f32 %v1403_v8, %v539_v49  ;;  %v2267_v14 = vsel %vm2011_vm0, 1.0, %v10076_v59 }
 0x246   :  { %vm336_vm3 = vcmp.eq.s32.totalorder %v10189_v12, %v9999_v18  ;;  %v2515_v11 = vadd.f32 %v2259_v17, %v1651_v54  ;;  %vm344_vm6 = vcmp.eq.s32.totalorder %v10190_v45, %v9999_v18  ;;  %vm1200_vm15 = vcmp.eq.s32.totalorder %v10191_v32, %v9999_v18 }
 0x247   :  { %v592_v52 = vsel %vm336_vm3, 1.0, %v10076_v59  ;;  %3775 = vmatprep.mubr.bf16.mxu0 %v2745_v39  ;;  %v2523_v15 = vadd.f32 %v2267_v14, %v1659_v27  ;;  %v600_v57 = vsel %vm344_vm6, 1.0, %v10076_v59  ;;  %vm1208_vm7 = vcmp.eq.s32.totalorder %v10196_v4, %v9999_v18 }
 0x248   :  { %v1456_v53 = vsel %vm1200_vm15, 1.0, %v10076_v59  ;;  %v1464_v49 = vsel %vm1208_vm7, 1.0, %v10076_v59  ;;  %vm2064_vm8 = vcmp.eq.s32.totalorder %v10197_v9, %v9999_v18  ;;  %vm2072_vm4 = vcmp.eq.s32.totalorder %v10198_v56, %v9999_v18 }
 0x249   :  { %v1712_v26 = vadd.f32 %v1456_v53, %v592_v52  ;;  %v2715_v8 = vpack.c.bf16 %v2523_v15, %v2515_v11  ;;  %v1720_v54 = vadd.f32 %v1464_v49, %v600_v57  ;;  %v2320_v17 = vsel %vm2064_vm8, 1.0, %v10076_v59 }
 0x24a   :  { %v2328_v39 = vsel %vm2072_vm4, 1.0, %v10076_v59  ;;  %vm274_vm2 = vcmp.eq.s32.totalorder %v10158_v44, %v8098_v30  ;;  %vm282_vm9 = vcmp.eq.s32.totalorder %v10159_v33, %v8098_v30  ;;  %vm1138_vm10 = vcmp.eq.s32.totalorder %v10160_v62, %v8098_v30 }
 0x24b   :  { %v2576_v27 = vadd.f32 %v2320_v17, %v1712_v26  ;;  %4460 = vmatprep.mubr.msk.bf16.mxu1 %vm3280_vm1, %v2715_v8  ;;  %v2584_v14 = vadd.f32 %v2328_v39, %v1720_v54  ;;  %v530_v11 = vsel %vm274_vm2, 1.0, %v10076_v59  ;;  %v538_v52 = vsel %vm282_vm9, 1.0, %v10076_v59  ;;  %v10201_v26 = vld [vmem:[#allocation12_spill] sm:$0xff]  ;;  %v10203_v8 = vld [vmem:[#allocation5_spill] sm:$0xff]  ;;  %v8748_v39 = vpop.f32.mrb[32].mxu0 }
 0x24c   :  { %vm1146_vm12 = vcmp.eq.s32.totalorder %v10161_v47, %v8098_v30  ;;  %v1394_v15 = vsel %vm1138_vm10, 1.0, %v10076_v59  ;;  %vm2002_vm5 = vcmp.eq.s32.totalorder %v10162_v25, %v8098_v30  ;;  %vm2010_vm11 = vcmp.eq.s32.totalorder %v10163_v16, %v8098_v30  ;;  %v10202_v47 = vld [vmem:[#allocation14_spill] sm:$0xff]  ;;  %10204 = vst [vmem:[#allocation28_spill] sm:$0xff] %v8748_v39 }
 0x24d   :  { %v1402_v44 = vsel %vm1146_vm12, 1.0, %v10076_v59  ;;  %v2744_v33 = vpack.c.bf16 %v2584_v14, %v2576_v27  ;;  %v1650_v62 = vadd.f32 %v1394_v15, %v530_v11  ;;  %v2258_v53 = vsel %vm2002_vm5, 1.0, %v10076_v59  ;;  %v8750_v27 = vpop.f32.mrb[48].mxu1  ;;  %v10206_v14 = vld [vmem:[#allocation7_spill] sm:$0xff] }
 0x24e   :  { %v1658_v57 = vadd.f32 %v1402_v44, %v538_v52  ;;  %v2266_v49 = vsel %vm2010_vm11, 1.0, %v10076_v59  ;;  %vm353_vm13 = vcmp.eq.s32.totalorder %v10201_v26, %v5388_v61  ;;  %vm361_vm14 = vcmp.eq.s32.totalorder %v10202_v47, %v5388_v61  ;;  %10205 = vst [vmem:[#allocation25_spill] sm:$0xff] %v8750_v27  ;;  %v10207_v52 = vld [vmem:[#allocation6_spill] sm:$0xff]  ;;  %v10208_v15 = vld [vmem:[#allocation11_spill] sm:$0xff]  ;;  %v8759_v44 = vpop.f32.mrb[33].mxu0 }
 0x24f   :  { %vm1217_vm0 = vcmp.eq.s32.totalorder %v10203_v8, %v5388_v61  ;;  %3776 = vmatmul.mubr.bf16.gmra.mrb[92].mxu0 %v2744_v33  ;;  %v2514_v25 = vadd.f32 %v2258_v53, %v1650_v62  ;;  %v609_v16 = vsel %vm353_vm13, 1.0, %v10076_v59  ;;  %v617_v17 = vsel %vm361_vm14, 1.0, %v10076_v59  ;;  %10209 = vst [vmem:[#allocation35_spill] sm:$0xff] %v8759_v44  ;;  %v8761_v33 = vpop.f32.mrb[49].mxu1  ;;  %v8765_v27 = vpop.f32.mrb[34].mxu0 }
 0x250   :  { %v2522_v54 = vadd.f32 %v2266_v49, %v1658_v57  ;;  %vm1225_vm3 = vcmp.eq.s32.totalorder %v10206_v14, %v5388_v61  ;;  %v1473_v11 = vsel %vm1217_vm0, 1.0, %v10076_v59  ;;  %vm2081_vm6 = vcmp.eq.s32.totalorder %v10207_v52, %v5388_v61  ;;  %10210 = vst [vmem:[#allocation36_spill] sm:$0xff] %v8761_v33  ;;  %10211 = vst [vmem:[#allocation98_spill] sm:$0xff] %v8765_v27  ;;  %v8767_v39 = vpop.f32.mrb[50].mxu1  ;;  %v8774_v33 = vpop.f32.mrb[35].mxu0 }
 0x251   :  { %vm2089_vm15 = vcmp.eq.s32.totalorder %v10208_v15, %v5388_v61  ;;  %v1481_v57 = vsel %vm1225_vm3, 1.0, %v10076_v59  ;;  %v1729_v53 = vadd.f32 %v1473_v11, %v609_v16  ;;  %v2337_v49 = vsel %vm2081_vm6, 1.0, %v10076_v59  ;;  %10212 = vst [vmem:[#allocation59_spill] sm:$0xff] %v8767_v39  ;;  %10213 = vst [vmem:[#allocation100_spill] sm:$0xff] %v8774_v33 }
 0x252   :  { %v2714_v62 = vpack.c.bf16 %v2522_v54, %v2514_v25  ;;  %v1737_v31 = vadd.f32 %v1481_v57, %v617_v17  ;;  %v2345_v22 = vsel %vm2089_vm15, 1.0, %v10076_v59  ;;  %vm291_vm7 = vcmp.eq.s32.totalorder %v10166_v40, %v8022_v50  ;;  %v8776_v25 = vpop.f32.mrb[51].mxu1 }
 0x253   :  { %vm299_vm8 = vcmp.eq.s32.totalorder %v10167_v7, %v8022_v50  ;;  %10214 = vst [vmem:[#allocation102_spill] sm:$0xff] %v8776_v25  ;;  %v2593_v54 = vadd.f32 %v2337_v49, %v1729_v53  ;;  %v547_v16 = vsel %vm291_vm7, 1.0, %v10076_v59  ;;  %vm1155_vm4 = vcmp.eq.s32.totalorder %v10168_v36, %v8022_v50 }
 0x254   :  { %3905 = vmatmul.mubr.bf16.gmra.mrb[108].mxu1 %v2714_v62  ;;  %v555_v11 = vsel %vm299_vm8, 1.0, %v10076_v59  ;;  %v2601_v17 = vadd.f32 %v2345_v22, %v1737_v31  ;;  %vm1163_vm2 = vcmp.eq.s32.totalorder %v10169_v28, %v8022_v50  ;;  %v1411_v57 = vsel %vm1155_vm4, 1.0, %v10076_v59 }
 0x255   :  { %vm2019_vm9 = vcmp.eq.s32.totalorder %v10170_v48, %v8022_v50  ;;  %v1419_v25 = vsel %vm1163_vm2, 1.0, %v10076_v59  ;;  %v1667_v62 = vadd.f32 %v1411_v57, %v547_v16  ;;  %vm2027_vm10 = vcmp.eq.s32.totalorder %v10171_v60, %v8022_v50  ;;  %v10215_v16 = vld [vmem:[#allocation109_spill] sm:$0xff]  ;;  %v10216_v57 = vld [vmem:[#allocation110_spill] sm:$0xff] }
 0x256   :  { %v2275_v53 = vsel %vm2019_vm9, 1.0, %v10076_v59  ;;  %v2753_v49 = vpack.c.bf16 %v2601_v17, %v2593_v54  ;;  %v1675_v39 = vadd.f32 %v1419_v25, %v555_v11  ;;  %v2283_v22 = vsel %vm2027_vm10, 1.0, %v10076_v59 }
 0x257   :  { %v4550_v31 = vadd.f32 %v8460_v41, %v8451_v6  ;;  %v2531_v33 = vadd.f32 %v2275_v53, %v1667_v62  ;;  %v4662_v27 = vadd.f32 %v8462_v13, %v8453_v0  ;;  %v4553_v44 = vadd.f32 %v8475_v29, %v8468_v46 }
 0x258   :  { %v4665_v56 = vadd.f32 %v10216_v57, %v10215_v16  ;;  %3783 = vmatprep.mubr.bf16.mxu0 %v2753_v49  ;;  %v2539_v9 = vadd.f32 %v2283_v22, %v1675_v39  ;;  %vm352_vm12 = vcmp.eq.s32.totalorder %v10201_v26, %v9999_v18  ;;  %vm360_vm5 = vcmp.eq.s32.totalorder %v10202_v47, %v9999_v18  ;;  %v10219_v22 = vld [vmem:[#allocation13_spill] sm:$0xff]  ;;  %v10221_v16 = vld [vmem:[#allocation15_spill] sm:$0xff] }
 0x259   :  { %vm1216_vm11 = vcmp.eq.s32.totalorder %v10203_v8, %v9999_v18  ;;  %v8806_v6 = vadd.f32 %v4662_v27, %v4550_v31  ;;  %v608_v41 = vsel %vm352_vm12, 1.0, %v10076_v59  ;;  %v616_v13 = vsel %vm360_vm5, 1.0, %v10076_v59  ;;  %v10220_v31 = vld [vmem:[#allocation16_spill] sm:$0xff] }
 0x25a   :  { %v8808_v0 = vadd.f32 %v4665_v56, %v4553_v44  ;;  %v2723_v46 = vpack.c.bf16 %v2539_v9, %v2531_v33  ;;  %vm1224_vm13 = vcmp.eq.s32.totalorder %v10206_v14, %v9999_v18  ;;  %v1472_v29 = vsel %vm1216_vm11, 1.0, %v10076_v59 }
 0x25b   :  { %10217 = vst [vmem:[#allocation49_spill] sm:$0xff] %v8806_v6  ;;  %vm2080_vm14 = vcmp.eq.s32.totalorder %v10207_v52, %v9999_v18  ;;  %v1480_v39 = vsel %vm1224_vm13, 1.0, %v10076_v59  ;;  %v1728_v25 = vadd.f32 %v1472_v29, %v608_v41  ;;  %vm2088_vm0 = vcmp.eq.s32.totalorder %v10208_v15, %v9999_v18  ;;  %v10222_v41 = vld [vmem:[#allocation17_spill] sm:$0xff] }
 0x25c   :  { %10218 = vst [vmem:[#allocation106_spill] sm:$0xff] %v8808_v0  ;;  %v2336_v56 = vsel %vm2080_vm14, 1.0, %v10076_v59  ;;  %4461 = vmatprep.mubr.msk.bf16.mxu1 %vm3280_vm1, %v2723_v46  ;;  %v1736_v27 = vadd.f32 %v1480_v39, %v616_v13  ;;  %v2344_v9 = vsel %vm2088_vm0, 1.0, %v10076_v59  ;;  %vm290_vm3 = vcmp.eq.s32.totalorder %v10166_v40, %v8098_v30 }
 0x25d   :  { %vm298_vm6 = vcmp.eq.s32.totalorder %v10167_v7, %v8098_v30  ;;  %v2592_v44 = vadd.f32 %v2336_v56, %v1728_v25  ;;  %v546_v33 = vsel %vm290_vm3, 1.0, %v10076_v59  ;;  %vm1154_vm15 = vcmp.eq.s32.totalorder %v10168_v36, %v8098_v30  ;;  %v10223_v56 = vld [vmem:[#allocation8_spill] sm:$0xff] }
 0x25e   :  { %v554_v54 = vsel %vm298_vm6, 1.0, %v10076_v59  ;;  %v2600_v11 = vadd.f32 %v2344_v9, %v1736_v27  ;;  %vm1162_vm7 = vcmp.eq.s32.totalorder %v10169_v28, %v8098_v30  ;;  %v1410_v17 = vsel %vm1154_vm15, 1.0, %v10076_v59  ;;  %v8852_v46 = vpop.f32.mrb[36].mxu0  ;;  %v8854_v29 = vpop.f32.mrb[52].mxu1  ;;  %v10224_v27 = vld [vmem:[#allocation20_spill] sm:$0xff] }
 0x25f   :  { %vm2018_vm8 = vcmp.eq.s32.totalorder %v10170_v48, %v8098_v30  ;;  %v1418_v40 = vsel %vm1162_vm7, 1.0, %v10076_v59  ;;  %v1666_v7 = vadd.f32 %v1410_v17, %v546_v33  ;;  %vm2026_vm4 = vcmp.eq.s32.totalorder %v10171_v60, %v8098_v30  ;;  %v8861_v9 = vpop.f32.mrb[37].mxu0 }
 0x260   :  { %v2274_v62 = vsel %vm2018_vm8, 1.0, %v10076_v59  ;;  %v2752_v53 = vpack.c.bf16 %v2600_v11, %v2592_v44  ;;  %v1674_v49 = vadd.f32 %v1418_v40, %v554_v54  ;;  %v2282_v36 = vsel %vm2026_vm4, 1.0, %v10076_v59  ;;  %v8863_v44 = vpop.f32.mrb[53].mxu1  ;;  %v8867_v40 = vpop.f32.mrb[38].mxu0 }
 0x261   :  { %vm369_vm2 = vcmp.eq.s32.totalorder %v10219_v22, %v5388_v61  ;;  %v2530_v28 = vadd.f32 %v2274_v62, %v1666_v7  ;;  %vm377_vm9 = vcmp.eq.s32.totalorder %v10220_v31, %v5388_v61  ;;  %vm1233_vm10 = vcmp.eq.s32.totalorder %v10221_v16, %v5388_v61  ;;  %v8869_v7 = vpop.f32.mrb[54].mxu1 }
 0x262   :  { %v625_v48 = vsel %vm369_vm2, 1.0, %v10076_v59  ;;  %3784 = vmatmul.mubr.bf16.gmra.mrb[96].mxu0 %v2752_v53  ;;  %v2538_v60 = vadd.f32 %v2282_v36, %v1674_v49  ;;  %v633_v57 = vsel %vm377_vm9, 1.0, %v10076_v59  ;;  %vm1241_vm12 = vcmp.eq.s32.totalorder %v10222_v41, %v5388_v61  ;;  %10225 = vst [vmem:[#allocation24_spill] sm:$0xff] %v8869_v7  ;;  %v8877_v53 = vpop.f32.mrb[39].mxu0  ;;  %v8879_v49 = vpop.f32.mrb[55].mxu1 }
 0x263   :  { %v1489_v13 = vsel %vm1233_vm10, 1.0, %v10076_v59  ;;  %v1497_v39 = vsel %vm1241_vm12, 1.0, %v10076_v59  ;;  %vm2097_vm5 = vcmp.eq.s32.totalorder %v10223_v56, %v5388_v61  ;;  %vm2105_vm11 = vcmp.eq.s32.totalorder %v10224_v27, %v5388_v61  ;;  %10226 = vst [vmem:[#allocation52_spill] sm:$0xff] %v8879_v49 }
 0x264   :  { %v1745_v25 = vadd.f32 %v1489_v13, %v625_v48  ;;  %v2722_v33 = vpack.c.bf16 %v2538_v60, %v2530_v28  ;;  %v1753_v54 = vadd.f32 %v1497_v39, %v633_v57  ;;  %v2353_v11 = vsel %vm2097_vm5, 1.0, %v10076_v59 }
 0x265   :  { %v2361_v17 = vsel %vm2105_vm11, 1.0, %v10076_v59  ;;  %vm307_vm13 = vcmp.eq.s32.totalorder %v7582_v34, %v8022_v50  ;;  %vm315_vm14 = vcmp.eq.s32.totalorder %v10174_v3, %v8022_v50  ;;  %vm1171_vm0 = vcmp.eq.s32.totalorder %v10175_v1, %v8022_v50 }
 0x266   :  { %v2609_v62 = vadd.f32 %v2353_v11, %v1745_v25  ;;  %3913 = vmatmul.mubr.bf16.gmra.mrb[112].mxu1 %v2722_v33  ;;  %v2617_v36 = vadd.f32 %v2361_v17, %v1753_v54  ;;  %v563_v28 = vsel %vm307_vm13, 1.0, %v10076_v59  ;;  %v571_v48 = vsel %vm315_vm14, 1.0, %v10076_v59 }
 0x267   :  { %vm1179_vm3 = vcmp.eq.s32.totalorder %v10176_v51, %v8022_v50  ;;  %v1427_v60 = vsel %vm1171_vm0, 1.0, %v10076_v59  ;;  %vm2035_vm6 = vcmp.eq.s32.totalorder %v10177_v5, %v8022_v50  ;;  %vm2043_vm15 = vcmp.eq.s32.totalorder %v10178_v24, %v8022_v50 }
 0x268   :  { %v1435_v57 = vsel %vm1179_vm3, 1.0, %v10076_v59  ;;  %v2761_v13 = vpack.c.bf16 %v2617_v36, %v2609_v62  ;;  %v1683_v39 = vadd.f32 %v1427_v60, %v563_v28  ;;  %v2291_v33 = vsel %vm2035_vm6, 1.0, %v10076_v59 }
 0x269   :  { %v1691_v25 = vadd.f32 %v1435_v57, %v571_v48  ;;  %v2299_v54 = vsel %vm2043_vm15, 1.0, %v10076_v59  ;;  %vm368_vm7 = vcmp.eq.s32.totalorder %v10219_v22, %v9999_v18  ;;  %vm376_vm8 = vcmp.eq.s32.totalorder %v10220_v31, %v9999_v18 }
 0x26a   :  { %vm1232_vm4 = vcmp.eq.s32.totalorder %v10221_v16, %v9999_v18  ;;  %3791 = vmatprep.mubr.bf16.mxu0 %v2761_v13  ;;  %v2547_v11 = vadd.f32 %v2291_v33, %v1683_v39  ;;  %v624_v62 = vsel %vm368_vm7, 1.0, %v10076_v59  ;;  %v632_v36 = vsel %vm376_vm8, 1.0, %v10076_v59 }
 0x26b   :  { %v2555_v17 = vadd.f32 %v2299_v54, %v1691_v25  ;;  %vm1240_vm2 = vcmp.eq.s32.totalorder %v10222_v41, %v9999_v18  ;;  %v1488_v28 = vsel %vm1232_vm4, 1.0, %v10076_v59  ;;  %vm2096_vm9 = vcmp.eq.s32.totalorder %v10223_v56, %v9999_v18 }
 0x26c   :  { %vm2104_vm10 = vcmp.eq.s32.totalorder %v10224_v27, %v9999_v18  ;;  %v1496_v60 = vsel %vm1240_vm2, 1.0, %v10076_v59  ;;  %v1744_v57 = vadd.f32 %v1488_v28, %v624_v62  ;;  %v2352_v13 = vsel %vm2096_vm9, 1.0, %v10076_v59 }
 0x26d   :  { %v2731_v48 = vpack.c.bf16 %v2555_v17, %v2547_v11  ;;  %v1752_v39 = vadd.f32 %v1496_v60, %v632_v36  ;;  %v2360_v25 = vsel %vm2104_vm10, 1.0, %v10076_v59  ;;  %vm306_vm12 = vcmp.eq.s32.totalorder %v7582_v34, %v8098_v30  ;;  %v10227_v60 = vld [vmem:[#allocation23_spill] sm:$0xff] }
 0x26e   :  { %vm314_vm5 = vcmp.eq.s32.totalorder %v10174_v3, %v8098_v30  ;;  %v2608_v33 = vadd.f32 %v2352_v13, %v1744_v57  ;;  %v562_v54 = vsel %vm306_vm12, 1.0, %v10076_v59  ;;  %vm1170_vm11 = vcmp.eq.s32.totalorder %v10175_v1, %v8098_v30  ;;  %v10228_v57 = vld [vmem:[#allocation18_spill] sm:$0xff]  ;;  %v10229_v13 = vld [vmem:[#allocation27_spill] sm:$0xff] }
 0x26f   :  { %4462 = vmatprep.mubr.msk.bf16.mxu1 %vm3280_vm1, %v2731_v48  ;;  %v570_v11 = vsel %vm314_vm5, 1.0, %v10076_v59  ;;  %v2616_v17 = vadd.f32 %v2360_v25, %v1752_v39  ;;  %vm1178_vm13 = vcmp.eq.s32.totalorder %v10176_v51, %v8098_v30  ;;  %v1426_v62 = vsel %vm1170_vm11, 1.0, %v10076_v59  ;;  %v10230_v25 = vld [vmem:[#allocation30_spill] sm:$0xff] }
 0x270   :  { %vm2034_vm14 = vcmp.eq.s32.totalorder %v10177_v5, %v8098_v30  ;;  %v1434_v34 = vsel %vm1178_vm13, 1.0, %v10076_v59  ;;  %v1682_v3 = vadd.f32 %v1426_v62, %v562_v54  ;;  %vm2042_vm0 = vcmp.eq.s32.totalorder %v10178_v24, %v8098_v30  ;;  %v10232_v62 = vld [vmem:[#allocation32_spill] sm:$0xff] }
 0x271   :  { %v2290_v36 = vsel %vm2034_vm14, 1.0, %v10076_v59  ;;  %v2760_v28 = vpack.c.bf16 %v2616_v17, %v2608_v33  ;;  %v1690_v48 = vadd.f32 %v1434_v34, %v570_v11  ;;  %v2298_v1 = vsel %vm2042_vm0, 1.0, %v10076_v59  ;;  %v10231_v17 = vld [vmem:[#allocation10_spill] sm:$0xff] }
 0x272   :  { %vm385_vm3 = vcmp.eq.s32.totalorder %v10227_v60, %v5388_v61  ;;  %v2546_v51 = vadd.f32 %v2290_v36, %v1682_v3  ;;  %vm393_vm6 = vcmp.eq.s32.totalorder %v10228_v57, %v5388_v61  ;;  %vm1249_vm15 = vcmp.eq.s32.totalorder %v10229_v13, %v5388_v61 }
 0x273   :  { %v641_v5 = vsel %vm385_vm3, 1.0, %v10076_v59  ;;  %3792 = vmatmul.mubr.bf16.gmra.mrb[100].mxu0 %v2760_v28  ;;  %v2554_v24 = vadd.f32 %v2298_v1, %v1690_v48  ;;  %v649_v39 = vsel %vm393_vm6, 1.0, %v10076_v59  ;;  %vm1257_vm7 = vcmp.eq.s32.totalorder %v10230_v25, %v5388_v61  ;;  %v8948_v48 = vpop.f32.mrb[40].mxu0  ;;  %v8950_v1 = vpop.f32.mrb[56].mxu1 }
 0x274   :  { %v1505_v33 = vsel %vm1249_vm15, 1.0, %v10076_v59  ;;  %v1513_v54 = vsel %vm1257_vm7, 1.0, %v10076_v59  ;;  %vm2113_vm8 = vcmp.eq.s32.totalorder %v10231_v17, %v5388_v61  ;;  %vm2121_vm4 = vcmp.eq.s32.totalorder %v10232_v62, %v5388_v61  ;;  %10233 = vst [vmem:[#allocation54_spill] sm:$0xff] %v8948_v48  ;;  %10234 = vst [vmem:[#allocation37_spill] sm:$0xff] %v8950_v1 }
 0x275   :  { %v1761_v11 = vadd.f32 %v1505_v33, %v641_v5  ;;  %v2730_v34 = vpack.c.bf16 %v2554_v24, %v2546_v51  ;;  %v1769_v3 = vadd.f32 %v1513_v54, %v649_v39  ;;  %v2369_v36 = vsel %vm2113_vm8, 1.0, %v10076_v59  ;;  %v8958_v51 = vpop.f32.mrb[41].mxu0  ;;  %v8960_v5 = vpop.f32.mrb[57].mxu1 }
 0x276   :  { %v2377_v28 = vsel %vm2121_vm4, 1.0, %v10076_v59  ;;  %vm323_vm2 = vcmp.eq.s32.totalorder %v10180_v63, %v8022_v50  ;;  %vm331_vm9 = vcmp.eq.s32.totalorder %v10181_v2, %v8022_v50  ;;  %vm1187_vm10 = vcmp.eq.s32.totalorder %v10182_v23, %v8022_v50  ;;  %10235 = vst [vmem:[#allocation60_spill] sm:$0xff] %v8958_v51  ;;  %10236 = vst [vmem:[#allocation111_spill] sm:$0xff] %v8960_v5  ;;  %v8966_v54 = vpop.f32.mrb[42].mxu0 }
 0x277   :  { %v2625_v0 = vadd.f32 %v2369_v36, %v1761_v11  ;;  %3921 = vmatmul.mubr.bf16.gmra.mrb[116].mxu1 %v2730_v34  ;;  %v2633_v24 = vadd.f32 %v2377_v28, %v1769_v3  ;;  %v579_v39 = vsel %vm323_vm2, 1.0, %v10076_v59  ;;  %v587_v33 = vsel %vm331_vm9, 1.0, %v10076_v59  ;;  %10237 = vst [vmem:[#allocation61_spill] sm:$0xff] %v8966_v54  ;;  %v8968_v11 = vpop.f32.mrb[58].mxu1  ;;  %v8976_v34 = vpop.f32.mrb[43].mxu0 }
 0x278   :  { %vm1195_vm12 = vcmp.eq.s32.totalorder %v10184_v37, %v8022_v50  ;;  %10238 = vst [vmem:[#allocation116_spill] sm:$0xff] %v8968_v11  ;;  %v1443_v36 = vsel %vm1187_vm10, 1.0, %v10076_v59  ;;  %vm2051_vm5 = vcmp.eq.s32.totalorder %v10185_v20, %v8022_v50  ;;  %vm2059_vm11 = vcmp.eq.s32.totalorder %v10186_v58, %v8022_v50  ;;  %10239 = vst [vmem:[#allocation118_spill] sm:$0xff] %v8976_v34  ;;  %v8978_v3 = vpop.f32.mrb[59].mxu1 }
 0x279   :  { %v1451_v6 = vsel %vm1195_vm12, 1.0, %v10076_v59  ;;  %v2769_v28 = vpack.c.bf16 %v2633_v24, %v2625_v0  ;;  %v1699_v5 = vadd.f32 %v1443_v36, %v579_v39  ;;  %v2307_v54 = vsel %vm2051_vm5, 1.0, %v10076_v59  ;;  %v10244_v36 = vld [vmem:[#allocation39_spill] sm:$0xff] }
 0x27a   :  { %v1707_v1 = vadd.f32 %v1451_v6, %v587_v33  ;;  %v2315_v11 = vsel %vm2059_vm11, 1.0, %v10076_v59  ;;  %v4556_v51 = vadd.f32 %v8559_v35, %v8553_v21  ;;  %v4668_v48 = vadd.f32 %v8561_v38, %v8555_v43 }
 0x27b   :  { %v4559_v49 = vadd.f32 %v8578_v10, %v8568_v42  ;;  %3799 = vmatprep.mubr.bf16.mxu0 %v2769_v28  ;;  %v2563_v34 = vadd.f32 %v2307_v54, %v1699_v5  ;;  %v4671_v0 = vadd.f32 %v8580_v55, %v8570_v19  ;;  %vm384_vm13 = vcmp.eq.s32.totalorder %v10227_v60, %v9999_v18  ;;  %v10242_v54 = vld [vmem:[#allocation34_spill] sm:$0xff] }
 0x27c   :  { %v2571_v7 = vadd.f32 %v2315_v11, %v1707_v1  ;;  %v8992_v6 = vadd.f32 %v4668_v48, %v4556_v51  ;;  %vm392_vm14 = vcmp.eq.s32.totalorder %v10228_v57, %v9999_v18  ;;  %v640_v21 = vsel %vm384_vm13, 1.0, %v10076_v59  ;;  %v10243_v11 = vld [vmem:[#allocation22_spill] sm:$0xff] }
 0x27d   :  { %vm1248_vm0 = vcmp.eq.s32.totalorder %v10229_v13, %v9999_v18  ;;  %v8999_v35 = vadd.f32 %v4671_v0, %v4559_v49  ;;  %v648_v38 = vsel %vm392_vm14, 1.0, %v10076_v59  ;;  %vm1256_vm3 = vcmp.eq.s32.totalorder %v10230_v25, %v9999_v18  ;;  %v10245_v0 = vld [vmem:[#allocation41_spill] sm:$0xff] }
 0x27e   :  { %10240 = vst [vmem:[#allocation51_spill] sm:$0xff] %v8992_v6  ;;  %v2739_v43 = vpack.c.bf16 %v2571_v7, %v2563_v34  ;;  %v1504_v42 = vsel %vm1248_vm0, 1.0, %v10076_v59  ;;  %v1512_v19 = vsel %vm1256_vm3, 1.0, %v10076_v59  ;;  %vm2112_vm6 = vcmp.eq.s32.totalorder %v10231_v17, %v9999_v18  ;;  %v10256_v6 = vld [vmem:[#allocation86_spill] sm:$0xff] }
 0x27f   :  { %10241 = vst [vmem:[#allocation9_spill] sm:$0xff] %v8999_v35  ;;  %vm2120_vm15 = vcmp.eq.s32.totalorder %v10232_v62, %v9999_v18  ;;  %v1760_v10 = vadd.f32 %v1504_v42, %v640_v21  ;;  %v1768_v55 = vadd.f32 %v1512_v19, %v648_v38  ;;  %v2368_v7 = vsel %vm2112_vm6, 1.0, %v10076_v59  ;;  %v10247_v38 = vld [vmem:[#allocation45_spill] sm:$0xff] }
 0x280   :  { %4463 = vmatprep.mubr.msk.bf16.mxu1 %vm3280_vm1, %v2739_v43  ;;  %v2376_v49 = vsel %vm2120_vm15, 1.0, %v10076_v59  ;;  %vm322_vm7 = vcmp.eq.s32.totalorder %v10180_v63, %v8098_v30  ;;  %vm330_vm8 = vcmp.eq.s32.totalorder %v10181_v2, %v8098_v30  ;;  %vm1186_vm4 = vcmp.eq.s32.totalorder %v10182_v23, %v8098_v30  ;;  %v10246_v43 = vld [vmem:[#allocation33_spill] sm:$0xff] }
 0x281   :  { %vm1194_vm2 = vcmp.eq.s32.totalorder %v10184_v37, %v8098_v30  ;;  %v2624_v48 = vadd.f32 %v2368_v7, %v1760_v10  ;;  %v2632_v1 = vadd.f32 %v2376_v49, %v1768_v55  ;;  %v578_v51 = vsel %vm322_vm7, 1.0, %v10076_v59 }
 0x282   :  { %v586_v5 = vsel %vm330_vm8, 1.0, %v10076_v59  ;;  %v1442_v24 = vsel %vm1186_vm4, 1.0, %v10076_v59  ;;  %v1450_v39 = vsel %vm1194_vm2, 1.0, %v10076_v59  ;;  %vm2050_vm9 = vcmp.eq.s32.totalorder %v10185_v20, %v8098_v30 }
 0x283   :  { %vm2058_vm10 = vcmp.eq.s32.totalorder %v10186_v58, %v8098_v30  ;;  %v2768_v63 = vpack.c.bf16 %v2632_v1, %v2624_v48  ;;  %v1698_v2 = vadd.f32 %v1442_v24, %v578_v51  ;;  %v1706_v23 = vadd.f32 %v1450_v39, %v586_v5 }
 0x284   :  { %v2306_v37 = vsel %vm2050_vm9, 1.0, %v10076_v59  ;;  %v2314_v33 = vsel %vm2058_vm10, 1.0, %v10076_v59  ;;  %vm401_vm12 = vcmp.eq.s32.totalorder %v10242_v54, %v5388_v61  ;;  %vm409_vm5 = vcmp.eq.s32.totalorder %v10243_v11, %v5388_v61 }
 0x285   :  { %vm1265_vm11 = vcmp.eq.s32.totalorder %v10244_v36, %v5388_v61  ;;  %3800 = vmatmul.mubr.bf16.gmra.mrb[104].mxu0 %v2768_v63  ;;  %v2562_v20 = vadd.f32 %v2306_v37, %v1698_v2  ;;  %v2570_v34 = vadd.f32 %v2314_v33, %v1706_v23  ;;  %v657_v58 = vsel %vm401_vm12, 1.0, %v10076_v59  ;;  %v9053_v48 = vpop.f32.mrb[44].mxu0  ;;  %v9055_v1 = vpop.f32.mrb[60].mxu1  ;;  %v10248_v23 = vld [vmem:[#allocation108_spill] sm:$0xff] }
 0x286   :  { %v665_v28 = vsel %vm409_vm5, 1.0, %v10076_v59  ;;  %vm1273_vm13 = vcmp.eq.s32.totalorder %v10245_v0, %v5388_v61  ;;  %v1521_v21 = vsel %vm1265_vm11, 1.0, %v10076_v59  ;;  %vm2129_vm14 = vcmp.eq.s32.totalorder %v10246_v43, %v5388_v61  ;;  %v9061_v24 = vpop.f32.mrb[45].mxu0  ;;  %v9063_v39 = vpop.f32.mrb[61].mxu1 }
 0x287   :  { %vm2137_vm0 = vcmp.eq.s32.totalorder %v10247_v38, %v5388_v61  ;;  %v2738_v42 = vpack.c.bf16 %v2570_v34, %v2562_v20  ;;  %v1529_v19 = vsel %vm1273_vm13, 1.0, %v10076_v59  ;;  %v1777_v10 = vadd.f32 %v1521_v21, %v657_v58  ;;  %v9070_v37 = vpop.f32.mrb[46].mxu0  ;;  %v9072_v33 = vpop.f32.mrb[62].mxu1  ;;  %v10249_v58 = vld [vmem:[#allocation93_spill] sm:$0xff] }
 0x288   :  { %v2385_v55 = vsel %vm2129_vm14, 1.0, %v10076_v59  ;;  %v1785_v7 = vadd.f32 %v1529_v19, %v665_v28  ;;  %v2393_v49 = vsel %vm2137_vm0, 1.0, %v10076_v59  ;;  %vm339_vm3 = vcmp.eq.s32.totalorder %v10189_v12, %v8022_v50  ;;  %v9078_v21 = vpop.f32.mrb[47].mxu0 }
 0x289   :  { %vm347_vm6 = vcmp.eq.s32.totalorder %v10190_v45, %v8022_v50  ;;  %3929 = vmatmul.mubr.bf16.gmra.mrb[120].mxu1 %v2738_v42  ;;  %v2641_v61 = vadd.f32 %v2385_v55, %v1777_v10  ;;  %v595_v51 = vsel %vm339_vm3, 1.0, %v10076_v59  ;;  %vm1203_vm15 = vcmp.eq.s32.totalorder %v10191_v32, %v8022_v50  ;;  %v9080_v42 = vpop.f32.mrb[63].mxu1 }
 0x28a   :  { %v603_v5 = vsel %vm347_vm6, 1.0, %v10076_v59  ;;  %v2649_v63 = vadd.f32 %v2393_v49, %v1785_v7  ;;  %vm1211_vm7 = vcmp.eq.s32.totalorder %v10196_v4, %v8022_v50  ;;  %v1459_v2 = vsel %vm1203_vm15, 1.0, %v10076_v59 }
 0x28b   :  { %vm2067_vm8 = vcmp.eq.s32.totalorder %v10248_v23, %v8022_v50  ;;  %v1467_v20 = vsel %vm1211_vm7, 1.0, %v10076_v59  ;;  %v1715_v34 = vadd.f32 %v1459_v2, %v595_v51  ;;  %vm2075_vm4 = vcmp.eq.s32.totalorder %v10249_v58, %v8022_v50 }
 0x28c   :  { %v2323_v28 = vsel %vm2067_vm8, 1.0, %v10076_v59  ;;  %v2777_v19 = vpack.c.bf16 %v2649_v63, %v2641_v61  ;;  %v1723_v10 = vadd.f32 %v1467_v20, %v603_v5  ;;  %v2331_v55 = vsel %vm2075_vm4, 1.0, %v10076_v59 }
 0x28d   :  { %vm400_vm2 = vcmp.eq.s32.totalorder %v10242_v54, %v9999_v18  ;;  %v2579_v7 = vadd.f32 %v2323_v28, %v1715_v34  ;;  %vm408_vm9 = vcmp.eq.s32.totalorder %v10243_v11, %v9999_v18  ;;  %vm1264_vm10 = vcmp.eq.s32.totalorder %v10244_v36, %v9999_v18 }
 0x28e   :  { %v656_v49 = vsel %vm400_vm2, 1.0, %v10076_v59  ;;  %3807 = vmatprep.mubr.bf16.mxu0 %v2777_v19  ;;  %v2587_v51 = vadd.f32 %v2331_v55, %v1723_v10  ;;  %v664_v2 = vsel %vm408_vm9, 1.0, %v10076_v59  ;;  %vm1272_vm12 = vcmp.eq.s32.totalorder %v10245_v0, %v9999_v18  ;;  %v9101_v10 = vpop.f32.mrb[64].mxu1  ;;  %v9103_v55 = vpop.f32.mrb[48].mxu0 }
 0x28f   :  { %v1520_v61 = vsel %vm1264_vm10, 1.0, %v10076_v59  ;;  %v1528_v5 = vsel %vm1272_vm12, 1.0, %v10076_v59  ;;  %vm2128_vm5 = vcmp.eq.s32.totalorder %v10246_v43, %v9999_v18  ;;  %vm2136_vm11 = vcmp.eq.s32.totalorder %v10247_v38, %v9999_v18  ;;  %10250 = vst [vmem:[#allocation62_spill] sm:$0xff] %v9103_v55  ;;  %v9111_v18 = vpop.f32.mrb[65].mxu1 }
 0x290   :  { %v1776_v63 = vadd.f32 %v1520_v61, %v656_v49  ;;  %v2747_v20 = vpack.c.bf16 %v2587_v51, %v2579_v7  ;;  %v1784_v34 = vadd.f32 %v1528_v5, %v664_v2  ;;  %v2384_v28 = vsel %vm2128_vm5, 1.0, %v10076_v59  ;;  %v9113_v7 = vpop.f32.mrb[49].mxu0 }
 0x291   :  { %v2392_v19 = vsel %vm2136_vm11, 1.0, %v10076_v59  ;;  %vm338_vm13 = vcmp.eq.s32.totalorder %v10189_v12, %v8098_v30  ;;  %vm346_vm14 = vcmp.eq.s32.totalorder %v10190_v45, %v8098_v30  ;;  %vm1202_vm0 = vcmp.eq.s32.totalorder %v10191_v32, %v8098_v30  ;;  %10251 = vst [vmem:[#allocation26_spill] sm:$0xff] %v9113_v7  ;;  %v9120_v12 = vpop.f32.mrb[66].mxu1  ;;  %v9122_v45 = vpop.f32.mrb[50].mxu0 }
 0x292   :  { %v2640_v35 = vadd.f32 %v2384_v28, %v1776_v63  ;;  %4464 = vmatprep.mubr.msk.bf16.mxu1 %vm3280_vm1, %v2747_v20  ;;  %v2648_v49 = vadd.f32 %v2392_v19, %v1784_v34  ;;  %v594_v51 = vsel %vm338_vm13, 1.0, %v10076_v59  ;;  %v602_v2 = vsel %vm346_vm14, 1.0, %v10076_v59  ;;  %10252 = vst [vmem:[#allocation66_spill] sm:$0xff] %v9120_v12  ;;  %10253 = vst [vmem:[#allocation71_spill] sm:$0xff] %v9122_v45  ;;  %v9130_v5 = vpop.f32.mrb[67].mxu1  ;;  %v9132_v63 = vpop.f32.mrb[51].mxu0 }
 0x293   :  { %vm1210_vm3 = vcmp.eq.s32.totalorder %v10196_v4, %v8098_v30  ;;  %v1458_v32 = vsel %vm1202_vm0, 1.0, %v10076_v59  ;;  %vm2066_vm6 = vcmp.eq.s32.totalorder %v10248_v23, %v8098_v30  ;;  %vm2074_vm15 = vcmp.eq.s32.totalorder %v10249_v58, %v8098_v30  ;;  %10254 = vst [vmem:[#allocation40_spill] sm:$0xff] %v9130_v5  ;;  %10255 = vst [vmem:[#allocation75_spill] sm:$0xff] %v9132_v63  ;;  %v10257_v63 = vld [vmem:[#allocation89_spill] sm:$0xff]  ;;  %v10258_v5 = vld [vmem:[#allocation31_spill] sm:$0xff] }
 0x294   :  { %v1466_v61 = vsel %vm1210_vm3, 1.0, %v10076_v59  ;;  %v2776_v20 = vpack.c.bf16 %v2648_v49, %v2640_v35  ;;  %v1714_v4 = vadd.f32 %v1458_v32, %v594_v51  ;;  %v2322_v28 = vsel %vm2066_vm6, 1.0, %v10076_v59  ;;  %v10259_v12 = vld [vmem:[#allocation91_spill] sm:$0xff] }
 0x295   :  { %v1722_v34 = vadd.f32 %v1466_v61, %v602_v2  ;;  %v2330_v19 = vsel %vm2074_vm15, 1.0, %v10076_v59  ;;  %vm355_vm7 = vcmp.eq.s32.totalorder %v10201_v26, %v8022_v50  ;;  %vm363_vm8 = vcmp.eq.s32.totalorder %v10202_v47, %v8022_v50 }
 0x296   :  { %vm1219_vm4 = vcmp.eq.s32.totalorder %v10203_v8, %v8022_v50  ;;  %3808 = vmatmul.mubr.bf16.gmra.mrb[108].mxu0 %v2776_v20  ;;  %v2578_v23 = vadd.f32 %v2322_v28, %v1714_v4  ;;  %v611_v35 = vsel %vm355_vm7, 1.0, %v10076_v59  ;;  %v619_v49 = vsel %vm363_vm8, 1.0, %v10076_v59 }
 0x297   :  { %v2586_v58 = vadd.f32 %v2330_v19, %v1722_v34  ;;  %vm1227_vm2 = vcmp.eq.s32.totalorder %v10206_v14, %v8022_v50  ;;  %v1475_v51 = vsel %vm1219_vm4, 1.0, %v10076_v59  ;;  %vm2083_vm9 = vcmp.eq.s32.totalorder %v10207_v52, %v8022_v50  ;;  %v9153_v4 = vpop.f32.mrb[68].mxu1  ;;  %v9155_v34 = vpop.f32.mrb[52].mxu0 }
 0x298   :  { %vm2091_vm10 = vcmp.eq.s32.totalorder %v10208_v15, %v8022_v50  ;;  %v1483_v32 = vsel %vm1227_vm2, 1.0, %v10076_v59  ;;  %v1731_v61 = vadd.f32 %v1475_v51, %v611_v35  ;;  %v2339_v20 = vsel %vm2083_vm9, 1.0, %v10076_v59  ;;  %v9162_v55 = vpop.f32.mrb[69].mxu1 }
 0x299   :  { %v2746_v2 = vpack.c.bf16 %v2586_v58, %v2578_v23  ;;  %v1739_v28 = vadd.f32 %v1483_v32, %v619_v49  ;;  %v2347_v19 = vsel %vm2091_vm10, 1.0, %v10076_v59  ;;  %v4562_v45 = vadd.f32 %v10257_v63, %v10256_v6  ;;  %v9164_v23 = vpop.f32.mrb[53].mxu0  ;;  %v9172_v35 = vpop.f32.mrb[70].mxu1 }
 0x29a   :  { %v4674_v7 = vadd.f32 %v10259_v12, %v10258_v5  ;;  %v2595_v58 = vadd.f32 %v2339_v20, %v1731_v61  ;;  %vm354_vm12 = vcmp.eq.s32.totalorder %v10201_v26, %v8098_v30  ;;  %vm362_vm5 = vcmp.eq.s32.totalorder %v10202_v47, %v8098_v30  ;;  %v9174_v6 = vpop.f32.mrb[54].mxu0  ;;  %v9180_v51 = vpop.f32.mrb[71].mxu1 }
 0x29b   :  { %3937 = vmatmul.mubr.bf16.gmra.mrb[124].mxu1 %v2746_v2  ;;  %vm1218_vm11 = vcmp.eq.s32.totalorder %v10203_v8, %v8098_v30  ;;  %10260 = vst [vmem:[#allocation55_spill] sm:$0xff] %v9174_v6  ;;  %v2603_v12 = vadd.f32 %v2347_v19, %v1739_v28  ;;  %v610_v63 = vsel %vm354_vm12, 1.0, %v10076_v59  ;;  %v618_v49 = vsel %vm362_vm5, 1.0, %v10076_v59  ;;  %v9182_v26 = vpop.f32.mrb[55].mxu0 }
 0x29c   :  { %v9176_v5 = vadd.f32 %v4674_v7, %v4562_v45  ;;  %10262 = vst [vmem:[#allocation56_spill] sm:$0xff] %v9182_v26  ;;  %vm1226_vm13 = vcmp.eq.s32.totalorder %v10206_v14, %v8098_v30  ;;  %v1474_v47 = vsel %vm1218_vm11, 1.0, %v10076_v59  ;;  %vm2082_vm14 = vcmp.eq.s32.totalorder %v10207_v52, %v8098_v30  ;;  %v10268_v26 = vld [vmem:[#allocation19_spill] sm:$0xff] }
 0x29d   :  { %vm2090_vm0 = vcmp.eq.s32.totalorder %v10208_v15, %v8098_v30  ;;  %v2755_v8 = vpack.c.bf16 %v2603_v12, %v2595_v58  ;;  %v1482_v7 = vsel %vm1226_vm13, 1.0, %v10076_v59  ;;  %v1730_v45 = vadd.f32 %v1474_v47, %v610_v63 }
 0x29e   :  { %10261 = vst [vmem:[#allocation63_spill] sm:$0xff] %v9176_v5  ;;  %v2338_v2 = vsel %vm2082_vm14, 1.0, %v10076_v59  ;;  %v1738_v32 = vadd.f32 %v1482_v7, %v618_v49  ;;  %v2346_v61 = vsel %vm2090_vm0, 1.0, %v10076_v59  ;;  %vm371_vm3 = vcmp.eq.s32.totalorder %v10219_v22, %v8022_v50 }
 0x29f   :  { %vm379_vm6 = vcmp.eq.s32.totalorder %v10220_v31, %v8022_v50  ;;  %4465 = vmatprep.mubr.msk.bf16.mxu1 %vm3280_vm1, %v2755_v8  ;;  %v2594_v14 = vadd.f32 %v2338_v2, %v1730_v45  ;;  %v627_v52 = vsel %vm371_vm3, 1.0, %v10076_v59  ;;  %vm1235_vm15 = vcmp.eq.s32.totalorder %v10221_v16, %v8022_v50 }
 0x2a0   :  { %v635_v15 = vsel %vm379_vm6, 1.0, %v10076_v59  ;;  %v2602_v20 = vadd.f32 %v2346_v61, %v1738_v32  ;;  %vm1243_vm7 = vcmp.eq.s32.totalorder %v10222_v41, %v8022_v50  ;;  %v1491_v28 = vsel %vm1235_vm15, 1.0, %v10076_v59  ;;  %v9208_v19 = vpop.f32.mrb[72].mxu1  ;;  %v9210_v58 = vpop.f32.mrb[56].mxu0  ;;  %v10265_v32 = vld [vmem:[#allocation46_spill] sm:$0xff]  ;;  %v10266_v61 = vld [vmem:[#allocation21_spill] sm:$0xff] }
 0x2a1   :  { %vm2099_vm8 = vcmp.eq.s32.totalorder %v10223_v56, %v8022_v50  ;;  %10263 = vst [vmem:[#allocation57_spill] sm:$0xff] %v9208_v19  ;;  %10264 = vst [vmem:[#allocation53_spill] sm:$0xff] %v9210_v58  ;;  %v1499_v12 = vsel %vm1243_vm7, 1.0, %v10076_v59  ;;  %v1747_v63 = vadd.f32 %v1491_v28, %v627_v52  ;;  %vm2107_vm4 = vcmp.eq.s32.totalorder %v10224_v27, %v8022_v50  ;;  %v9216_v47 = vpop.f32.mrb[73].mxu1  ;;  %v9218_v8 = vpop.f32.mrb[57].mxu0  ;;  %v10267_v28 = vld [vmem:[#allocation96_spill] sm:$0xff] }
 0x2a2   :  { %v2355_v49 = vsel %vm2099_vm8, 1.0, %v10076_v59  ;;  %v2754_v7 = vpack.c.bf16 %v2602_v20, %v2594_v14  ;;  %v1755_v45 = vadd.f32 %v1499_v12, %v635_v15  ;;  %v2363_v2 = vsel %vm2107_vm4, 1.0, %v10076_v59  ;;  %v9223_v58 = vpop.f32.mrb[74].mxu1  ;;  %v9225_v19 = vpop.f32.mrb[58].mxu0 }
 0x2a3   :  { %v4565_v5 = vadd.f32 %v10266_v61, %v10265_v32  ;;  %v2611_v52 = vadd.f32 %v2355_v49, %v1747_v63  ;;  %v4677_v6 = vadd.f32 %v10268_v26, %v10267_v28  ;;  %vm370_vm2 = vcmp.eq.s32.totalorder %v10219_v22, %v8098_v30  ;;  %v9233_v14 = vpop.f32.mrb[75].mxu1  ;;  %v9235_v15 = vpop.f32.mrb[59].mxu0 }
 0x2a4   :  { %vm378_vm9 = vcmp.eq.s32.totalorder %v10220_v31, %v8098_v30  ;;  %3945 = vmatmul.mubr.bf16.gmra.mrb[128].mxu1 %v2754_v7  ;;  %v2619_v20 = vadd.f32 %v2363_v2, %v1755_v45  ;;  %v626_v12 = vsel %vm370_vm2, 1.0, %v10076_v59  ;;  %vm1234_vm10 = vcmp.eq.s32.totalorder %v10221_v16, %v8098_v30 }
 0x2a5   :  { %v634_v32 = vsel %vm378_vm9, 1.0, %v10076_v59  ;;  %v9241_v26 = vadd.f32 %v4677_v6, %v4565_v5  ;;  %vm1242_vm12 = vcmp.eq.s32.totalorder %v10222_v41, %v8098_v30  ;;  %v1490_v22 = vsel %vm1234_vm10, 1.0, %v10076_v59 }
 0x2a6   :  { %vm2098_vm5 = vcmp.eq.s32.totalorder %v10223_v56, %v8098_v30  ;;  %v2763_v31 = vpack.c.bf16 %v2619_v20, %v2611_v52  ;;  %v1498_v63 = vsel %vm1242_vm12, 1.0, %v10076_v59  ;;  %v1746_v49 = vadd.f32 %v1490_v22, %v626_v12 }
 0x2a7   :  { %10269 = vst [vmem:[#allocation64_spill] sm:$0xff] %v9241_v26  ;;  %vm2106_vm11 = vcmp.eq.s32.totalorder %v10224_v27, %v8098_v30  ;;  %v1754_v7 = vadd.f32 %v1498_v63, %v634_v32  ;;  %v2354_v16 = vsel %vm2098_vm5, 1.0, %v10076_v59  ;;  %vm387_vm13 = vcmp.eq.s32.totalorder %v10227_v60, %v8022_v50 }
 0x2a8   :  { %v2362_v6 = vsel %vm2106_vm11, 1.0, %v10076_v59  ;;  %4466 = vmatprep.mubr.msk.bf16.mxu1 %vm3280_vm1, %v2763_v31  ;;  %v2610_v41 = vadd.f32 %v2354_v16, %v1746_v49  ;;  %vm395_vm14 = vcmp.eq.s32.totalorder %v10228_v57, %v8022_v50  ;;  %v643_v56 = vsel %vm387_vm13, 1.0, %v10076_v59 }
 0x2a9   :  { %vm1251_vm0 = vcmp.eq.s32.totalorder %v10229_v13, %v8022_v50  ;;  %v9261_v27 = vpop.f32.mrb[76].mxu1  ;;  %v9263_v5 = vpop.f32.mrb[60].mxu0  ;;  %v2618_v45 = vadd.f32 %v2362_v6, %v1754_v7  ;;  %v651_v2 = vsel %vm395_vm14, 1.0, %v10076_v59  ;;  %vm1259_vm3 = vcmp.eq.s32.totalorder %v10230_v25, %v8022_v50 }
 0x2aa   :  { %v1507_v61 = vsel %vm1251_vm0, 1.0, %v10076_v59  ;;  %v9269_v52 = vpop.f32.mrb[77].mxu1  ;;  %v9271_v28 = vpop.f32.mrb[61].mxu0  ;;  %v1515_v20 = vsel %vm1259_vm3, 1.0, %v10076_v59  ;;  %vm2115_vm6 = vcmp.eq.s32.totalorder %v10231_v17, %v8022_v50  ;;  %vm2123_vm15 = vcmp.eq.s32.totalorder %v10232_v62, %v8022_v50 }
 0x2ab   :  { %v1763_v12 = vadd.f32 %v1507_v61, %v643_v56  ;;  %v9278_v32 = vpop.f32.mrb[78].mxu1  ;;  %v9280_v22 = vpop.f32.mrb[62].mxu0  ;;  %v2762_v31 = vpack.c.bf16 %v2618_v45, %v2610_v41  ;;  %v1771_v63 = vadd.f32 %v1515_v20, %v651_v2  ;;  %v2371_v49 = vsel %vm2115_vm6, 1.0, %v10076_v59 }
 0x2ac   :  { %10270 = vst [vmem:[#allocation65_spill] sm:$0xff] %v9280_v22  ;;  %v2379_v7 = vsel %vm2123_vm15, 1.0, %v10076_v59  ;;  %v9284_v16 = vpop.f32.mrb[79].mxu1  ;;  %v9286_v6 = vpop.f32.mrb[63].mxu0  ;;  %vm386_vm7 = vcmp.eq.s32.totalorder %v10227_v60, %v8098_v30  ;;  %vm394_vm8 = vcmp.eq.s32.totalorder %v10228_v57, %v8098_v30  ;;  %vm1250_vm4 = vcmp.eq.s32.totalorder %v10229_v13, %v8098_v30 }
 0x2ad   :  { %10271 = vst [vmem:[#allocation69_spill] sm:$0xff] %v9284_v16  ;;  %10272 = vst [vmem:[#allocation67_spill] sm:$0xff] %v9286_v6  ;;  %v2627_v56 = vadd.f32 %v2371_v49, %v1763_v12  ;;  %3953 = vmatmul.mubr.bf16.gmra.mrb[132].mxu1 %v2762_v31  ;;  %v2635_v41 = vadd.f32 %v2379_v7, %v1771_v63  ;;  %v642_v45 = vsel %vm386_vm7, 1.0, %v10076_v59  ;;  %v650_v2 = vsel %vm394_vm8, 1.0, %v10076_v59  ;;  %v10281_v6 = vld [vmem:[#allocation36_spill] sm:$0xff] }
 0x2ae   :  { %vm1258_vm2 = vcmp.eq.s32.totalorder %v10230_v25, %v8098_v30  ;;  %v1506_v61 = vsel %vm1250_vm4, 1.0, %v10076_v59  ;;  %vm2114_vm9 = vcmp.eq.s32.totalorder %v10231_v17, %v8098_v30  ;;  %vm2122_vm10 = vcmp.eq.s32.totalorder %v10232_v62, %v8098_v30 }
 0x2af   :  { %v1514_v20 = vsel %vm1258_vm2, 1.0, %v10076_v59  ;;  %v2771_v60 = vpack.c.bf16 %v2635_v41, %v2627_v56  ;;  %v1762_v57 = vadd.f32 %v1506_v61, %v642_v45  ;;  %v2370_v12 = vsel %vm2114_vm9, 1.0, %v10076_v59 }
 0x2b0   :  { %v1770_v13 = vadd.f32 %v1514_v20, %v650_v2  ;;  %v2378_v31 = vsel %vm2122_vm10, 1.0, %v10076_v59  ;;  %vm403_vm12 = vcmp.eq.s32.totalorder %v10242_v54, %v8022_v50  ;;  %vm411_vm5 = vcmp.eq.s32.totalorder %v10243_v11, %v8022_v50 }
 0x2b1   :  { %vm1267_vm11 = vcmp.eq.s32.totalorder %v10244_v36, %v8022_v50  ;;  %v9312_v25 = vpop.f32.mrb[64].mxu0  ;;  %v9314_v17 = vpop.f32.mrb[80].mxu1  ;;  %4467 = vmatprep.mubr.msk.bf16.mxu1 %vm3280_vm1, %v2771_v60  ;;  %v2626_v62 = vadd.f32 %v2370_v12, %v1762_v57  ;;  %v659_v49 = vsel %vm403_vm12, 1.0, %v10076_v59  ;;  %v667_v7 = vsel %vm411_vm5, 1.0, %v10076_v59 }
 0x2b2   :  { %10273 = vst [vmem:[#allocation58_spill] sm:$0xff] %v9312_v25  ;;  %10274 = vst [vmem:[#allocation77_spill] sm:$0xff] %v9314_v17  ;;  %v2634_v63 = vadd.f32 %v2378_v31, %v1770_v13  ;;  %v9319_v56 = vpop.f32.mrb[65].mxu0  ;;  %v3852_v41 = vpop.f32.mrb[81].mxu1  ;;  %vm1275_vm13 = vcmp.eq.s32.totalorder %v10245_v0, %v8022_v50  ;;  %v1523_v45 = vsel %vm1267_vm11, 1.0, %v10076_v59  ;;  %vm2131_vm14 = vcmp.eq.s32.totalorder %v10246_v43, %v8022_v50  ;;  %v10278_v17 = vld [vmem:[#allocation28_spill] sm:$0xff] }
 0x2b3   :  { %10275 = vst [vmem:[#allocation38_spill] sm:$0xff] %v9319_v56  ;;  %vm2139_vm0 = vcmp.eq.s32.totalorder %v10247_v38, %v8022_v50  ;;  %v9328_v2 = vpop.f32.mrb[66].mxu0  ;;  %v9330_v61 = vpop.f32.mrb[82].mxu1  ;;  %v1531_v60 = vsel %vm1275_vm13, 1.0, %v10076_v59  ;;  %v1779_v57 = vadd.f32 %v1523_v45, %v659_v49  ;;  %v2387_v13 = vsel %vm2131_vm14, 1.0, %v10076_v59  ;;  %v10279_v56 = vld [vmem:[#allocation35_spill] sm:$0xff] }
 0x2b4   :  { %10276 = vst [vmem:[#allocation68_spill] sm:$0xff] %v9328_v2  ;;  %10277 = vst [vmem:[#allocation72_spill] sm:$0xff] %v9330_v61  ;;  %v2770_v20 = vpack.c.bf16 %v2634_v63, %v2626_v62  ;;  %v9334_v12 = vpop.f32.mrb[67].mxu0  ;;  %v3855_v31 = vpop.f32.mrb[83].mxu1  ;;  %v1787_v41 = vadd.f32 %v1531_v60, %v667_v7  ;;  %v2395_v26 = vsel %vm2139_vm0, 1.0, %v10076_v59  ;;  %v4568_v25 = vadd.f32 %v10279_v56, %v10278_v17  ;;  %v10280_v50 = vld [vmem:[#allocation25_spill] sm:$0xff] }
 0x2b5   :  { %v4680_v2 = vadd.f32 %v10281_v6, %v10280_v50  ;;  %v2643_v61 = vadd.f32 %v2387_v13, %v1779_v57  ;;  %v10282_v62 = vld [vmem:[#allocation98_spill] sm:$0xff]  ;;  %v10283_v63 = vld [vmem:[#allocation100_spill] sm:$0xff]  ;;  %v10284_v49 = vld [vmem:[#allocation59_spill] sm:$0xff]  ;;  %vm402_vm3 = vcmp.eq.s32.totalorder %v10242_v54, %v8098_v30  ;;  %vm410_vm6 = vcmp.eq.s32.totalorder %v10243_v11, %v8098_v30 }
 0x2b6   :  { %3961 = vmatmul.mubr.bf16.gmra.mrb[136].mxu1 %v2770_v20  ;;  %v4571_v22 = vadd.f32 %v10283_v63, %v10282_v62  ;;  %v10285_v45 = vld [vmem:[#allocation102_spill] sm:$0xff]  ;;  %v2651_v7 = vadd.f32 %v2395_v26, %v1787_v41  ;;  %v658_v17 = vsel %vm402_vm3, 1.0, %v10076_v59  ;;  %v666_v56 = vsel %vm410_vm6, 1.0, %v10076_v59  ;;  %v4009_v11 = vld [vmem:[%s9650_s2] sm:$0xff]  ;;  %v10286_v41 = vld [vmem:[#allocation24_spill] sm:$0xff] }
 0x2b7   :  { %v4683_v16 = vadd.f32 %v10285_v45, %v10284_v49  ;;  %v9347_v60 = vadd.f32 %v4680_v2, %v4568_v25  ;;  %vm1266_vm15 = vcmp.eq.s32.totalorder %v10244_v36, %v8098_v30  ;;  %vm1274_vm7 = vcmp.eq.s32.totalorder %v10245_v0, %v8098_v30  ;;  %v10287_v50 = vld [vmem:[#allocation52_spill] sm:$0xff] }
 0x2b8   :  { %v2779_v20 = vpack.c.bf16 %v2651_v7, %v2643_v61  ;;  %v1522_v54 = vsel %vm1266_vm15, 1.0, %v10076_v59  ;;  %v1530_v26 = vsel %vm1274_vm7, 1.0, %v10076_v59  ;;  %vm2130_vm8 = vcmp.eq.s32.totalorder %v10246_v43, %v8098_v30  ;;  %v10289_v7 = vld [vmem:[#allocation60_spill] sm:$0xff] }
 0x2b9   :  { %v9352_v6 = vadd.f32 %v4683_v16, %v4571_v22  ;;  %v4010_v22 = vld [vmem:[%s9650_s2 + $0x8] sm:$0xff]  ;;  %v9369_v36 = vpop.f32.mrb[68].mxu0  ;;  %v1778_v16 = vadd.f32 %v1522_v54, %v658_v17  ;;  %v1786_v0 = vadd.f32 %v1530_v26, %v666_v56  ;;  %vm2138_vm4 = vcmp.eq.s32.totalorder %v10247_v38, %v8098_v30  ;;  %v10291_v17 = vld [vmem:[#allocation111_spill] sm:$0xff]  ;;  %v10294_v54 = vld [vmem:[#allocation116_spill] sm:$0xff] }
 0x2ba   :  { %v2386_v25 = vsel %vm2130_vm8, 1.0, %v10076_v59  ;;  %v9374_v2 = vpop.f32.mrb[69].mxu0  ;;  %4468 = vmatprep.mubr.msk.bf16.mxu1 %vm3280_vm1, %v2779_v20  ;;  %v2394_v43 = vsel %vm2138_vm4, 1.0, %v10076_v59  ;;  %v4574_v61 = vadd.f32 %v8861_v9, %v8852_v46  ;;  %v4686_v57 = vadd.f32 %v8863_v44, %v8854_v29  ;;  %v10288_v59 = vld [vmem:[#allocation54_spill] sm:$0xff]  ;;  %v10290_v9 = vld [vmem:[#allocation37_spill] sm:$0xff] }
 0x2bb   :  { %v4577_v13 = vadd.f32 %v8877_v53, %v8867_v40  ;;  %v9384_v31 = vpop.f32.mrb[70].mxu0  ;;  %v2642_v30 = vadd.f32 %v2386_v25, %v1778_v16  ;;  %v2650_v38 = vadd.f32 %v2394_v43, %v1786_v0  ;;  %v4689_v62 = vadd.f32 %v10287_v50, %v10286_v41  ;;  %v10292_v44 = vld [vmem:[#allocation61_spill] sm:$0xff]  ;;  %v10293_v56 = vld [vmem:[#allocation118_spill] sm:$0xff] }
 0x2bc   :  { %v4930_v63 = vpack.c.bf16 %v4010_v22, %v4009_v11  ;;  %v4776_v49 = vpop.f32.mrb[71].mxu0  ;;  %v9388_v45 = vadd.f32 %v4686_v57, %v4574_v61  ;;  %v4580_v46 = vadd.f32 %v10289_v7, %v10288_v59  ;;  %v4692_v29 = vadd.f32 %v10291_v17, %v10290_v9  ;;  %v10303_v9 = vld [vmem:[#allocation50_spill] sm:$0xff] }
 0x2bd   :  { %v4583_v40 = vadd.f32 %v10293_v56, %v10292_v44  ;;  %v2778_v53 = vpack.c.bf16 %v2650_v38, %v2642_v30  ;;  %v9396_v20 = vadd.f32 %v4689_v62, %v4577_v13  ;;  %v4695_v26 = vadd.f32 %v8978_v3, %v10294_v54  ;;  %v3858_v22 = vpop.f32.mrb[84].mxu1  ;;  %v10297_v30 = vld [vmem:[#allocation66_spill] sm:$0xff]  ;;  %v10298_v38 = vld [vmem:[#allocation40_spill] sm:$0xff]  ;;  %v10308_v54 = vld [vmem:[#allocation79_spill] sm:$0xff] }
 0x2be   :  { %4931 = vmatprep.subr.bf16.mxu0 %v4930_v63  ;;  %v4586_v11 = vadd.f32 %v9061_v24, %v9053_v48  ;;  %v9402_v16 = vadd.f32 %v4692_v29, %v4580_v46  ;;  %v4698_v0 = vadd.f32 %v9063_v39, %v9055_v1  ;;  %v4589_v25 = vadd.f32 %v9078_v21, %v9070_v37  ;;  %v3860_v61 = vpop.f32.mrb[85].mxu1  ;;  %v10295_v48 = vld [vmem:[#allocation62_spill] sm:$0xff]  ;;  %v10299_v21 = vld [vmem:[#allocation71_spill] sm:$0xff]  ;;  %v10305_v44 = vld [vmem:[#allocation56_spill] sm:$0xff] }
 0x2bf   :  { %4933 = vmatpush3.bf16.msra.mxu0 %v4930_v63  ;;  %v4701_v43 = vadd.f32 %v9080_v42, %v9072_v33  ;;  %3969 = vmatmul.mubr.bf16.gmra.mrb[140].mxu1 %v2778_v53  ;;  %v9410_v57 = vadd.f32 %v4695_v26, %v4583_v40  ;;  %v4704_v3 = vadd.f32 %v9111_v18, %v9101_v10  ;;  %v10296_v24 = vld [vmem:[#allocation26_spill] sm:$0xff]  ;;  %v3861_v1 = vpop.f32.mrb[86].mxu1  ;;  %v10300_v33 = vld [vmem:[#allocation75_spill] sm:$0xff]  ;;  %v10302_v18 = vld [vmem:[#allocation73_spill] sm:$0xff]  ;;  %vm4020_vm1 = vcmask 261120  }
 0x2c0   :  { %v4744_v13 = vadd.f32 %v10296_v24, %v10295_v48  ;;  %v4707_v41 = vadd.f32 %v10298_v38, %v10297_v30  ;;  %v9418_v39 = vadd.f32 %v4698_v0, %v4586_v11  ;;  %v4747_v42 = vadd.f32 %v10300_v33, %v10299_v21  ;;  %v3863_v62 = vpop.f32.mrb[87].mxu1  ;;  %v10301_v63 = vld [vmem:[#allocation70_spill] sm:$0xff]  ;;  %v10304_v29 = vld [vmem:[#allocation55_spill] sm:$0xff]  ;;  %v10307_v40 = vld [vmem:[#allocation53_spill] sm:$0xff] }
 0x2c1   :  { %v9420_v37 = vadd.f32 %v4701_v43, %v4589_v25  ;;  %v4710_v50 = vadd.f32 %v9162_v55, %v9153_v4  ;;  %v9427_v10 = vadd.f32 %v4704_v3, %v10301_v63  ;;  %v4750_v7 = vadd.f32 %v9164_v23, %v9155_v34  ;;  %v10306_v55 = vld [vmem:[#allocation57_spill] sm:$0xff]  ;;  %v10312_v0 = vld [vmem:[#allocation67_spill] sm:$0xff]  ;;  %v10314_v43 = vld [vmem:[#allocation92_spill] sm:$0xff] }
 0x2c2   :  { %v9430_v59 = vadd.f32 %v4707_v41, %v10302_v18  ;;  %v4713_v46 = vadd.f32 %v9180_v51, %v9172_v35  ;;  %v4753_v56 = vadd.f32 %v10305_v44, %v10304_v29  ;;  %v4716_v4 = vadd.f32 %v9216_v47, %v10306_v55  ;;  %v4011_v51 = vld [vmem:[%s9650_s2 + $0x10] sm:$0xff]  ;;  %v4012_v47 = vld [vmem:[%s9650_s2 + $0x18] sm:$0xff]  ;;  %v10316_v24 = vld [vmem:[#allocation58_spill] sm:$0xff] }
 0x2c3   :  { %v9437_v17 = vadd.f32 %v4710_v50, %v10303_v9  ;;  %v4756_v53 = vadd.f32 %v9218_v8, %v10307_v40  ;;  %v4719_v34 = vadd.f32 %v9233_v14, %v9223_v58  ;;  %v4759_v23 = vadd.f32 %v9235_v15, %v9225_v19  ;;  %v10309_v8 = vld [vmem:[#allocation29_spill] sm:$0xff]  ;;  %v10315_v3 = vld [vmem:[#allocation99_spill] sm:$0xff]  ;;  %v10317_v30 = vld [vmem:[#allocation38_spill] sm:$0xff] }
 0x2c4   :  { %v9446_v26 = vadd.f32 %v4713_v46, %v10308_v54  ;;  %v4722_v35 = vadd.f32 %v9269_v52, %v9261_v27  ;;  %v9461_v11 = vadd.f32 %v4716_v4, %v10309_v8  ;;  %v4762_v58 = vadd.f32 %v9271_v28, %v9263_v5  ;;  %v10310_v14 = vld [vmem:[#allocation69_spill] sm:$0xff]  ;;  %v10313_v52 = vld [vmem:[#allocation88_spill] sm:$0xff]  ;;  %v10318_v41 = vld [vmem:[#allocation94_spill] sm:$0xff] }
 0x2c5   :  { %v4725_v19 = vadd.f32 %v10310_v14, %v9278_v32  ;;  %v10311_v15 = vld [vmem:[#allocation65_spill] sm:$0xff]  ;;  %v9470_v25 = vadd.f32 %v4719_v34, %v10313_v52  ;;  %v3690_v48 = vadd.f32 %v4744_v13, %v10315_v3  ;;  %v4768_v38 = vadd.f32 %v10317_v30, %v10316_v24  ;;  %v10320_v33 = vld [vmem:[#allocation68_spill] sm:$0xff]  ;;  %v10333_v24 = vld [vmem:[#allocation51_spill] sm:$0xff] }
 0x2c6   :  { %v4765_v27 = vadd.f32 %v10312_v0, %v10311_v15  ;;  %v9473_v61 = vadd.f32 %v4722_v35, %v10314_v43  ;;  %v10319_v5 = vld [vmem:[#allocation101_spill] sm:$0xff]  ;;  %v4934_v32 = vpack.c.bf16 %v4012_v47, %v4011_v51  ;;  %v4771_v50 = vadd.f32 %v9334_v12, %v10320_v33  ;;  %v10323_v9 = vld [vmem:[#allocation72_spill] sm:$0xff]  ;;  %v10327_v51 = vld [vmem:[#allocation114_spill] sm:$0xff] }
 0x2c7   :  { %v9479_v21 = vadd.f32 %v4725_v19, %v10318_v41  ;;  %v3693_v28 = vadd.f32 %v4747_v42, %v10319_v5  ;;  %v10321_v62 = vld [vmem:[#allocation77_spill] sm:$0xff]  ;;  %v4774_v13 = vadd.f32 %v9374_v2, %v9369_v36  ;;  %v10324_v44 = vld [vmem:[#allocation104_spill] sm:$0xff]  ;;  %v4777_v4 = vadd.f32 %v4776_v49, %v9384_v31  ;;  %v10328_v36 = vld [vmem:[#allocation107_spill] sm:$0xff] }
 0x2c8   :  { %v3851_v63 = vadd.f32 %v10321_v62, %v3690_v48  ;;  %v10322_v18 = vld [vmem:[#allocation105_spill] sm:$0xff]  ;;  %4935 = vmatprep.subr.bf16.mxu0 %v4934_v32  ;;  %v3701_v55 = vadd.f32 %v4753_v56, %v10324_v44  ;;  %v10325_v42 = vld [vmem:[#allocation112_spill] sm:$0xff]  ;;  %v3714_v47 = vadd.f32 %v4762_v58, %v10327_v51  ;;  %v3717_v2 = vadd.f32 %v4765_v27, %v10328_v36  ;;  %v10330_v49 = vld [vmem:[#allocation115_spill] sm:$0xff] }
 0x2c9   :  { %v3698_v46 = vadd.f32 %v4750_v7, %v10322_v18  ;;  %v3854_v29 = vadd.f32 %v10323_v9, %v3693_v28  ;;  %v3706_v40 = vadd.f32 %v4756_v53, %v10325_v42  ;;  %4937 = vmatpush3.bf16.msra.mxu0 %v4934_v32  ;;  %v10326_v34 = vld [vmem:[#allocation113_spill] sm:$0xff]  ;;  %v3725_v53 = vadd.f32 %v4771_v50, %v10330_v49 }
 0x2ca   :  { %v3977_v54 = vmul.f32 0.33333334, %v3851_v63  ;;  %v3709_v35 = vadd.f32 %v4759_v23, %v10326_v34  ;;  %v3862_v8 = vadd.f32 %v3861_v1, %v3701_v55  ;;  %v4778_v14 = vpop.f32.mrb[72].mxu0  ;;  %v10329_v19 = vld [vmem:[#allocation117_spill] sm:$0xff]  ;;  %v10336_v34 = vld [vmem:[#allocation64_spill] sm:$0xff] }
 0x2cb   :  { %v3859_v12 = vadd.f32 %v3858_v22, %v3698_v46  ;;  %v3978_v7 = vmul.f32 0.33333334, %v3854_v29  ;;  %v3722_v15 = vadd.f32 %v4768_v38, %v10329_v19  ;;  %v4779_v31 = vpop.f32.mrb[73].mxu0  ;;  %v10331_v0 = vld [vmem:[#allocation49_spill] sm:$0xff]  ;;  %v10332_v22 = vld [vmem:[#allocation106_spill] sm:$0xff] }
 0x2cc   :  { %4882 = vmatprep.mubr.msk.f32.mxu0 %vm4020_vm1, %v3977_v54  ;;  %v9499_v52 = vadd.f32 %v4774_v13, %v10331_v0  ;;  %v9502_v23 = vadd.f32 %v4777_v4, %v10332_v22  ;;  %v3980_v1 = vmul.f32 0.33333334, %v3862_v8  ;;  %v4780_v58 = vadd.f32 %v4779_v31, %v4778_v14  ;;  %v4781_v43 = vpop.f32.mrb[74].mxu0  ;;  %v10334_v28 = vld [vmem:[#allocation9_spill] sm:$0xff]  ;;  %v10335_v4 = vld [vmem:[#allocation63_spill] sm:$0xff] }
 0x2cd   :  { %v3979_v56 = vmul.f32 0.33333334, %v3859_v12  ;;  %4883 = vmatmul.mubr.msk.f32.vlgmr.msra.gmra.mrb[112].mxu0 %vm4020_vm1, %v3978_v7  ;;  %v4782_v27 = vpop.f32.mrb[75].mxu0 }
 0x2ce   :  { %v4783_v48 = vadd.f32 %v4782_v27, %v4781_v43  ;;  %v9507_v30 = vadd.f32 %v4780_v58, %v10333_v24 }
 0x2cf   :  { %4885 = vmatprep.mubr.msk.f32.mxu0 %vm4020_vm1, %v3979_v56  ;;  %v3866_v3 = vpop.f32.mrb[88].mxu1 }
 0x2d0   :  { %v3867_v38 = vadd.f32 %v3866_v3, %v3706_v40  ;;  %v3868_v41 = vpop.f32.mrb[89].mxu1  ;;  %v9511_v32 = vadd.f32 %v4783_v48, %v10334_v28 }
 0x2d1   :  { %4886 = vmatmul.mubr.msk.f32.gmra.mrb[114].mxu0 %vm4020_vm1, %v3980_v1  ;;  %v3869_v5 = vpop.f32.mrb[90].mxu1 }
 0x2d2   :  { %v3981_v33 = vmul.f32 0.33333334, %v3867_v38  ;;  %v3870_v50 = vadd.f32 %v3869_v5, %v3709_v35  ;;  %v3871_v62 = vpop.f32.mrb[91].mxu1 }
 0x2d4   :  { %v3982_v63 = vmul.f32 0.33333334, %v3870_v50  ;;  %4888 = vmatprep.mubr.msk.f32.mxu0 %vm4020_vm1, %v3981_v33 }
 0x2d6   :  { %4889 = vmatmul.mubr.msk.f32.gmra.mrb[116].mxu0 %vm4020_vm1, %v3982_v63 }
 0x2dd   :  { %v4784_v18 = vpop.f32.mrb[76].mxu0 }
 0x2de   :  { %v4785_v46 = vpop.f32.mrb[77].mxu0 }
 0x2df   :  { %v4786_v13 = vadd.f32 %v4785_v46, %v4784_v18  ;;  %v4787_v9 = vpop.f32.mrb[78].mxu0 }
 0x2e0   :  { %v4788_v29 = vpop.f32.mrb[79].mxu0 }
 0x2e1   :  { %v3874_v44 = vpop.f32.mrb[92].mxu1  ;;  %v4789_v55 = vadd.f32 %v4788_v29, %v4787_v9  ;;  %v9516_v42 = vadd.f32 %v4786_v13, %v10335_v4 }
 0x2e2   :  { %v3875_v40 = vadd.f32 %v3874_v44, %v3714_v47  ;;  %v3876_v54 = vpop.f32.mrb[93].mxu1 }
 0x2e3   :  { %v3877_v12 = vpop.f32.mrb[94].mxu1  ;;  %v9519_v35 = vadd.f32 %v4789_v55, %v10336_v34 }
 0x2e4   :  { %v3983_v51 = vmul.f32 0.33333334, %v3875_v40  ;;  %v3878_v7 = vadd.f32 %v3877_v12, %v3717_v2  ;;  %v3879_v8 = vpop.f32.mrb[95].mxu1 }
 0x2e6   :  { %v3984_v14 = vmul.f32 0.33333334, %v3878_v7  ;;  %4891 = vmatprep.mubr.msk.f32.mxu0 %vm4020_vm1, %v3983_v51 }
 0x2e8   :  { %4892 = vmatmul.mubr.msk.f32.gmra.mrb[118].mxu0 %vm4020_vm1, %v3984_v14 }
 0x2ee   :  { %v4790_v36 = vpop.f32.mrb[80].mxu0 }
 0x2ef   :  { %v4791_v19 = vpop.f32.mrb[81].mxu0 }
 0x2f0   :  { %v4792_v56 = vadd.f32 %v4791_v19, %v4790_v36  ;;  %v4793_v31 = vpop.f32.mrb[82].mxu0 }
 0x2f1   :  { %v4794_v49 = vpop.f32.mrb[83].mxu0 }
 0x2f2   :  { %v3882_v0 = vpop.f32.mrb[96].mxu1  ;;  %v4795_v47 = vadd.f32 %v4794_v49, %v4793_v31  ;;  %v9524_v22 = vadd.f32 %v4792_v56, %v9347_v60 }
 0x2f3   :  { %v3883_v1 = vadd.f32 %v3882_v0, %v3722_v15  ;;  %v3884_v58 = vpop.f32.mrb[97].mxu1 }
 0x2f4   :  { %v3885_v43 = vpop.f32.mrb[98].mxu1  ;;  %v9527_v2 = vadd.f32 %v4795_v47, %v9352_v6 }
 0x2f5   :  { %v3985_v27 = vmul.f32 0.33333334, %v3883_v1  ;;  %v3886_v3 = vadd.f32 %v3885_v43, %v3725_v53  ;;  %v3887_v48 = vpop.f32.mrb[99].mxu1 }
 0x2f7   :  { %v3986_v24 = vmul.f32 0.33333334, %v3886_v3  ;;  %4894 = vmatprep.mubr.msk.f32.mxu0 %vm4020_vm1, %v3985_v27 }
 0x2f9   :  { %4895 = vmatmul.mubr.msk.f32.gmra.mrb[120].mxu0 %vm4020_vm1, %v3986_v24 }
 0x300   :  { %v4796_v38 = vpop.f32.mrb[84].mxu0 }
 0x301   :  { %v4797_v41 = vpop.f32.mrb[85].mxu0 }
 0x302   :  { %v4798_v5 = vadd.f32 %v4797_v41, %v4796_v38  ;;  %v4799_v28 = vpop.f32.mrb[86].mxu0 }
 0x303   :  { %v4800_v60 = vpop.f32.mrb[87].mxu0 }
 0x304   :  { %v4801_v33 = vadd.f32 %v4800_v60, %v4799_v28  ;;  %v9532_v15 = vadd.f32 %v4798_v5, %v9388_v45  ;;  %v3890_v50 = vpop.f32.mrb[100].mxu1 }
 0x305   :  { %v3891_v6 = vadd.f32 %v3890_v50, %v9499_v52  ;;  %v3892_v62 = vpop.f32.mrb[101].mxu1 }
 0x306   :  { %v9536_v53 = vadd.f32 %v4801_v33, %v9396_v20  ;;  %v3893_v63 = vpop.f32.mrb[102].mxu1 }
 0x307   :  { %v3987_v18 = vmul.f32 0.33333334, %v3891_v6  ;;  %v3894_v46 = vadd.f32 %v3893_v63, %v9502_v23  ;;  %v3895_v13 = vpop.f32.mrb[103].mxu1 }
 0x309   :  { %v3988_v9 = vmul.f32 0.33333334, %v3894_v46  ;;  %4897 = vmatprep.mubr.msk.f32.mxu0 %vm4020_vm1, %v3987_v18 }
 0x30b   :  { %4898 = vmatmul.mubr.msk.f32.gmra.mrb[122].mxu0 %vm4020_vm1, %v3988_v9 }
 0x311   :  { %v4802_v29 = vpop.f32.mrb[88].mxu0 }
 0x312   :  { %v4803_v45 = vpop.f32.mrb[89].mxu0 }
 0x313   :  { %v4804_v44 = vadd.f32 %v4803_v45, %v4802_v29  ;;  %v4805_v55 = vpop.f32.mrb[90].mxu0 }
 0x314   :  { %v4806_v4 = vpop.f32.mrb[91].mxu0 }
 0x315   :  { %v4807_v40 = vadd.f32 %v4806_v4, %v4805_v55  ;;  %v9542_v20 = vadd.f32 %v4804_v44, %v9402_v16 }
 0x316   :  { %v3898_v52 = vpop.f32.mrb[104].mxu1 }
 0x317   :  { %v3899_v54 = vadd.f32 %v3898_v52, %v9507_v30  ;;  %v3900_v12 = vpop.f32.mrb[105].mxu1  ;;  %v9546_v34 = vadd.f32 %v4807_v40, %v9410_v57 }
 0x318   :  { %v3901_v23 = vpop.f32.mrb[106].mxu1 }
 0x319   :  { %v3989_v51 = vmul.f32 0.33333334, %v3899_v54  ;;  %v3902_v7 = vadd.f32 %v3901_v23, %v9511_v32  ;;  %v3903_v8 = vpop.f32.mrb[107].mxu1 }
 0x31b   :  { %v3990_v14 = vmul.f32 0.33333334, %v3902_v7  ;;  %4900 = vmatprep.mubr.msk.f32.mxu0 %vm4020_vm1, %v3989_v51 }
 0x31d   :  { %4901 = vmatmul.mubr.msk.f32.gmra.mrb[124].mxu0 %vm4020_vm1, %v3990_v14 }
 0x322   :  { %v4808_v36 = vpop.f32.mrb[92].mxu0 }
 0x323   :  { %v4809_v19 = vpop.f32.mrb[93].mxu0 }
 0x324   :  { %v4810_v16 = vadd.f32 %v4809_v19, %v4808_v36  ;;  %v4811_v56 = vpop.f32.mrb[94].mxu0 }
 0x325   :  { %v4812_v31 = vpop.f32.mrb[95].mxu0 }
 0x326   :  { %v4813_v49 = vadd.f32 %v4812_v31, %v4811_v56  ;;  %v9552_v0 = vadd.f32 %v4810_v16, %v9418_v39 }
 0x327   :  { %v3906_v30 = vpop.f32.mrb[108].mxu1 }
 0x328   :  { %v3907_v57 = vadd.f32 %v3906_v30, %v9516_v42  ;;  %v3908_v47 = vpop.f32.mrb[109].mxu1  ;;  %v9556_v1 = vadd.f32 %v4813_v49, %v9420_v37 }
 0x329   :  { %v3909_v32 = vpop.f32.mrb[110].mxu1 }
 0x32a   :  { %v3991_v58 = vmul.f32 0.33333334, %v3907_v57  ;;  %v3910_v43 = vadd.f32 %v3909_v32, %v9519_v35  ;;  %v3911_v27 = vpop.f32.mrb[111].mxu1 }
 0x32c   :  { %v3992_v3 = vmul.f32 0.33333334, %v3910_v43  ;;  %4903 = vmatprep.mubr.msk.f32.mxu0 %vm4020_vm1, %v3991_v58 }
 0x32e   :  { %4904 = vmatmul.mubr.msk.f32.gmra.mrb[126].mxu0 %vm4020_vm1, %v3992_v3 }
 0x335   :  { %v4814_v48 = vpop.f32.mrb[96].mxu0 }
 0x336   :  { %v4815_v24 = vpop.f32.mrb[97].mxu0 }
 0x337   :  { %v4816_v39 = vadd.f32 %v4815_v24, %v4814_v48  ;;  %v4817_v38 = vpop.f32.mrb[98].mxu0 }
 0x338   :  { %v4818_v41 = vpop.f32.mrb[99].mxu0 }
 0x339   :  { %v3914_v42 = vpop.f32.mrb[112].mxu1  ;;  %v4819_v5 = vadd.f32 %v4818_v41, %v4817_v38  ;;  %v9562_v28 = vadd.f32 %v4816_v39, %v9427_v10 }
 0x33a   :  { %v3915_v37 = vadd.f32 %v3914_v42, %v9524_v22  ;;  %v3916_v60 = vpop.f32.mrb[113].mxu1 }
 0x33b   :  { %v3917_v35 = vpop.f32.mrb[114].mxu1  ;;  %v9566_v33 = vadd.f32 %v4819_v5, %v9430_v59 }
 0x33c   :  { %v3993_v50 = vmul.f32 0.33333334, %v3915_v37  ;;  %v3918_v6 = vadd.f32 %v3917_v35, %v9527_v2  ;;  %v3919_v62 = vpop.f32.mrb[115].mxu1 }
 0x33e   :  { %v3994_v63 = vmul.f32 0.33333334, %v3918_v6  ;;  %4906 = vmatprep.mubr.msk.f32.mxu0 %vm4020_vm1, %v3993_v50 }
 0x340   :  { %4907 = vmatmul.mubr.msk.f32.gmra.mrb[128].mxu0 %vm4020_vm1, %v3994_v63 }
 0x346   :  { %v4820_v18 = vpop.f32.mrb[100].mxu0 }
 0x347   :  { %v4821_v46 = vpop.f32.mrb[101].mxu0 }
 0x348   :  { %v4822_v10 = vadd.f32 %v4821_v46, %v4820_v18  ;;  %v4823_v13 = vpop.f32.mrb[102].mxu0 }
 0x349   :  { %v4824_v9 = vpop.f32.mrb[103].mxu0 }
 0x34a   :  { %v3922_v22 = vpop.f32.mrb[116].mxu1  ;;  %v4825_v29 = vadd.f32 %v4824_v9, %v4823_v13  ;;  %v3794_v45 = vadd.f32 %v4822_v10, %v9437_v17 }
 0x34b   :  { %v3923_v59 = vadd.f32 %v3922_v22, %v9532_v15  ;;  %v3924_v44 = vpop.f32.mrb[117].mxu1 }
 0x34c   :  { %v3925_v55 = vpop.f32.mrb[118].mxu1  ;;  %v3797_v2 = vadd.f32 %v4825_v29, %v9446_v26 }
 0x34d   :  { %v3995_v4 = vmul.f32 0.33333334, %v3923_v59  ;;  %v3926_v52 = vadd.f32 %v3925_v55, %v9536_v53  ;;  %v3927_v40 = vpop.f32.mrb[119].mxu1 }
 0x34f   :  { %v3996_v54 = vmul.f32 0.33333334, %v3926_v52  ;;  %4909 = vmatprep.mubr.msk.f32.mxu0 %vm4020_vm1, %v3995_v4 }
 0x351   :  { %4910 = vmatmul.mubr.msk.f32.gmra.mrb[130].mxu0 %vm4020_vm1, %v3996_v54 }
 0x358   :  { %v4826_v12 = vpop.f32.mrb[104].mxu0 }
 0x359   :  { %v4827_v23 = vpop.f32.mrb[105].mxu0 }
 0x35a   :  { %v4828_v51 = vadd.f32 %v4827_v23, %v4826_v12  ;;  %v4829_v7 = vpop.f32.mrb[106].mxu0  ;;  %v9602_v12 = vld [vmem:[%s9651_s3] ss:$0 sm:$0xff]  ;;  %s5114_s3 = smov [#allocation2]  }
 0x35b   :  { %v4830_v17 = vpop.f32.mrb[107].mxu0  ;;  %s4379_s19 = sshll.u32 %s5114_s3, 4  ;;  %s4380_s19 = int_to_ptr.vmem [resolvable:$true] %s4379_s19 }
 0x35c   :  { %v3930_v8 = vpop.f32.mrb[120].mxu1  ;;  %v4831_v15 = vadd.f32 %v4830_v17, %v4829_v7  ;;  %v3802_v14 = vadd.f32 %v4828_v51, %v9461_v11  ;;  %s5086_s20 = scalar_lea.vmem %s4380_s19, 4096  ;;  %p5091_p1 = scmp.lt.s32.totalorder %s4380_s19, %s4380_s19 }
 0x35d   :  { %v3931_v26 = vadd.f32 %v3930_v8, %v9542_v20  ;;  %v3932_v36 = vpop.f32.mrb[121].mxu1  ;;  %p5087_p0 = scmp.ne.s32.totalorder %s4380_s19, %s5086_s20  ;;  %p5092_p2 = scmp.lt.s32.totalorder %s5086_s20, %s5086_s20 }
 0x35e   :  { %v3933_v19 = vpop.f32.mrb[122].mxu1  ;;  %v3805_v53 = vadd.f32 %v4831_v15, %v9470_v25 }
 0x35f   :  { %v3997_v16 = vmul.f32 0.33333334, %v3931_v26  ;;  %v3934_v56 = vadd.f32 %v3933_v19, %v9546_v34  ;;  %v3935_v31 = vpop.f32.mrb[123].mxu1  ;;  %p5093_p3 = por %p5092_p2, %p5091_p1 }
 0x361   :  { %v3998_v30 = vmul.f32 0.33333334, %v3934_v56  ;;  %4912 = vmatprep.mubr.msk.f32.mxu0 %vm4020_vm1, %v3997_v16  ;;  %p5094_p4 = pnand %p5093_p3, %p5087_p0 }
 0x363   :  { %4913 = vmatmul.mubr.msk.f32.gmra.mrb[132].mxu0 %vm4020_vm1, %v3998_v30 }
 0x369   :  { %v4832_v49 = vpop.f32.mrb[108].mxu0 }
 0x36a   :  { %v4833_v57 = vpop.f32.mrb[109].mxu0 }
 0x36b   :  { %v4834_v47 = vadd.f32 %v4833_v57, %v4832_v49  ;;  %v4835_v32 = vpop.f32.mrb[110].mxu0 }
 0x36c   :  { %v4836_v11 = vpop.f32.mrb[111].mxu0 }
 0x36d   :  { %v4837_v20 = vadd.f32 %v4836_v11, %v4835_v32  ;;  %v3810_v43 = vadd.f32 %v4834_v47, %v9473_v61 }
 0x36e   :  { %v3938_v58 = vpop.f32.mrb[124].mxu1 }
 0x36f   :  { %v3939_v25 = vadd.f32 %v3938_v58, %v9552_v0  ;;  %v3940_v27 = vpop.f32.mrb[125].mxu1  ;;  %v3813_v34 = vadd.f32 %v4837_v20, %v9479_v21 }
 0x370   :  { %v3941_v3 = vpop.f32.mrb[126].mxu1 }
 0x371   :  { %v3999_v48 = vmul.f32 0.33333334, %v3939_v25  ;;  %v3942_v24 = vadd.f32 %v3941_v3, %v9556_v1  ;;  %v3943_v39 = vpop.f32.mrb[127].mxu1 }
 0x373   :  { %v4000_v38 = vmul.f32 0.33333334, %v3942_v24  ;;  %4915 = vmatprep.mubr.msk.f32.mxu0 %vm4020_vm1, %v3999_v48 }
 0x375   :  { %4916 = vmatmul.mubr.msk.f32.gmra.mrb[134].mxu0 %vm4020_vm1, %v4000_v38 }
 0x377   :  { %v3946_v41 = vpop.f32.mrb[128].mxu1 }
 0x378   :  { %v3947_v42 = vadd.f32 %v3946_v41, %v9562_v28  ;;  %v3948_v5 = vpop.f32.mrb[129].mxu1 }
 0x379   :  { %v3949_v61 = vpop.f32.mrb[130].mxu1 }
 0x37a   :  { %v4001_v37 = vmul.f32 0.33333334, %v3947_v42  ;;  %v3950_v0 = vadd.f32 %v3949_v61, %v9566_v33  ;;  %v3951_v60 = vpop.f32.mrb[131].mxu1 }
 0x37c   :  { %v4002_v35 = vmul.f32 0.33333334, %v3950_v0  ;;  %4918 = vmatprep.mubr.msk.f32.mxu0 %vm4020_vm1, %v4001_v37 }
 0x37e   :  { %4919 = vmatmul.mubr.msk.f32.gmra.mrb[136].mxu0 %vm4020_vm1, %v4002_v35 }
 0x380   :  { %v3954_v21 = vpop.f32.mrb[132].mxu1 }
 0x381   :  { %v3955_v1 = vadd.f32 %v3954_v21, %v3794_v45  ;;  %v3956_v50 = vpop.f32.mrb[133].mxu1 }
 0x382   :  { %v3957_v6 = vpop.f32.mrb[134].mxu1 }
 0x383   :  { %v4003_v62 = vmul.f32 0.33333334, %v3955_v1  ;;  %v3958_v63 = vadd.f32 %v3957_v6, %v3797_v2  ;;  %v3959_v18 = vpop.f32.mrb[135].mxu1 }
 0x385   :  { %v4004_v46 = vmul.f32 0.33333334, %v3958_v63  ;;  %4921 = vmatprep.mubr.msk.f32.mxu0 %vm4020_vm1, %v4003_v62 }
 0x387   :  { %4922 = vmatmul.mubr.msk.f32.gmra.mrb[138].mxu0 %vm4020_vm1, %v4004_v46 }
 0x389   :  { %v3962_v28 = vpop.f32.mrb[136].mxu1 }
 0x38a   :  { %v3963_v33 = vadd.f32 %v3962_v28, %v3802_v14  ;;  %v3964_v10 = vpop.f32.mrb[137].mxu1 }
 0x38b   :  { %v3965_v13 = vpop.f32.mrb[138].mxu1 }
 0x38c   :  { %v4005_v9 = vmul.f32 0.33333334, %v3963_v33  ;;  %v3966_v22 = vadd.f32 %v3965_v13, %v3805_v53  ;;  %v3967_v29 = vpop.f32.mrb[139].mxu1 }
 0x38e   :  { %v4006_v59 = vmul.f32 0.33333334, %v3966_v22  ;;  %4924 = vmatprep.mubr.msk.f32.mxu0 %vm4020_vm1, %v4005_v9 }
 0x390   :  { %4925 = vmatmul.mubr.msk.f32.gmra.mrb[140].mxu0 %vm4020_vm1, %v4006_v59 }
 0x392   :  { %v3970_v45 = vpop.f32.mrb[140].mxu1 }
 0x393   :  { %v3971_v44 = vadd.f32 %v3970_v45, %v3810_v43  ;;  %v3972_v55 = vpop.f32.mrb[141].mxu1 }
 0x394   :  { %v3973_v2 = vpop.f32.mrb[142].mxu1 }
 0x395   :  { %v4007_v4 = vmul.f32 0.33333334, %v3971_v44  ;;  %v3974_v52 = vadd.f32 %v3973_v2, %v3813_v34  ;;  %v3975_v40 = vpop.f32.mrb[143].mxu1 }
 0x397   :  { %v4008_v54 = vmul.f32 0.33333334, %v3974_v52  ;;  %4927 = vmatprep.mubr.msk.f32.mxu0 %vm4020_vm1, %v4007_v4 }
 0x399   :  { %4928 = vmatmul.mubr.msk.f32.gmra.mrb[142].mxu0 %vm4020_vm1, %v4008_v54 }
 0x3a0   :  { %v4884_v23 = vpop.f32.mrb[112].mxu0 }
 0x3a1   :  { %v4189_v51 = vadd.f32 %v4884_v23, %v9602_v12  ;;  %v4183_v7 = vpop.f32.mrb[113].mxu0 }
 0x3a2   :  { %v4184_v17 = vadd.f32 %v9602_v12, %v4183_v7 }
 0x3a3   :  { %4343 = vst [vmem:[#allocation2 + $0x8] sm:$0xff] %v4189_v51 }
 0x3a4   :  { %4342 = vst [vmem:[#allocation2] sm:$0xff] %v4184_v17  ;;  %v4887_v8 = vpop.f32.mrb[114].mxu0 }
 0x3a5   :  { %v4199_v15 = vadd.f32 %v4887_v8, %v9602_v12  ;;  %v4193_v14 = vpop.f32.mrb[115].mxu0 }
 0x3a6   :  { %v4194_v26 = vadd.f32 %v9602_v12, %v4193_v14 }
 0x3a7   :  { %4345 = vst [vmem:[#allocation2 + $0x18] sm:$0xff] %v4199_v15 }
 0x3a8   :  { %4344 = vst [vmem:[#allocation2 + $0x10] sm:$0xff] %v4194_v26 }
 0x3a9   :  { %v4890_v36 = vpop.f32.mrb[116].mxu0 }
 0x3aa   :  { %v4209_v19 = vadd.f32 %v4890_v36, %v9602_v12  ;;  %v4203_v53 = vpop.f32.mrb[117].mxu0 }
 0x3ab   :  { %v4204_v16 = vadd.f32 %v9602_v12, %v4203_v53 }
 0x3ac   :  { %4347 = vst [vmem:[#allocation2 + $0x28] sm:$0xff] %v4209_v19 }
 0x3ad   :  { %4346 = vst [vmem:[#allocation2 + $0x20] sm:$0xff] %v4204_v16 }
 0x3bb   :  { %v4893_v56 = vpop.f32.mrb[118].mxu0 }
 0x3bc   :  { %v4219_v31 = vadd.f32 %v4893_v56, %v9602_v12  ;;  %v4213_v30 = vpop.f32.mrb[119].mxu0 }
 0x3bd   :  { %v4214_v49 = vadd.f32 %v9602_v12, %v4213_v30 }
 0x3be   :  { %4349 = vst [vmem:[#allocation2 + $0x38] sm:$0xff] %v4219_v31 }
 0x3bf   :  { %4348 = vst [vmem:[#allocation2 + $0x30] sm:$0xff] %v4214_v49 }
 0x3cc   :  { %v4896_v57 = vpop.f32.mrb[120].mxu0 }
 0x3cd   :  { %v4229_v47 = vadd.f32 %v4896_v57, %v9602_v12  ;;  %v4223_v32 = vpop.f32.mrb[121].mxu0 }
 0x3ce   :  { %v4224_v11 = vadd.f32 %v9602_v12, %v4223_v32 }
 0x3cf   :  { %4351 = vst [vmem:[#allocation2 + $0x48] sm:$0xff] %v4229_v47 }
 0x3d0   :  { %4350 = vst [vmem:[#allocation2 + $0x40] sm:$0xff] %v4224_v11 }
 0x3de   :  { %v4899_v58 = vpop.f32.mrb[122].mxu0 }
 0x3df   :  { %v4239_v20 = vadd.f32 %v4899_v58, %v9602_v12  ;;  %v4233_v43 = vpop.f32.mrb[123].mxu0 }
 0x3e0   :  { %v4234_v25 = vadd.f32 %v9602_v12, %v4233_v43 }
 0x3e1   :  { %4353 = vst [vmem:[#allocation2 + $0x58] sm:$0xff] %v4239_v20 }
 0x3e2   :  { %4352 = vst [vmem:[#allocation2 + $0x50] sm:$0xff] %v4234_v25 }
 0x3f0   :  { %v4902_v27 = vpop.f32.mrb[124].mxu0 }
 0x3f1   :  { %v4249_v3 = vadd.f32 %v4902_v27, %v9602_v12  ;;  %v4243_v34 = vpop.f32.mrb[125].mxu0 }
 0x3f2   :  { %v4244_v48 = vadd.f32 %v9602_v12, %v4243_v34 }
 0x3f3   :  { %4355 = vst [vmem:[#allocation2 + $0x68] sm:$0xff] %v4249_v3 }
 0x3f4   :  { %4354 = vst [vmem:[#allocation2 + $0x60] sm:$0xff] %v4244_v48 }
 0x401   :  { %v4905_v24 = vpop.f32.mrb[126].mxu0 }
 0x402   :  { %v4259_v39 = vadd.f32 %v4905_v24, %v9602_v12  ;;  %v4253_v38 = vpop.f32.mrb[127].mxu0 }
 0x403   :  { %v4254_v41 = vadd.f32 %v9602_v12, %v4253_v38 }
 0x404   :  { %4357 = vst [vmem:[#allocation2 + $0x78] sm:$0xff] %v4259_v39 }
 0x405   :  { %4356 = vst [vmem:[#allocation2 + $0x70] sm:$0xff] %v4254_v41 }
 0x413   :  { %v4908_v42 = vpop.f32.mrb[128].mxu0 }
 0x414   :  { %v4269_v5 = vadd.f32 %v4908_v42, %v9602_v12  ;;  %v4263_v61 = vpop.f32.mrb[129].mxu0 }
 0x415   :  { %v4264_v37 = vadd.f32 %v9602_v12, %v4263_v61 }
 0x416   :  { %4359 = vst [vmem:[#allocation2 + $0x88] sm:$0xff] %v4269_v5 }
 0x417   :  { %4358 = vst [vmem:[#allocation2 + $0x80] sm:$0xff] %v4264_v37 }
 0x424   :  { %v4911_v0 = vpop.f32.mrb[130].mxu0 }
 0x425   :  { %v4279_v60 = vadd.f32 %v4911_v0, %v9602_v12  ;;  %v4273_v35 = vpop.f32.mrb[131].mxu0 }
 0x426   :  { %v4274_v21 = vadd.f32 %v9602_v12, %v4273_v35 }
 0x427   :  { %4361 = vst [vmem:[#allocation2 + $0x98] sm:$0xff] %v4279_v60 }
 0x428   :  { %4360 = vst [vmem:[#allocation2 + $0x90] sm:$0xff] %v4274_v21 }
 0x436   :  { %v4914_v1 = vpop.f32.mrb[132].mxu0 }
 0x437   :  { %v4289_v50 = vadd.f32 %v4914_v1, %v9602_v12  ;;  %v4283_v6 = vpop.f32.mrb[133].mxu0 }
 0x438   :  { %v4284_v62 = vadd.f32 %v9602_v12, %v4283_v6 }
 0x439   :  { %4363 = vst [vmem:[#allocation2 + $0xa8] sm:$0xff] %v4289_v50 }
 0x43a   :  { %4362 = vst [vmem:[#allocation2 + $0xa0] sm:$0xff] %v4284_v62 }
 0x448   :  { %v4917_v63 = vpop.f32.mrb[134].mxu0 }
 0x449   :  { %v4299_v18 = vadd.f32 %v4917_v63, %v9602_v12  ;;  %v4293_v46 = vpop.f32.mrb[135].mxu0 }
 0x44a   :  { %v4294_v28 = vadd.f32 %v9602_v12, %v4293_v46 }
 0x44b   :  { %4365 = vst [vmem:[#allocation2 + $0xb8] sm:$0xff] %v4299_v18 }
 0x44c   :  { %4364 = vst [vmem:[#allocation2 + $0xb0] sm:$0xff] %v4294_v28 }
 0x451   :  { %v4920_v33 = vpop.f32.mrb[136].mxu0 }
 0x452   :  { %v4309_v10 = vadd.f32 %v4920_v33, %v9602_v12  ;;  %v4303_v13 = vpop.f32.mrb[137].mxu0 }
 0x453   :  { %v4304_v9 = vadd.f32 %v9602_v12, %v4303_v13 }
 0x454   :  { %4367 = vst [vmem:[#allocation2 + $0xc8] sm:$0xff] %v4309_v10 }
 0x455   :  { %4366 = vst [vmem:[#allocation2 + $0xc0] sm:$0xff] %v4304_v9 }
 0x45a   :  { %v4923_v22 = vpop.f32.mrb[138].mxu0 }
 0x45b   :  { %v4319_v29 = vadd.f32 %v4923_v22, %v9602_v12  ;;  %v4313_v59 = vpop.f32.mrb[139].mxu0 }
 0x45c   :  { %v4314_v45 = vadd.f32 %v9602_v12, %v4313_v59 }
 0x45d   :  { %4369 = vst [vmem:[#allocation2 + $0xd8] sm:$0xff] %v4319_v29 }
 0x45e   :  { %4368 = vst [vmem:[#allocation2 + $0xd0] sm:$0xff] %v4314_v45 }
 0x463   :  { %v4926_v44 = vpop.f32.mrb[140].mxu0 }
 0x464   :  { %v4329_v55 = vadd.f32 %v4926_v44, %v9602_v12  ;;  %v4323_v2 = vpop.f32.mrb[141].mxu0 }
 0x465   :  { %v4324_v4 = vadd.f32 %v9602_v12, %v4323_v2 }
 0x466   :  { %4371 = vst [vmem:[#allocation2 + $0xe8] sm:$0xff] %v4329_v55 }
 0x467   :  { %4370 = vst [vmem:[#allocation2 + $0xe0] sm:$0xff] %v4324_v4 }
 0x46c   :  { %v4929_v52 = vpop.f32.mrb[142].mxu0 }
 0x46d   :  { %v4339_v40 = vadd.f32 %v4929_v52, %v9602_v12  ;;  %v4333_v54 = vpop.f32.mrb[143].mxu0 }
 0x46e   :  { %v4334_v23 = vadd.f32 %v9602_v12, %v4333_v54 }
 0x46f   :  { %4373 = vst [vmem:[#allocation2 + $0xf8] sm:$0xff] %v4339_v40 }
 0x470   :  { %4372 = vst [vmem:[#allocation2 + $0xf0] sm:$0xff] %v4334_v23 }
 0x471   :  { %5097 = shalt.err (!%p5094_p4)
}
 0x472   :  { %s5098_s23 = scalar_lea.hbm %s9652_s4, 4096 }
 0x473   :  { %p5099_p5 = scmp.ne.s32.totalorder %s9652_s4, %s5098_s23  ;;  %p5102_p6 = scmp.lt.u32.totalorder %s5098_s23, %s9652_s4 }
 0x475   :  { %p5104_p7 = pnand %p5102_p6, %p5099_p5 }
 0x477   :  { %5107 = shalt.err (!%p5104_p7)
}
 0x478   :  { %s5115_s28 = smov 128   ;;  %s5116_s29 = smov 8  }
 0x479   :  { %4385 = dma.vmem_to_hbm [thread:$0]  %s4380_s19, 4096, %s9652_s4, [#allocation3], %s5115_s28, %s5115_s28, %s5116_s29  }
 0x47a   :  { %5108 = dma.done.wait [#allocation3], 4096  }
 0x47b   :  { %5109 = vsyncadd [#allocation3], 4294963200 }
 0x47c   :  { %4389 = vsyncpa [#allocation3], 1 }

</bundles_post_ra>
